<compile_context>
chip_gen: v6e
topology: v6e:2x2x1
jax: 0.10.0
libtpu: 0.0.40
codegen_flags: <defaults>
</compile_context>

<pallas_src>
import jax
import jax.numpy as jnp
import numpy as np
from jax.experimental import pallas as pl
from jax.experimental.pallas import tpu as pltpu  # noqa: F401  (TPU backend)

# ----------------------------------------------------------------------------
# Hyper-parameters.  The original module hard-codes constraints:
#   hidden_dim == in_dim            (needed by `eye + c*AXW` broadcast in GCN)
#   2 * in_dim * hidden_dim == 50   (needed by DenseGCNConv(in_channels=50))
# so in_dim = hidden_dim = 5.  N_ROI stands in for the hard-coded 116 ROIs.
# ----------------------------------------------------------------------------
IN_DIM = 5
HIDDEN_DIM = 5
N_ROI = 16
GCN_IN = 2 * IN_DIM * HIDDEN_DIM      # == 50
GCN_OUT = 128
FC1_OUT = 32
NUM_CLASSES = 2
C_GCN = 0.85


# ----------------------------------------------------------------------------
# Single fused kernel: dim_reduce (p & n) -> 3 GCN layers per branch -> head.
# 7 packed f32 operands, all resident in VMEM.
# ----------------------------------------------------------------------------
def _fused_forward_kernel(
    adj_ref,       # [2, N, B*N]  adjacencies, pre-arranged (column = b*N + n)
    kern_ref,      # [2, N, R]    kernel_p / kernel_n
    gw_ref,        # [2, 3, R, R] six GCN layer weights
    nadj_ref,      # [B, B]       nodes_adj
    wg_ref,        # [2, R*R, GCN_OUT] DenseGCNConv weight, re-laid-out
    fcw_ref,       # [GCN_OUT + FC1_OUT, FC1_OUT] packed fc1_w / fc2_w
    bias_ref,      # [3, GCN_OUT] packed gcn_b / fc1_b / fc2_b
    out_ref,       # [B, NUM_CLASSES]
):
    N = kern_ref.shape[1]
    R = kern_ref.shape[2]
    B = adj_ref.shape[2] // N
    RR = R * R

    # [R, R] identity built once, shared by all six GCN layers.
    ii = jax.lax.broadcasted_iota(jnp.int32, (R, R), 0)
    jj = jax.lax.broadcasted_iota(jnp.int32, (R, R), 1)
    eye_r = jnp.where(ii == jj, 1.0, 0.0).astype(jnp.float32)

    def gcn_norm(axw3):                                        # [B, R, R]
        y = jnp.maximum(eye_r + C_GCN * axw3, 0.0)
        col_mean = jnp.mean(y, axis=1, keepdims=True) + 1e-6   # [B, 1, R]
        return jax.nn.softplus(y / col_mean)                   # exact divide

    def branch(c):
        # ---- dim_reduce: reduced[b] = relu(K)^T @ adj[b] @ relu(K) ----------
        kp = jnp.maximum(kern_ref[c], 0.0)                     # [N, R]
        # adj_ref[c] columns are (b, n) pairs -> one shared-LHS matmul covers
        # the whole batch.
        g = jnp.dot(kp.T, adj_ref[c],
                    preferred_element_type=jnp.float32)        # [R, B*N]
        g = jnp.transpose(g.reshape(R, B, N), (1, 0, 2)).reshape(B * R, N)
        red_flat = jnp.dot(g, kp,
                           preferred_element_type=jnp.float32)  # [B*R, R]
        red3 = red_flat.reshape(B, R, R)

        gw = gw_ref[c]                                         # [3, R, R]
        w1, w2, w3 = gw[0], gw[1], gw[2]

        # ---- GCN layer 1 (x = None  =>  AXW = adj @ W, batch-folded) --------
        x3 = gcn_norm(
            jnp.dot(red_flat, w1,
                    preferred_element_type=jnp.float32).reshape(B, R, R))

        # ---- GCN layers 2-3: XW batch-folded, adj @ XW per-batch unrolled ---
        def gcn(x3, w):
            xw = jnp.dot(x3.reshape(B * R, R), w,
                         preferred_element_type=jnp.float32).reshape(B, R, R)
            axw = jnp.stack(
                [jnp.dot(red3[b], xw[b], preferred_element_type=jnp.float32)
                 for b in range(B)], axis=0)
            return gcn_norm(axw)

        x3 = gcn(x3, w2)
        x3 = gcn(x3, w3)
        return x3.reshape(B, RR)                               # [B, R*R]

    p_flat = branch(0)
    n_flat = branch(1)

    # ---- head: DenseGCNConv(50 -> 128) + fc1 + fc2 ---------------------------
    # conv_concat @ Wg fused into two full GEMMs (weights re-laid-out at trace
    # time to match torch.cat([p3, n3], -1).reshape(B, 50) row ordering).
    pre = (jnp.dot(p_flat, wg_ref[0], preferred_element_type=jnp.float32)
           + jnp.dot(n_flat, wg_ref[1], preferred_element_type=jnp.float32))

    adj = nadj_ref[...]                                        # [B, B]
    ib = jax.lax.broadcasted_iota(jnp.int32, (B, B), 0)
    jb = jax.lax.broadcasted_iota(jnp.int32, (B, B), 1)
    adj = jnp.where(ib == jb, 1.0, adj)                        # add self loops
    deg = jnp.sum(adj, axis=-1, keepdims=True)                 # [B, 1]
    dis = jax.lax.rsqrt(jnp.maximum(deg, 1.0))                 # clamp(1)^-0.5
    adj_n = dis * adj * dis.T                                  # D^-1/2 A D^-1/2

    bias = bias_ref[...]                                       # [3, 128]
    fcw = fcw_ref[...]                                         # [160, 32]

    h = jnp.dot(adj_n, pre, preferred_element_type=jnp.float32) + bias[0:1, :]
    h = (jnp.dot(h, fcw[:GCN_OUT, :], preferred_element_type=jnp.float32)
         + bias[1:2, :FC1_OUT])
    out_ref[...] = (
        jnp.dot(h, fcw[GCN_OUT:, :NUM_CLASSES],
                preferred_element_type=jnp.float32)
        + bias[2:3, :NUM_CLASSES])


# ----------------------------------------------------------------------------
# Plain-JAX glue: dim_reduce regularization losses (tiny scalar reductions).
# ----------------------------------------------------------------------------
def _dim_reduce_loss(kernel, ortho_penalty, variance_penalty, neg_penalty):
    kp = jax.nn.relu(kernel)
    gram = kp.T @ kp
    d = jnp.diagonal(gram)
    ortho = ortho_penalty * jnp.sum(jnp.square(gram - jnp.diag(d)))
    var = variance_penalty * jnp.var(d, ddof=1)            # torch .var() (unbiased)
    neg = neg_penalty * jnp.sum(jax.nn.relu(1e-6 - kernel))
    l1 = 0.05 * jnp.sum(jnp.abs(kp))
    return ortho + var + neg + l1


# ----------------------------------------------------------------------------
# Full forward pass of MyHIgcn (single fused pallas_call + scalar loss glue).
# ----------------------------------------------------------------------------
@jax.jit
def my_higcn_forward(graph_adj, nodes, nodes_adj, P):
    # model_gnn(self.graph_adj[nodes]) : A -> [2, B, N, N]
    A = jnp.swapaxes(graph_adj[nodes], 0, 1)
    _, B, N, _ = A.shape
    assert HIDDEN_DIM == IN_DIM           # GCN's `eye + c*AXW` broadcast needs this
    assert P["gcn_w"].shape[0] == GCN_IN

    # --- trace-time operand packing (7 kernel inputs instead of 22) ----------
    # Adjacency arranged as [2, N, B*N] (column index = b*N + n) so the first
    # dim_reduce contraction is a single shared-LHS matmul over the batch.
    adj_arr = jnp.swapaxes(A, 1, 2).reshape(2, N, B * N)
    kern = jnp.stack([P["kernel_p"], P["kernel_n"]])                      # [2, N, R]
    gw = jnp.stack([jnp.stack([P["gcn1_p"], P["gcn2_p"], P["gcn3_p"]]),
                    jnp.stack([P["gcn1_n"], P["gcn2_n"], P["gcn3_n"]])])  # [2,3,R,R]

    # DenseGCNConv weight rows re-laid-out to match
    #   conv_concat[b, 10*i + j]     = p3[b, i, j]
    #   conv_concat[b, 10*i + 5 + j] = n3[b, i, j]
    wg4 = P["gcn_w"].reshape(IN_DIM, 2, HIDDEN_DIM, GCN_OUT)
    wg = jnp.stack([wg4[:, 0].reshape(IN_DIM * HIDDEN_DIM, GCN_OUT),
                    wg4[:, 1].reshape(IN_DIM * HIDDEN_DIM, GCN_OUT)])     # [2,25,128]

    fcw = jnp.zeros((GCN_OUT + FC1_OUT, FC1_OUT), jnp.float32)
    fcw = fcw.at[:GCN_OUT, :].set(P["fc1_w"])
    fcw = fcw.at[GCN_OUT:, :NUM_CLASSES].set(P["fc2_w"])                  # [160, 32]

    bias = jnp.zeros((3, GCN_OUT), jnp.float32)
    bias = bias.at[0, :].set(P["gcn_b"])
    bias = bias.at[1, :FC1_OUT].set(P["fc1_b"])
    bias = bias.at[2, :NUM_CLASSES].set(P["fc2_b"])                       # [3, 128]

    out = pl.pallas_call(
        _fused_forward_kernel,
        out_shape=jax.ShapeDtypeStruct((B, NUM_CLASSES), jnp.float32),
    )(adj_arr, kern, gw, nodes_adj, wg, fcw, bias)

    # TODO(synk): np.savetxt('kernel_p.txt', ...) file side-effect skipped.
    cluster_loss = (_dim_reduce_loss(P["kernel_p"], 0.2, 0.3, 0.1)
                    + _dim_reduce_loss(P["kernel_n"], 0.2, 0.5, 0.1))
    return out, cluster_loss


# ----------------------------------------------------------------------------
# Pure-JAX reference (mirrors the PyTorch math) for a correctness check.
# ----------------------------------------------------------------------------
def _ref_forward(graph_adj, nodes, nodes_adj, P):
    hp = jax.lax.Precision.HIGHEST
    A = jnp.swapaxes(graph_adj[nodes], 0, 1)
    s_p, s_n = A[0], A[1]

    def dimred(adj, k):
        kp = jax.nn.relu(k)
        af = jnp.einsum("bnm,mr->bnr", adj, kp, precision=hp)
        return jnp.einsum("ni,bnj->bij", kp, af, precision=hp)

    def gcn(x, adj, k):
        if x is None:
            axw = jnp.einsum("bij,jh->bih", adj, k, precision=hp)
        else:
            xw = jnp.einsum("bif,fh->bih", x, k, precision=hp)
            axw = jnp.einsum("bij,bjh->bih", adj, xw, precision=hp)
        y = jax.nn.relu(jnp.eye(adj.shape[-1]) + C_GCN * axw)
        cm = jnp.mean(y, axis=-2, keepdims=True) + 1e-6
        return jax.nn.softplus(y / cm)

    pr, nr = dimred(s_p, P["kernel_p"]), dimred(s_n, P["kernel_n"])
    p = gcn(gcn(gcn(None, pr, P["gcn1_p"]), pr, P["gcn2_p"]), pr, P["gcn3_p"])
    n = gcn(gcn(gcn(None, nr, P["gcn1_n"]), nr, P["gcn2_n"]), nr, P["gcn3_n"])
    emb = jnp.concatenate([p, n], -1).reshape(p.shape[0], GCN_IN)

    adj = nodes_adj
    bb = adj.shape[0]
    adj = jnp.where(jnp.eye(bb, dtype=bool), 1.0, adj)
    out = jnp.einsum("bf,fo->bo", emb, P["gcn_w"], precision=hp)
    dis = jnp.maximum(jnp.sum(adj, -1), 1.0) ** -0.5
    adj_n = dis[:, None] * adj * dis[None, :]
    out = jnp.einsum("ij,jo->io", adj_n, out, precision=hp) + P["gcn_b"]
    out = jnp.einsum("io,oh->ih", out, P["fc1_w"], precision=hp) + P["fc1_b"]
    out = jnp.einsum("ih,hc->ic", out, P["fc2_w"], precision=hp) + P["fc2_b"]
    loss = (_dim_reduce_loss(P["kernel_p"], 0.2, 0.3, 0.1)
            + _dim_reduce_loss(P["kernel_n"], 0.2, 0.5, 0.1))
    return out, loss


# ----------------------------------------------------------------------------
# Deterministic parameter initialization (xavier-uniform like the module).
# ----------------------------------------------------------------------------
def _xavier(key, shape):
    lim = float(np.sqrt(6.0 / (shape[0] + shape[1])))
    return jax.random.uniform(key, shape, jnp.float32, -lim, lim)


if __name__ == "__main__":
    key = jax.random.PRNGKey(0)
    ks = jax.random.split(key, 16)

    params = {
        "kernel_p": _xavier(ks[0], (N_ROI, IN_DIM)),
        "kernel_n": _xavier(ks[1], (N_ROI, IN_DIM)),
        "gcn1_p": _xavier(ks[2], (IN_DIM, HIDDEN_DIM)),
        "gcn2_p": _xavier(ks[3], (HIDDEN_DIM, HIDDEN_DIM)),
        "gcn3_p": _xavier(ks[4], (HIDDEN_DIM, HIDDEN_DIM)),
        "gcn1_n": _xavier(ks[5], (IN_DIM, HIDDEN_DIM)),
        "gcn2_n": _xavier(ks[6], (HIDDEN_DIM, HIDDEN_DIM)),
        "gcn3_n": _xavier(ks[7], (HIDDEN_DIM, HIDDEN_DIM)),
        "gcn_w": _xavier(ks[8], (GCN_IN, GCN_OUT)),           # DenseGCNConv.weight
        "gcn_b": jnp.zeros((GCN_OUT,), jnp.float32),          # DenseGCNConv.bias
        "fc1_w": _xavier(ks[9], (GCN_OUT, FC1_OUT)),          # fc1 (stored [in,out])
        "fc1_b": jax.random.uniform(ks[10], (FC1_OUT,), jnp.float32, -0.1, 0.1),
        "fc2_w": _xavier(ks[11], (FC1_OUT, NUM_CLASSES)),
        "fc2_b": jax.random.uniform(ks[12], (NUM_CLASSES,), jnp.float32, -0.1, 0.1),
    }

    # graph_adj: [num_graphs, 2, N_ROI, N_ROI]; nodes selects a batch of graphs.
    graph_adj = jax.random.uniform(ks[13], (6, 2, N_ROI, N_ROI), jnp.float32)
    nodes = jnp.array([0, 2, 3, 5], dtype=jnp.int32)                  # batch B = 4
    nodes_adj = (jax.random.uniform(ks[14], (4, 4)) > 0.5).astype(jnp.float32)

    out, cluster_loss = my_higcn_forward(graph_adj, nodes, nodes_adj, params)
    out = jax.block_until_ready(out)
    cluster_loss = jax.block_until_ready(cluster_loss)

    out_ref, loss_ref = _ref_forward(graph_adj, nodes, nodes_adj, params)
    # Exact in-kernel reciprocal now -> tolerance tightened (was 2e-2 with the
    # approximate EUP reciprocal); headroom kept only for MXU f32 accumulation.
    np.testing.assert_allclose(np.asarray(out), np.asarray(out_ref),
                               rtol=2e-3, atol=2e-3)
    np.testing.assert_allclose(float(cluster_loss), float(loss_ref),
                               rtol=1e-4, atol=1e-4)

    print("KERNEL_OK")
</pallas_src>

<mosaic_0001>
module attributes {stable_mosaic.version = 11 : i64} {
  func.func @_fused_forward_kernel(%arg0: memref<2x16x64xf32, #tpu.memory_space<vmem>>, %arg1: memref<2x16x5xf32, #tpu.memory_space<vmem>>, %arg2: memref<2x3x5x5xf32, #tpu.memory_space<vmem>>, %arg3: memref<4x4xf32, #tpu.memory_space<vmem>>, %arg4: memref<2x25x128xf32, #tpu.memory_space<vmem>>, %arg5: memref<160x32xf32, #tpu.memory_space<vmem>>, %arg6: memref<3x128xf32, #tpu.memory_space<vmem>>, %arg7: memref<4x2xf32, #tpu.memory_space<vmem>>) attributes {dimension_semantics = [], scalar_prefetch = 0 : i64, scratch_operands = 0 : i64, tpu.core_type = #tpu.core_type<tc>} {
    %0 = tpu.iota {dimensions = array<i32: 0>} : vector<5x5xi32>
    %1 = tpu.iota {dimensions = array<i32: 1>} : vector<5x5xi32>
    %2 = arith.cmpi eq, %0, %1 : vector<5x5xi32>
    %cst = arith.constant 1.000000e+00 : f32
    %cst_0 = arith.constant 0.000000e+00 : f32
    %3 = vector.broadcast %cst : f32 to vector<5x5xf32>
    %4 = vector.broadcast %cst_0 : f32 to vector<5x5xf32>
    %5 = arith.select %2, %3, %4 : vector<5x5xi1>, vector<5x5xf32>
    %c0 = arith.constant 0 : index
    %c0_1 = arith.constant 0 : index
    %c0_2 = arith.constant 0 : index
    %6 = vector.load %arg1[%c0, %c0_1, %c0_2] : memref<2x16x5xf32, #tpu.memory_space<vmem>>, vector<1x16x5xf32>
    %7 = vector.shape_cast %6 : vector<1x16x5xf32> to vector<16x5xf32>
    %cst_3 = arith.constant 0.000000e+00 : f32
    %8 = vector.broadcast %cst_3 : f32 to vector<16x5xf32>
    %9 = arith.maximumf %7, %8 : vector<16x5xf32>
    %10 = tpu.transpose %9, [1, 0] : vector<16x5xf32> -> vector<5x16xf32>
    %c0_4 = arith.constant 0 : index
    %c0_5 = arith.constant 0 : index
    %c0_6 = arith.constant 0 : index
    %11 = vector.load %arg0[%c0_4, %c0_5, %c0_6] : memref<2x16x64xf32, #tpu.memory_space<vmem>>, vector<1x16x64xf32>
    %12 = vector.shape_cast %11 : vector<1x16x64xf32> to vector<16x64xf32>
    %cst_7 = arith.constant dense<0.000000e+00> : vector<5x64xf32>
    %13 = tpu.matmul %10, %12, %cst_7 {dimension_numbers = #tpu.dot_dimension_numbers<[1], [0], [0], [1], [0, 0, 1, 1], [], []>} : vector<5x16xf32>, vector<16x64xf32>, vector<5x64xf32> -> vector<5x64xf32>
    %14 = vector.shape_cast %13 : vector<5x64xf32> to vector<5x4x16xf32>
    %15 = tpu.transpose %14, [1, 0, 2] : vector<5x4x16xf32> -> vector<4x5x16xf32>
    %16 = vector.shape_cast %15 : vector<4x5x16xf32> to vector<20x16xf32>
    %cst_8 = arith.constant dense<0.000000e+00> : vector<20x5xf32>
    %17 = tpu.matmul %16, %9, %cst_8 {dimension_numbers = #tpu.dot_dimension_numbers<[1], [0], [0], [1], [0, 0, 1, 1], [], []>} : vector<20x16xf32>, vector<16x5xf32>, vector<20x5xf32> -> vector<20x5xf32>
    %18 = vector.shape_cast %17 : vector<20x5xf32> to vector<4x5x5xf32>
    %c0_9 = arith.constant 0 : index
    %c0_10 = arith.constant 0 : index
    %c0_11 = arith.constant 0 : index
    %c0_12 = arith.constant 0 : index
    %19 = vector.load %arg2[%c0_9, %c0_10, %c0_11, %c0_12] : memref<2x3x5x5xf32, #tpu.memory_space<vmem>>, vector<1x3x5x5xf32>
    %20 = vector.shape_cast %19 : vector<1x3x5x5xf32> to vector<3x5x5xf32>
    %21 = vector.extract_strided_slice %20 {offsets = [0, 0, 0], sizes = [1, 5, 5], strides = [1, 1, 1]} : vector<3x5x5xf32> to vector<1x5x5xf32>
    %22 = vector.shape_cast %21 : vector<1x5x5xf32> to vector<5x5xf32>
    %23 = vector.extract_strided_slice %20 {offsets = [1, 0, 0], sizes = [1, 5, 5], strides = [1, 1, 1]} : vector<3x5x5xf32> to vector<1x5x5xf32>
    %24 = vector.shape_cast %23 : vector<1x5x5xf32> to vector<5x5xf32>
    %25 = vector.extract_strided_slice %20 {offsets = [2, 0, 0], sizes = [1, 5, 5], strides = [1, 1, 1]} : vector<3x5x5xf32> to vector<1x5x5xf32>
    %26 = vector.shape_cast %25 : vector<1x5x5xf32> to vector<5x5xf32>
    %cst_13 = arith.constant dense<0.000000e+00> : vector<20x5xf32>
    %27 = tpu.matmul %17, %22, %cst_13 {dimension_numbers = #tpu.dot_dimension_numbers<[1], [0], [0], [1], [0, 0, 1, 1], [], []>} : vector<20x5xf32>, vector<5x5xf32>, vector<20x5xf32> -> vector<20x5xf32>
    %28 = vector.shape_cast %27 : vector<20x5xf32> to vector<4x5x5xf32>
    %cst_14 = arith.constant 8.500000e-01 : f32
    %29 = vector.broadcast %cst_14 : f32 to vector<4x5x5xf32>
    %30 = arith.mulf %29, %28 : vector<4x5x5xf32>
    %31 = vector.shape_cast %5 : vector<5x5xf32> to vector<1x5x5xf32>
    %32 = vector.broadcast %31 : vector<1x5x5xf32> to vector<4x5x5xf32>
    %33 = arith.addf %32, %30 : vector<4x5x5xf32>
    %cst_15 = arith.constant 0.000000e+00 : f32
    %34 = vector.broadcast %cst_15 : f32 to vector<4x5x5xf32>
    %35 = arith.maximumf %33, %34 : vector<4x5x5xf32>
    %cst_16 = arith.constant dense<0.000000e+00> : vector<4x5xf32>
    %36 = vector.multi_reduction <add>, %35, %cst_16 [1] : vector<4x5x5xf32> to vector<4x5xf32>
    %37 = vector.shape_cast %36 : vector<4x5xf32> to vector<4x1x5xf32>
    %cst_17 = arith.constant 5.000000e+00 : f32
    %38 = vector.broadcast %cst_17 : f32 to vector<4x1x5xf32>
    %39 = arith.divf %37, %38 : vector<4x1x5xf32>
    %cst_18 = arith.constant 9.99999997E-7 : f32
    %40 = vector.broadcast %cst_18 : f32 to vector<4x1x5xf32>
    %41 = arith.addf %39, %40 : vector<4x1x5xf32>
    %42 = vector.broadcast %41 : vector<4x1x5xf32> to vector<4x5x5xf32>
    %43 = arith.divf %35, %42 : vector<4x5x5xf32>
    %cst_19 = arith.constant 0.000000e+00 : f32
    %44 = vector.broadcast %cst_19 : f32 to vector<4x5x5xf32>
    %45 = arith.maximumf %43, %44 : vector<4x5x5xf32>
    %46 = vector.broadcast %cst_19 : f32 to vector<4x5x5xf32>
    %47 = arith.subf %43, %46 : vector<4x5x5xf32>
    %48 = arith.cmpf one, %47, %47 : vector<4x5x5xf32>
    %49 = vector.broadcast %cst_19 : f32 to vector<4x5x5xf32>
    %50 = arith.addf %43, %49 : vector<4x5x5xf32>
    %51 = math.absf %47 : vector<4x5x5xf32>
    %cst_20 = arith.constant 0.000000e+00 : f32
    %52 = vector.broadcast %cst_20 : f32 to vector<4x5x5xf32>
    %53 = arith.subf %52, %51 : vector<4x5x5xf32>
    %54 = math.exp %53 : vector<4x5x5xf32>
    %55 = math.log1p %54 : vector<4x5x5xf32>
    %56 = arith.addf %45, %55 : vector<4x5x5xf32>
    %57 = arith.select %48, %50, %56 : vector<4x5x5xi1>, vector<4x5x5xf32>
    %58 = vector.shape_cast %57 : vector<4x5x5xf32> to vector<20x5xf32>
    %cst_21 = arith.constant dense<0.000000e+00> : vector<20x5xf32>
    %59 = tpu.matmul %58, %24, %cst_21 {dimension_numbers = #tpu.dot_dimension_numbers<[1], [0], [0], [1], [0, 0, 1, 1], [], []>} : vector<20x5xf32>, vector<5x5xf32>, vector<20x5xf32> -> vector<20x5xf32>
    %60 = vector.shape_cast %59 : vector<20x5xf32> to vector<4x5x5xf32>
    %61 = vector.extract_strided_slice %18 {offsets = [0, 0, 0], sizes = [1, 5, 5], strides = [1, 1, 1]} : vector<4x5x5xf32> to vector<1x5x5xf32>
    %62 = vector.shape_cast %61 : vector<1x5x5xf32> to vector<5x5xf32>
    %63 = vector.extract_strided_slice %60 {offsets = [0, 0, 0], sizes = [1, 5, 5], strides = [1, 1, 1]} : vector<4x5x5xf32> to vector<1x5x5xf32>
    %64 = vector.shape_cast %63 : vector<1x5x5xf32> to vector<5x5xf32>
    %cst_22 = arith.constant dense<0.000000e+00> : vector<5x5xf32>
    %65 = tpu.matmul %62, %64, %cst_22 {dimension_numbers = #tpu.dot_dimension_numbers<[1], [0], [0], [1], [0, 0, 1, 1], [], []>} : vector<5x5xf32>, vector<5x5xf32>, vector<5x5xf32> -> vector<5x5xf32>
    %66 = vector.extract_strided_slice %18 {offsets = [1, 0, 0], sizes = [1, 5, 5], strides = [1, 1, 1]} : vector<4x5x5xf32> to vector<1x5x5xf32>
    %67 = vector.shape_cast %66 : vector<1x5x5xf32> to vector<5x5xf32>
    %68 = vector.extract_strided_slice %60 {offsets = [1, 0, 0], sizes = [1, 5, 5], strides = [1, 1, 1]} : vector<4x5x5xf32> to vector<1x5x5xf32>
    %69 = vector.shape_cast %68 : vector<1x5x5xf32> to vector<5x5xf32>
    %cst_23 = arith.constant dense<0.000000e+00> : vector<5x5xf32>
    %70 = tpu.matmul %67, %69, %cst_23 {dimension_numbers = #tpu.dot_dimension_numbers<[1], [0], [0], [1], [0, 0, 1, 1], [], []>} : vector<5x5xf32>, vector<5x5xf32>, vector<5x5xf32> -> vector<5x5xf32>
    %71 = vector.extract_strided_slice %18 {offsets = [2, 0, 0], sizes = [1, 5, 5], strides = [1, 1, 1]} : vector<4x5x5xf32> to vector<1x5x5xf32>
    %72 = vector.shape_cast %71 : vector<1x5x5xf32> to vector<5x5xf32>
    %73 = vector.extract_strided_slice %60 {offsets = [2, 0, 0], sizes = [1, 5, 5], strides = [1, 1, 1]} : vector<4x5x5xf32> to vector<1x5x5xf32>
    %74 = vector.shape_cast %73 : vector<1x5x5xf32> to vector<5x5xf32>
    %cst_24 = arith.constant dense<0.000000e+00> : vector<5x5xf32>
    %75 = tpu.matmul %72, %74, %cst_24 {dimension_numbers = #tpu.dot_dimension_numbers<[1], [0], [0], [1], [0, 0, 1, 1], [], []>} : vector<5x5xf32>, vector<5x5xf32>, vector<5x5xf32> -> vector<5x5xf32>
    %76 = vector.extract_strided_slice %18 {offsets = [3, 0, 0], sizes = [1, 5, 5], strides = [1, 1, 1]} : vector<4x5x5xf32> to vector<1x5x5xf32>
    %77 = vector.shape_cast %76 : vector<1x5x5xf32> to vector<5x5xf32>
    %78 = vector.extract_strided_slice %60 {offsets = [3, 0, 0], sizes = [1, 5, 5], strides = [1, 1, 1]} : vector<4x5x5xf32> to vector<1x5x5xf32>
    %79 = vector.shape_cast %78 : vector<1x5x5xf32> to vector<5x5xf32>
    %cst_25 = arith.constant dense<0.000000e+00> : vector<5x5xf32>
    %80 = tpu.matmul %77, %79, %cst_25 {dimension_numbers = #tpu.dot_dimension_numbers<[1], [0], [0], [1], [0, 0, 1, 1], [], []>} : vector<5x5xf32>, vector<5x5xf32>, vector<5x5xf32> -> vector<5x5xf32>
    %81 = vector.shape_cast %65 : vector<5x5xf32> to vector<1x5x5xf32>
    %82 = vector.shape_cast %70 : vector<5x5xf32> to vector<1x5x5xf32>
    %83 = vector.shape_cast %75 : vector<5x5xf32> to vector<1x5x5xf32>
    %84 = vector.shape_cast %80 : vector<5x5xf32> to vector<1x5x5xf32>
    %85 = tpu.concatenate %81, %82, %83, %84 in 0 : vector<1x5x5xf32>, vector<1x5x5xf32>, vector<1x5x5xf32>, vector<1x5x5xf32> -> vector<4x5x5xf32>
    %cst_26 = arith.constant 8.500000e-01 : f32
    %86 = vector.broadcast %cst_26 : f32 to vector<4x5x5xf32>
    %87 = arith.mulf %86, %85 : vector<4x5x5xf32>
    %88 = vector.shape_cast %5 : vector<5x5xf32> to vector<1x5x5xf32>
    %89 = vector.broadcast %88 : vector<1x5x5xf32> to vector<4x5x5xf32>
    %90 = arith.addf %89, %87 : vector<4x5x5xf32>
    %cst_27 = arith.constant 0.000000e+00 : f32
    %91 = vector.broadcast %cst_27 : f32 to vector<4x5x5xf32>
    %92 = arith.maximumf %90, %91 : vector<4x5x5xf32>
    %cst_28 = arith.constant dense<0.000000e+00> : vector<4x5xf32>
    %93 = vector.multi_reduction <add>, %92, %cst_28 [1] : vector<4x5x5xf32> to vector<4x5xf32>
    %94 = vector.shape_cast %93 : vector<4x5xf32> to vector<4x1x5xf32>
    %cst_29 = arith.constant 5.000000e+00 : f32
    %95 = vector.broadcast %cst_29 : f32 to vector<4x1x5xf32>
    %96 = arith.divf %94, %95 : vector<4x1x5xf32>
    %cst_30 = arith.constant 9.99999997E-7 : f32
    %97 = vector.broadcast %cst_30 : f32 to vector<4x1x5xf32>
    %98 = arith.addf %96, %97 : vector<4x1x5xf32>
    %99 = vector.broadcast %98 : vector<4x1x5xf32> to vector<4x5x5xf32>
    %100 = arith.divf %92, %99 : vector<4x5x5xf32>
    %cst_31 = arith.constant 0.000000e+00 : f32
    %101 = vector.broadcast %cst_31 : f32 to vector<4x5x5xf32>
    %102 = arith.maximumf %100, %101 : vector<4x5x5xf32>
    %103 = vector.broadcast %cst_31 : f32 to vector<4x5x5xf32>
    %104 = arith.subf %100, %103 : vector<4x5x5xf32>
    %105 = arith.cmpf one, %104, %104 : vector<4x5x5xf32>
    %106 = vector.broadcast %cst_31 : f32 to vector<4x5x5xf32>
    %107 = arith.addf %100, %106 : vector<4x5x5xf32>
    %108 = math.absf %104 : vector<4x5x5xf32>
    %cst_32 = arith.constant 0.000000e+00 : f32
    %109 = vector.broadcast %cst_32 : f32 to vector<4x5x5xf32>
    %110 = arith.subf %109, %108 : vector<4x5x5xf32>
    %111 = math.exp %110 : vector<4x5x5xf32>
    %112 = math.log1p %111 : vector<4x5x5xf32>
    %113 = arith.addf %102, %112 : vector<4x5x5xf32>
    %114 = arith.select %105, %107, %113 : vector<4x5x5xi1>, vector<4x5x5xf32>
    %115 = vector.shape_cast %114 : vector<4x5x5xf32> to vector<20x5xf32>
    %cst_33 = arith.constant dense<0.000000e+00> : vector<20x5xf32>
    %116 = tpu.matmul %115, %26, %cst_33 {dimension_numbers = #tpu.dot_dimension_numbers<[1], [0], [0], [1], [0, 0, 1, 1], [], []>} : vector<20x5xf32>, vector<5x5xf32>, vector<20x5xf32> -> vector<20x5xf32>
    %117 = vector.shape_cast %116 : vector<20x5xf32> to vector<4x5x5xf32>
    %118 = vector.extract_strided_slice %18 {offsets = [0, 0, 0], sizes = [1, 5, 5], strides = [1, 1, 1]} : vector<4x5x5xf32> to vector<1x5x5xf32>
    %119 = vector.shape_cast %118 : vector<1x5x5xf32> to vector<5x5xf32>
    %120 = vector.extract_strided_slice %117 {offsets = [0, 0, 0], sizes = [1, 5, 5], strides = [1, 1, 1]} : vector<4x5x5xf32> to vector<1x5x5xf32>
    %121 = vector.shape_cast %120 : vector<1x5x5xf32> to vector<5x5xf32>
    %cst_34 = arith.constant dense<0.000000e+00> : vector<5x5xf32>
    %122 = tpu.matmul %119, %121, %cst_34 {dimension_numbers = #tpu.dot_dimension_numbers<[1], [0], [0], [1], [0, 0, 1, 1], [], []>} : vector<5x5xf32>, vector<5x5xf32>, vector<5x5xf32> -> vector<5x5xf32>
    %123 = vector.extract_strided_slice %18 {offsets = [1, 0, 0], sizes = [1, 5, 5], strides = [1, 1, 1]} : vector<4x5x5xf32> to vector<1x5x5xf32>
    %124 = vector.shape_cast %123 : vector<1x5x5xf32> to vector<5x5xf32>
    %125 = vector.extract_strided_slice %117 {offsets = [1, 0, 0], sizes = [1, 5, 5], strides = [1, 1, 1]} : vector<4x5x5xf32> to vector<1x5x5xf32>
    %126 = vector.shape_cast %125 : vector<1x5x5xf32> to vector<5x5xf32>
    %cst_35 = arith.constant dense<0.000000e+00> : vector<5x5xf32>
    %127 = tpu.matmul %124, %126, %cst_35 {dimension_numbers = #tpu.dot_dimension_numbers<[1], [0], [0], [1], [0, 0, 1, 1], [], []>} : vector<5x5xf32>, vector<5x5xf32>, vector<5x5xf32> -> vector<5x5xf32>
    %128 = vector.extract_strided_slice %18 {offsets = [2, 0, 0], sizes = [1, 5, 5], strides = [1, 1, 1]} : vector<4x5x5xf32> to vector<1x5x5xf32>
    %129 = vector.shape_cast %128 : vector<1x5x5xf32> to vector<5x5xf32>
    %130 = vector.extract_strided_slice %117 {offsets = [2, 0, 0], sizes = [1, 5, 5], strides = [1, 1, 1]} : vector<4x5x5xf32> to vector<1x5x5xf32>
    %131 = vector.shape_cast %130 : vector<1x5x5xf32> to vector<5x5xf32>
    %cst_36 = arith.constant dense<0.000000e+00> : vector<5x5xf32>
    %132 = tpu.matmul %129, %131, %cst_36 {dimension_numbers = #tpu.dot_dimension_numbers<[1], [0], [0], [1], [0, 0, 1, 1], [], []>} : vector<5x5xf32>, vector<5x5xf32>, vector<5x5xf32> -> vector<5x5xf32>
    %133 = vector.extract_strided_slice %18 {offsets = [3, 0, 0], sizes = [1, 5, 5], strides = [1, 1, 1]} : vector<4x5x5xf32> to vector<1x5x5xf32>
    %134 = vector.shape_cast %133 : vector<1x5x5xf32> to vector<5x5xf32>
    %135 = vector.extract_strided_slice %117 {offsets = [3, 0, 0], sizes = [1, 5, 5], strides = [1, 1, 1]} : vector<4x5x5xf32> to vector<1x5x5xf32>
    %136 = vector.shape_cast %135 : vector<1x5x5xf32> to vector<5x5xf32>
    %cst_37 = arith.constant dense<0.000000e+00> : vector<5x5xf32>
    %137 = tpu.matmul %134, %136, %cst_37 {dimension_numbers = #tpu.dot_dimension_numbers<[1], [0], [0], [1], [0, 0, 1, 1], [], []>} : vector<5x5xf32>, vector<5x5xf32>, vector<5x5xf32> -> vector<5x5xf32>
    %138 = vector.shape_cast %122 : vector<5x5xf32> to vector<1x5x5xf32>
    %139 = vector.shape_cast %127 : vector<5x5xf32> to vector<1x5x5xf32>
    %140 = vector.shape_cast %132 : vector<5x5xf32> to vector<1x5x5xf32>
    %141 = vector.shape_cast %137 : vector<5x5xf32> to vector<1x5x5xf32>
    %142 = tpu.concatenate %138, %139, %140, %141 in 0 : vector<1x5x5xf32>, vector<1x5x5xf32>, vector<1x5x5xf32>, vector<1x5x5xf32> -> vector<4x5x5xf32>
    %cst_38 = arith.constant 8.500000e-01 : f32
    %143 = vector.broadcast %cst_38 : f32 to vector<4x5x5xf32>
    %144 = arith.mulf %143, %142 : vector<4x5x5xf32>
    %145 = vector.shape_cast %5 : vector<5x5xf32> to vector<1x5x5xf32>
    %146 = vector.broadcast %145 : vector<1x5x5xf32> to vector<4x5x5xf32>
    %147 = arith.addf %146, %144 : vector<4x5x5xf32>
    %cst_39 = arith.constant 0.000000e+00 : f32
    %148 = vector.broadcast %cst_39 : f32 to vector<4x5x5xf32>
    %149 = arith.maximumf %147, %148 : vector<4x5x5xf32>
    %cst_40 = arith.constant dense<0.000000e+00> : vector<4x5xf32>
    %150 = vector.multi_reduction <add>, %149, %cst_40 [1] : vector<4x5x5xf32> to vector<4x5xf32>
    %151 = vector.shape_cast %150 : vector<4x5xf32> to vector<4x1x5xf32>
    %cst_41 = arith.constant 5.000000e+00 : f32
    %152 = vector.broadcast %cst_41 : f32 to vector<4x1x5xf32>
    %153 = arith.divf %151, %152 : vector<4x1x5xf32>
    %cst_42 = arith.constant 9.99999997E-7 : f32
    %154 = vector.broadcast %cst_42 : f32 to vector<4x1x5xf32>
    %155 = arith.addf %153, %154 : vector<4x1x5xf32>
    %156 = vector.broadcast %155 : vector<4x1x5xf32> to vector<4x5x5xf32>
    %157 = arith.divf %149, %156 : vector<4x5x5xf32>
    %cst_43 = arith.constant 0.000000e+00 : f32
    %158 = vector.broadcast %cst_43 : f32 to vector<4x5x5xf32>
    %159 = arith.maximumf %157, %158 : vector<4x5x5xf32>
    %160 = vector.broadcast %cst_43 : f32 to vector<4x5x5xf32>
    %161 = arith.subf %157, %160 : vector<4x5x5xf32>
    %162 = arith.cmpf one, %161, %161 : vector<4x5x5xf32>
    %163 = vector.broadcast %cst_43 : f32 to vector<4x5x5xf32>
    %164 = arith.addf %157, %163 : vector<4x5x5xf32>
    %165 = math.absf %161 : vector<4x5x5xf32>
    %cst_44 = arith.constant 0.000000e+00 : f32
    %166 = vector.broadcast %cst_44 : f32 to vector<4x5x5xf32>
    %167 = arith.subf %166, %165 : vector<4x5x5xf32>
    %168 = math.exp %167 : vector<4x5x5xf32>
    %169 = math.log1p %168 : vector<4x5x5xf32>
    %170 = arith.addf %159, %169 : vector<4x5x5xf32>
    %171 = arith.select %162, %164, %170 : vector<4x5x5xi1>, vector<4x5x5xf32>
    %172 = vector.shape_cast %171 : vector<4x5x5xf32> to vector<4x25xf32>
    %c1 = arith.constant 1 : index
    %c0_45 = arith.constant 0 : index
    %c0_46 = arith.constant 0 : index
    %173 = vector.load %arg1[%c1, %c0_45, %c0_46] : memref<2x16x5xf32, #tpu.memory_space<vmem>>, vector<1x16x5xf32>
    %174 = vector.shape_cast %173 : vector<1x16x5xf32> to vector<16x5xf32>
    %cst_47 = arith.constant 0.000000e+00 : f32
    %175 = vector.broadcast %cst_47 : f32 to vector<16x5xf32>
    %176 = arith.maximumf %174, %175 : vector<16x5xf32>
    %177 = tpu.transpose %176, [1, 0] : vector<16x5xf32> -> vector<5x16xf32>
    %c1_48 = arith.constant 1 : index
    %c0_49 = arith.constant 0 : index
    %c0_50 = arith.constant 0 : index
    %178 = vector.load %arg0[%c1_48, %c0_49, %c0_50] : memref<2x16x64xf32, #tpu.memory_space<vmem>>, vector<1x16x64xf32>
    %179 = vector.shape_cast %178 : vector<1x16x64xf32> to vector<16x64xf32>
    %cst_51 = arith.constant dense<0.000000e+00> : vector<5x64xf32>
    %180 = tpu.matmul %177, %179, %cst_51 {dimension_numbers = #tpu.dot_dimension_numbers<[1], [0], [0], [1], [0, 0, 1, 1], [], []>} : vector<5x16xf32>, vector<16x64xf32>, vector<5x64xf32> -> vector<5x64xf32>
    %181 = vector.shape_cast %180 : vector<5x64xf32> to vector<5x4x16xf32>
    %182 = tpu.transpose %181, [1, 0, 2] : vector<5x4x16xf32> -> vector<4x5x16xf32>
    %183 = vector.shape_cast %182 : vector<4x5x16xf32> to vector<20x16xf32>
    %cst_52 = arith.constant dense<0.000000e+00> : vector<20x5xf32>
    %184 = tpu.matmul %183, %176, %cst_52 {dimension_numbers = #tpu.dot_dimension_numbers<[1], [0], [0], [1], [0, 0, 1, 1], [], []>} : vector<20x16xf32>, vector<16x5xf32>, vector<20x5xf32> -> vector<20x5xf32>
    %185 = vector.shape_cast %184 : vector<20x5xf32> to vector<4x5x5xf32>
    %c1_53 = arith.constant 1 : index
    %c0_54 = arith.constant 0 : index
    %c0_55 = arith.constant 0 : index
    %c0_56 = arith.constant 0 : index
    %186 = vector.load %arg2[%c1_53, %c0_54, %c0_55, %c0_56] : memref<2x3x5x5xf32, #tpu.memory_space<vmem>>, vector<1x3x5x5xf32>
    %187 = vector.shape_cast %186 : vector<1x3x5x5xf32> to vector<3x5x5xf32>
    %188 = vector.extract_strided_slice %187 {offsets = [0, 0, 0], sizes = [1, 5, 5], strides = [1, 1, 1]} : vector<3x5x5xf32> to vector<1x5x5xf32>
    %189 = vector.shape_cast %188 : vector<1x5x5xf32> to vector<5x5xf32>
    %190 = vector.extract_strided_slice %187 {offsets = [1, 0, 0], sizes = [1, 5, 5], strides = [1, 1, 1]} : vector<3x5x5xf32> to vector<1x5x5xf32>
    %191 = vector.shape_cast %190 : vector<1x5x5xf32> to vector<5x5xf32>
    %192 = vector.extract_strided_slice %187 {offsets = [2, 0, 0], sizes = [1, 5, 5], strides = [1, 1, 1]} : vector<3x5x5xf32> to vector<1x5x5xf32>
    %193 = vector.shape_cast %192 : vector<1x5x5xf32> to vector<5x5xf32>
    %cst_57 = arith.constant dense<0.000000e+00> : vector<20x5xf32>
    %194 = tpu.matmul %184, %189, %cst_57 {dimension_numbers = #tpu.dot_dimension_numbers<[1], [0], [0], [1], [0, 0, 1, 1], [], []>} : vector<20x5xf32>, vector<5x5xf32>, vector<20x5xf32> -> vector<20x5xf32>
    %195 = vector.shape_cast %194 : vector<20x5xf32> to vector<4x5x5xf32>
    %cst_58 = arith.constant 8.500000e-01 : f32
    %196 = vector.broadcast %cst_58 : f32 to vector<4x5x5xf32>
    %197 = arith.mulf %196, %195 : vector<4x5x5xf32>
    %198 = vector.shape_cast %5 : vector<5x5xf32> to vector<1x5x5xf32>
    %199 = vector.broadcast %198 : vector<1x5x5xf32> to vector<4x5x5xf32>
    %200 = arith.addf %199, %197 : vector<4x5x5xf32>
    %cst_59 = arith.constant 0.000000e+00 : f32
    %201 = vector.broadcast %cst_59 : f32 to vector<4x5x5xf32>
    %202 = arith.maximumf %200, %201 : vector<4x5x5xf32>
    %cst_60 = arith.constant dense<0.000000e+00> : vector<4x5xf32>
    %203 = vector.multi_reduction <add>, %202, %cst_60 [1] : vector<4x5x5xf32> to vector<4x5xf32>
    %204 = vector.shape_cast %203 : vector<4x5xf32> to vector<4x1x5xf32>
    %cst_61 = arith.constant 5.000000e+00 : f32
    %205 = vector.broadcast %cst_61 : f32 to vector<4x1x5xf32>
    %206 = arith.divf %204, %205 : vector<4x1x5xf32>
    %cst_62 = arith.constant 9.99999997E-7 : f32
    %207 = vector.broadcast %cst_62 : f32 to vector<4x1x5xf32>
    %208 = arith.addf %206, %207 : vector<4x1x5xf32>
    %209 = vector.broadcast %208 : vector<4x1x5xf32> to vector<4x5x5xf32>
    %210 = arith.divf %202, %209 : vector<4x5x5xf32>
    %cst_63 = arith.constant 0.000000e+00 : f32
    %211 = vector.broadcast %cst_63 : f32 to vector<4x5x5xf32>
    %212 = arith.maximumf %210, %211 : vector<4x5x5xf32>
    %213 = vector.broadcast %cst_63 : f32 to vector<4x5x5xf32>
    %214 = arith.subf %210, %213 : vector<4x5x5xf32>
    %215 = arith.cmpf one, %214, %214 : vector<4x5x5xf32>
    %216 = vector.broadcast %cst_63 : f32 to vector<4x5x5xf32>
    %217 = arith.addf %210, %216 : vector<4x5x5xf32>
    %218 = math.absf %214 : vector<4x5x5xf32>
    %cst_64 = arith.constant 0.000000e+00 : f32
    %219 = vector.broadcast %cst_64 : f32 to vector<4x5x5xf32>
    %220 = arith.subf %219, %218 : vector<4x5x5xf32>
    %221 = math.exp %220 : vector<4x5x5xf32>
    %222 = math.log1p %221 : vector<4x5x5xf32>
    %223 = arith.addf %212, %222 : vector<4x5x5xf32>
    %224 = arith.select %215, %217, %223 : vector<4x5x5xi1>, vector<4x5x5xf32>
    %225 = vector.shape_cast %224 : vector<4x5x5xf32> to vector<20x5xf32>
    %cst_65 = arith.constant dense<0.000000e+00> : vector<20x5xf32>
    %226 = tpu.matmul %225, %191, %cst_65 {dimension_numbers = #tpu.dot_dimension_numbers<[1], [0], [0], [1], [0, 0, 1, 1], [], []>} : vector<20x5xf32>, vector<5x5xf32>, vector<20x5xf32> -> vector<20x5xf32>
    %227 = vector.shape_cast %226 : vector<20x5xf32> to vector<4x5x5xf32>
    %228 = vector.extract_strided_slice %185 {offsets = [0, 0, 0], sizes = [1, 5, 5], strides = [1, 1, 1]} : vector<4x5x5xf32> to vector<1x5x5xf32>
    %229 = vector.shape_cast %228 : vector<1x5x5xf32> to vector<5x5xf32>
    %230 = vector.extract_strided_slice %227 {offsets = [0, 0, 0], sizes = [1, 5, 5], strides = [1, 1, 1]} : vector<4x5x5xf32> to vector<1x5x5xf32>
    %231 = vector.shape_cast %230 : vector<1x5x5xf32> to vector<5x5xf32>
    %cst_66 = arith.constant dense<0.000000e+00> : vector<5x5xf32>
    %232 = tpu.matmul %229, %231, %cst_66 {dimension_numbers = #tpu.dot_dimension_numbers<[1], [0], [0], [1], [0, 0, 1, 1], [], []>} : vector<5x5xf32>, vector<5x5xf32>, vector<5x5xf32> -> vector<5x5xf32>
    %233 = vector.extract_strided_slice %185 {offsets = [1, 0, 0], sizes = [1, 5, 5], strides = [1, 1, 1]} : vector<4x5x5xf32> to vector<1x5x5xf32>
    %234 = vector.shape_cast %233 : vector<1x5x5xf32> to vector<5x5xf32>
    %235 = vector.extract_strided_slice %227 {offsets = [1, 0, 0], sizes = [1, 5, 5], strides = [1, 1, 1]} : vector<4x5x5xf32> to vector<1x5x5xf32>
    %236 = vector.shape_cast %235 : vector<1x5x5xf32> to vector<5x5xf32>
    %cst_67 = arith.constant dense<0.000000e+00> : vector<5x5xf32>
    %237 = tpu.matmul %234, %236, %cst_67 {dimension_numbers = #tpu.dot_dimension_numbers<[1], [0], [0], [1], [0, 0, 1, 1], [], []>} : vector<5x5xf32>, vector<5x5xf32>, vector<5x5xf32> -> vector<5x5xf32>
    %238 = vector.extract_strided_slice %185 {offsets = [2, 0, 0], sizes = [1, 5, 5], strides = [1, 1, 1]} : vector<4x5x5xf32> to vector<1x5x5xf32>
    %239 = vector.shape_cast %238 : vector<1x5x5xf32> to vector<5x5xf32>
    %240 = vector.extract_strided_slice %227 {offsets = [2, 0, 0], sizes = [1, 5, 5], strides = [1, 1, 1]} : vector<4x5x5xf32> to vector<1x5x5xf32>
    %241 = vector.shape_cast %240 : vector<1x5x5xf32> to vector<5x5xf32>
    %cst_68 = arith.constant dense<0.000000e+00> : vector<5x5xf32>
    %242 = tpu.matmul %239, %241, %cst_68 {dimension_numbers = #tpu.dot_dimension_numbers<[1], [0], [0], [1], [0, 0, 1, 1], [], []>} : vector<5x5xf32>, vector<5x5xf32>, vector<5x5xf32> -> vector<5x5xf32>
    %243 = vector.extract_strided_slice %185 {offsets = [3, 0, 0], sizes = [1, 5, 5], strides = [1, 1, 1]} : vector<4x5x5xf32> to vector<1x5x5xf32>
    %244 = vector.shape_cast %243 : vector<1x5x5xf32> to vector<5x5xf32>
    %245 = vector.extract_strided_slice %227 {offsets = [3, 0, 0], sizes = [1, 5, 5], strides = [1, 1, 1]} : vector<4x5x5xf32> to vector<1x5x5xf32>
    %246 = vector.shape_cast %245 : vector<1x5x5xf32> to vector<5x5xf32>
    %cst_69 = arith.constant dense<0.000000e+00> : vector<5x5xf32>
    %247 = tpu.matmul %244, %246, %cst_69 {dimension_numbers = #tpu.dot_dimension_numbers<[1], [0], [0], [1], [0, 0, 1, 1], [], []>} : vector<5x5xf32>, vector<5x5xf32>, vector<5x5xf32> -> vector<5x5xf32>
    %248 = vector.shape_cast %232 : vector<5x5xf32> to vector<1x5x5xf32>
    %249 = vector.shape_cast %237 : vector<5x5xf32> to vector<1x5x5xf32>
    %250 = vector.shape_cast %242 : vector<5x5xf32> to vector<1x5x5xf32>
    %251 = vector.shape_cast %247 : vector<5x5xf32> to vector<1x5x5xf32>
    %252 = tpu.concatenate %248, %249, %250, %251 in 0 : vector<1x5x5xf32>, vector<1x5x5xf32>, vector<1x5x5xf32>, vector<1x5x5xf32> -> vector<4x5x5xf32>
    %cst_70 = arith.constant 8.500000e-01 : f32
    %253 = vector.broadcast %cst_70 : f32 to vector<4x5x5xf32>
    %254 = arith.mulf %253, %252 : vector<4x5x5xf32>
    %255 = vector.shape_cast %5 : vector<5x5xf32> to vector<1x5x5xf32>
    %256 = vector.broadcast %255 : vector<1x5x5xf32> to vector<4x5x5xf32>
    %257 = arith.addf %256, %254 : vector<4x5x5xf32>
    %cst_71 = arith.constant 0.000000e+00 : f32
    %258 = vector.broadcast %cst_71 : f32 to vector<4x5x5xf32>
    %259 = arith.maximumf %257, %258 : vector<4x5x5xf32>
    %cst_72 = arith.constant dense<0.000000e+00> : vector<4x5xf32>
    %260 = vector.multi_reduction <add>, %259, %cst_72 [1] : vector<4x5x5xf32> to vector<4x5xf32>
    %261 = vector.shape_cast %260 : vector<4x5xf32> to vector<4x1x5xf32>
    %cst_73 = arith.constant 5.000000e+00 : f32
    %262 = vector.broadcast %cst_73 : f32 to vector<4x1x5xf32>
    %263 = arith.divf %261, %262 : vector<4x1x5xf32>
    %cst_74 = arith.constant 9.99999997E-7 : f32
    %264 = vector.broadcast %cst_74 : f32 to vector<4x1x5xf32>
    %265 = arith.addf %263, %264 : vector<4x1x5xf32>
    %266 = vector.broadcast %265 : vector<4x1x5xf32> to vector<4x5x5xf32>
    %267 = arith.divf %259, %266 : vector<4x5x5xf32>
    %cst_75 = arith.constant 0.000000e+00 : f32
    %268 = vector.broadcast %cst_75 : f32 to vector<4x5x5xf32>
    %269 = arith.maximumf %267, %268 : vector<4x5x5xf32>
    %270 = vector.broadcast %cst_75 : f32 to vector<4x5x5xf32>
    %271 = arith.subf %267, %270 : vector<4x5x5xf32>
    %272 = arith.cmpf one, %271, %271 : vector<4x5x5xf32>
    %273 = vector.broadcast %cst_75 : f32 to vector<4x5x5xf32>
    %274 = arith.addf %267, %273 : vector<4x5x5xf32>
    %275 = math.absf %271 : vector<4x5x5xf32>
    %cst_76 = arith.constant 0.000000e+00 : f32
    %276 = vector.broadcast %cst_76 : f32 to vector<4x5x5xf32>
    %277 = arith.subf %276, %275 : vector<4x5x5xf32>
    %278 = math.exp %277 : vector<4x5x5xf32>
    %279 = math.log1p %278 : vector<4x5x5xf32>
    %280 = arith.addf %269, %279 : vector<4x5x5xf32>
    %281 = arith.select %272, %274, %280 : vector<4x5x5xi1>, vector<4x5x5xf32>
    %282 = vector.shape_cast %281 : vector<4x5x5xf32> to vector<20x5xf32>
    %cst_77 = arith.constant dense<0.000000e+00> : vector<20x5xf32>
    %283 = tpu.matmul %282, %193, %cst_77 {dimension_numbers = #tpu.dot_dimension_numbers<[1], [0], [0], [1], [0, 0, 1, 1], [], []>} : vector<20x5xf32>, vector<5x5xf32>, vector<20x5xf32> -> vector<20x5xf32>
    %284 = vector.shape_cast %283 : vector<20x5xf32> to vector<4x5x5xf32>
    %285 = vector.extract_strided_slice %185 {offsets = [0, 0, 0], sizes = [1, 5, 5], strides = [1, 1, 1]} : vector<4x5x5xf32> to vector<1x5x5xf32>
    %286 = vector.shape_cast %285 : vector<1x5x5xf32> to vector<5x5xf32>
    %287 = vector.extract_strided_slice %284 {offsets = [0, 0, 0], sizes = [1, 5, 5], strides = [1, 1, 1]} : vector<4x5x5xf32> to vector<1x5x5xf32>
    %288 = vector.shape_cast %287 : vector<1x5x5xf32> to vector<5x5xf32>
    %cst_78 = arith.constant dense<0.000000e+00> : vector<5x5xf32>
    %289 = tpu.matmul %286, %288, %cst_78 {dimension_numbers = #tpu.dot_dimension_numbers<[1], [0], [0], [1], [0, 0, 1, 1], [], []>} : vector<5x5xf32>, vector<5x5xf32>, vector<5x5xf32> -> vector<5x5xf32>
    %290 = vector.extract_strided_slice %185 {offsets = [1, 0, 0], sizes = [1, 5, 5], strides = [1, 1, 1]} : vector<4x5x5xf32> to vector<1x5x5xf32>
    %291 = vector.shape_cast %290 : vector<1x5x5xf32> to vector<5x5xf32>
    %292 = vector.extract_strided_slice %284 {offsets = [1, 0, 0], sizes = [1, 5, 5], strides = [1, 1, 1]} : vector<4x5x5xf32> to vector<1x5x5xf32>
    %293 = vector.shape_cast %292 : vector<1x5x5xf32> to vector<5x5xf32>
    %cst_79 = arith.constant dense<0.000000e+00> : vector<5x5xf32>
    %294 = tpu.matmul %291, %293, %cst_79 {dimension_numbers = #tpu.dot_dimension_numbers<[1], [0], [0], [1], [0, 0, 1, 1], [], []>} : vector<5x5xf32>, vector<5x5xf32>, vector<5x5xf32> -> vector<5x5xf32>
    %295 = vector.extract_strided_slice %185 {offsets = [2, 0, 0], sizes = [1, 5, 5], strides = [1, 1, 1]} : vector<4x5x5xf32> to vector<1x5x5xf32>
    %296 = vector.shape_cast %295 : vector<1x5x5xf32> to vector<5x5xf32>
    %297 = vector.extract_strided_slice %284 {offsets = [2, 0, 0], sizes = [1, 5, 5], strides = [1, 1, 1]} : vector<4x5x5xf32> to vector<1x5x5xf32>
    %298 = vector.shape_cast %297 : vector<1x5x5xf32> to vector<5x5xf32>
    %cst_80 = arith.constant dense<0.000000e+00> : vector<5x5xf32>
    %299 = tpu.matmul %296, %298, %cst_80 {dimension_numbers = #tpu.dot_dimension_numbers<[1], [0], [0], [1], [0, 0, 1, 1], [], []>} : vector<5x5xf32>, vector<5x5xf32>, vector<5x5xf32> -> vector<5x5xf32>
    %300 = vector.extract_strided_slice %185 {offsets = [3, 0, 0], sizes = [1, 5, 5], strides = [1, 1, 1]} : vector<4x5x5xf32> to vector<1x5x5xf32>
    %301 = vector.shape_cast %300 : vector<1x5x5xf32> to vector<5x5xf32>
    %302 = vector.extract_strided_slice %284 {offsets = [3, 0, 0], sizes = [1, 5, 5], strides = [1, 1, 1]} : vector<4x5x5xf32> to vector<1x5x5xf32>
    %303 = vector.shape_cast %302 : vector<1x5x5xf32> to vector<5x5xf32>
    %cst_81 = arith.constant dense<0.000000e+00> : vector<5x5xf32>
    %304 = tpu.matmul %301, %303, %cst_81 {dimension_numbers = #tpu.dot_dimension_numbers<[1], [0], [0], [1], [0, 0, 1, 1], [], []>} : vector<5x5xf32>, vector<5x5xf32>, vector<5x5xf32> -> vector<5x5xf32>
    %305 = vector.shape_cast %289 : vector<5x5xf32> to vector<1x5x5xf32>
    %306 = vector.shape_cast %294 : vector<5x5xf32> to vector<1x5x5xf32>
    %307 = vector.shape_cast %299 : vector<5x5xf32> to vector<1x5x5xf32>
    %308 = vector.shape_cast %304 : vector<5x5xf32> to vector<1x5x5xf32>
    %309 = tpu.concatenate %305, %306, %307, %308 in 0 : vector<1x5x5xf32>, vector<1x5x5xf32>, vector<1x5x5xf32>, vector<1x5x5xf32> -> vector<4x5x5xf32>
    %cst_82 = arith.constant 8.500000e-01 : f32
    %310 = vector.broadcast %cst_82 : f32 to vector<4x5x5xf32>
    %311 = arith.mulf %310, %309 : vector<4x5x5xf32>
    %312 = vector.shape_cast %5 : vector<5x5xf32> to vector<1x5x5xf32>
    %313 = vector.broadcast %312 : vector<1x5x5xf32> to vector<4x5x5xf32>
    %314 = arith.addf %313, %311 : vector<4x5x5xf32>
    %cst_83 = arith.constant 0.000000e+00 : f32
    %315 = vector.broadcast %cst_83 : f32 to vector<4x5x5xf32>
    %316 = arith.maximumf %314, %315 : vector<4x5x5xf32>
    %cst_84 = arith.constant dense<0.000000e+00> : vector<4x5xf32>
    %317 = vector.multi_reduction <add>, %316, %cst_84 [1] : vector<4x5x5xf32> to vector<4x5xf32>
    %318 = vector.shape_cast %317 : vector<4x5xf32> to vector<4x1x5xf32>
    %cst_85 = arith.constant 5.000000e+00 : f32
    %319 = vector.broadcast %cst_85 : f32 to vector<4x1x5xf32>
    %320 = arith.divf %318, %319 : vector<4x1x5xf32>
    %cst_86 = arith.constant 9.99999997E-7 : f32
    %321 = vector.broadcast %cst_86 : f32 to vector<4x1x5xf32>
    %322 = arith.addf %320, %321 : vector<4x1x5xf32>
    %323 = vector.broadcast %322 : vector<4x1x5xf32> to vector<4x5x5xf32>
    %324 = arith.divf %316, %323 : vector<4x5x5xf32>
    %cst_87 = arith.constant 0.000000e+00 : f32
    %325 = vector.broadcast %cst_87 : f32 to vector<4x5x5xf32>
    %326 = arith.maximumf %324, %325 : vector<4x5x5xf32>
    %327 = vector.broadcast %cst_87 : f32 to vector<4x5x5xf32>
    %328 = arith.subf %324, %327 : vector<4x5x5xf32>
    %329 = arith.cmpf one, %328, %328 : vector<4x5x5xf32>
    %330 = vector.broadcast %cst_87 : f32 to vector<4x5x5xf32>
    %331 = arith.addf %324, %330 : vector<4x5x5xf32>
    %332 = math.absf %328 : vector<4x5x5xf32>
    %cst_88 = arith.constant 0.000000e+00 : f32
    %333 = vector.broadcast %cst_88 : f32 to vector<4x5x5xf32>
    %334 = arith.subf %333, %332 : vector<4x5x5xf32>
    %335 = math.exp %334 : vector<4x5x5xf32>
    %336 = math.log1p %335 : vector<4x5x5xf32>
    %337 = arith.addf %326, %336 : vector<4x5x5xf32>
    %338 = arith.select %329, %331, %337 : vector<4x5x5xi1>, vector<4x5x5xf32>
    %339 = vector.shape_cast %338 : vector<4x5x5xf32> to vector<4x25xf32>
    %c0_89 = arith.constant 0 : index
    %c0_90 = arith.constant 0 : index
    %c0_91 = arith.constant 0 : index
    %340 = vector.load %arg4[%c0_89, %c0_90, %c0_91] : memref<2x25x128xf32, #tpu.memory_space<vmem>>, vector<1x25x128xf32>
    %341 = vector.shape_cast %340 : vector<1x25x128xf32> to vector<25x128xf32>
    %cst_92 = arith.constant dense<0.000000e+00> : vector<4x128xf32>
    %342 = tpu.matmul %172, %341, %cst_92 {dimension_numbers = #tpu.dot_dimension_numbers<[1], [0], [0], [1], [0, 0, 1, 1], [], []>} : vector<4x25xf32>, vector<25x128xf32>, vector<4x128xf32> -> vector<4x128xf32>
    %c1_93 = arith.constant 1 : index
    %c0_94 = arith.constant 0 : index
    %c0_95 = arith.constant 0 : index
    %343 = vector.load %arg4[%c1_93, %c0_94, %c0_95] : memref<2x25x128xf32, #tpu.memory_space<vmem>>, vector<1x25x128xf32>
    %344 = vector.shape_cast %343 : vector<1x25x128xf32> to vector<25x128xf32>
    %cst_96 = arith.constant dense<0.000000e+00> : vector<4x128xf32>
    %345 = tpu.matmul %339, %344, %cst_96 {dimension_numbers = #tpu.dot_dimension_numbers<[1], [0], [0], [1], [0, 0, 1, 1], [], []>} : vector<4x25xf32>, vector<25x128xf32>, vector<4x128xf32> -> vector<4x128xf32>
    %346 = arith.addf %342, %345 : vector<4x128xf32>
    %c0_97 = arith.constant 0 : index
    %c0_98 = arith.constant 0 : index
    %347 = vector.load %arg3[%c0_97, %c0_98] : memref<4x4xf32, #tpu.memory_space<vmem>>, vector<4x4xf32>
    %348 = tpu.iota {dimensions = array<i32: 0>} : vector<4x4xi32>
    %349 = tpu.iota {dimensions = array<i32: 1>} : vector<4x4xi32>
    %350 = arith.cmpi eq, %348, %349 : vector<4x4xi32>
    %cst_99 = arith.constant 1.000000e+00 : f32
    %351 = vector.broadcast %cst_99 : f32 to vector<4x4xf32>
    %352 = arith.select %350, %351, %347 : vector<4x4xi1>, vector<4x4xf32>
    %cst_100 = arith.constant dense<0.000000e+00> : vector<4xf32>
    %353 = vector.multi_reduction <add>, %352, %cst_100 [1] : vector<4x4xf32> to vector<4xf32>
    %354 = vector.shape_cast %353 : vector<4xf32> to vector<4x1xf32>
    %cst_101 = arith.constant 1.000000e+00 : f32
    %355 = vector.broadcast %cst_101 : f32 to vector<4x1xf32>
    %356 = arith.maximumf %354, %355 : vector<4x1xf32>
    %357 = math.rsqrt %356 : vector<4x1xf32>
    %358 = vector.broadcast %357 : vector<4x1xf32> to vector<4x4xf32>
    %359 = arith.mulf %358, %352 : vector<4x4xf32>
    %360 = tpu.transpose %357, [1, 0] : vector<4x1xf32> -> vector<1x4xf32>
    %361 = vector.broadcast %360 : vector<1x4xf32> to vector<4x4xf32>
    %362 = arith.mulf %359, %361 : vector<4x4xf32>
    %c0_102 = arith.constant 0 : index
    %c0_103 = arith.constant 0 : index
    %363 = vector.load %arg6[%c0_102, %c0_103] : memref<3x128xf32, #tpu.memory_space<vmem>>, vector<3x128xf32>
    %c0_104 = arith.constant 0 : index
    %c0_105 = arith.constant 0 : index
    %364 = vector.load %arg5[%c0_104, %c0_105] : memref<160x32xf32, #tpu.memory_space<vmem>>, vector<160x32xf32>
    %cst_106 = arith.constant dense<0.000000e+00> : vector<4x128xf32>
    %365 = tpu.matmul %362, %346, %cst_106 {dimension_numbers = #tpu.dot_dimension_numbers<[1], [0], [0], [1], [0, 0, 1, 1], [], []>} : vector<4x4xf32>, vector<4x128xf32>, vector<4x128xf32> -> vector<4x128xf32>
    %366 = vector.extract_strided_slice %363 {offsets = [0, 0], sizes = [1, 128], strides = [1, 1]} : vector<3x128xf32> to vector<1x128xf32>
    %367 = vector.broadcast %366 : vector<1x128xf32> to vector<4x128xf32>
    %368 = arith.addf %365, %367 : vector<4x128xf32>
    %369 = vector.extract_strided_slice %364 {offsets = [0, 0], sizes = [128, 32], strides = [1, 1]} : vector<160x32xf32> to vector<128x32xf32>
    %cst_107 = arith.constant dense<0.000000e+00> : vector<4x32xf32>
    %370 = tpu.matmul %368, %369, %cst_107 {dimension_numbers = #tpu.dot_dimension_numbers<[1], [0], [0], [1], [0, 0, 1, 1], [], []>} : vector<4x128xf32>, vector<128x32xf32>, vector<4x32xf32> -> vector<4x32xf32>
    %371 = vector.extract_strided_slice %363 {offsets = [1, 0], sizes = [1, 32], strides = [1, 1]} : vector<3x128xf32> to vector<1x32xf32>
    %372 = vector.broadcast %371 : vector<1x32xf32> to vector<4x32xf32>
    %373 = arith.addf %370, %372 : vector<4x32xf32>
    %374 = vector.extract_strided_slice %364 {offsets = [128, 0], sizes = [32, 2], strides = [1, 1]} : vector<160x32xf32> to vector<32x2xf32>
    %cst_108 = arith.constant dense<0.000000e+00> : vector<4x2xf32>
    %375 = tpu.matmul %373, %374, %cst_108 {dimension_numbers = #tpu.dot_dimension_numbers<[1], [0], [0], [1], [0, 0, 1, 1], [], []>} : vector<4x32xf32>, vector<32x2xf32>, vector<4x2xf32> -> vector<4x2xf32>
    %376 = vector.extract_strided_slice %363 {offsets = [2, 0], sizes = [1, 2], strides = [1, 1]} : vector<3x128xf32> to vector<1x2xf32>
    %377 = vector.broadcast %376 : vector<1x2xf32> to vector<4x2xf32>
    %378 = arith.addf %375, %377 : vector<4x2xf32>
    %c0_109 = arith.constant 0 : index
    %c0_110 = arith.constant 0 : index
    %379 = vector.load %arg7[%c0_109, %c0_110] : memref<4x2xf32, #tpu.memory_space<vmem>>, vector<4x2xf32>
    tpu.vector_store %arg7[%c0_109, %c0_110], %378 {strides = array<i32>} : memref<4x2xf32, #tpu.memory_space<vmem>>, vector<4x2xf32>,
    return
  }
}

</mosaic_0001>

<bundles_post_ra>
// kernel: squeeze.1
= control target key start
LH: loop header
LB: loop body
LE: loop exit
PB: predicated region body
PF: predicated region fallthrough
CT: control target
= control target key end

     0   :  { %s68_s0 = inlined_call_operand.vmem [shape: f32[5,1,5,128], index: 0, kind: input, shape index: {}]   ;;  %s69_s1 = inlined_call_operand.vmem [shape: f32[1,25,128], index: 1, kind: output, shape index: {}]  }
   0x1   :  { %v2_v0 = vld [vmem:[%s68_s0] sm:$0x1f]   ;;  %v20_v1 = vld [vmem:[%s68_s0 + $0x8] sm:$0x1f]   ;;  %v22_v2 = vld [vmem:[%s68_s0 + $0x10] sm:$0x1f]  }
   0x2   :  { %3 = vst [vmem:[%s69_s1] sm:$0x1f] %v2_v0   ;;  %21 = vst [vmem:[%s69_s1 + $0x5] sm:$0x1f] %v20_v1   ;;  %v24_v3 = vld [vmem:[%s68_s0 + $0x18] sm:$0x1f]  }
   0x3   :  { %23 = vst [vmem:[%s69_s1 + $0xa] sm:$0x1f] %v22_v2   ;;  %v26_v4 = vld [vmem:[%s68_s0 + $0x20] sm:$0x1f]   ;;  %25 = vst [vmem:[%s69_s1 + $0xf] sm:$0x1f] %v24_v3  }
   0x4   :  { %27 = vst [vmem:[%s69_s1 + $0x14] sm:$0x1f] %v26_v4  }

// kernel: my_higcn_forward.1
= control target key start
LH: loop header
LB: loop body
LE: loop exit
PB: predicated region body
PF: predicated region fallthrough
CT: control target
= control target key end

     0   :  { %v8490_v2 = vmov 0.0   ;;  %vm8491_vm0 = vmmov 0   ;;  %vm70_vm1 = vcmask 130048   ;;  %s8492_s9 = smov 80   ;;  %s8493_s10 = smov 112   ;;  %v26_v10 = vlaneseq  ;;  %s9856_s1 = inlined_call_operand.vmem [shape: f32[2,16,5], index: 1, kind: input, shape index: {}]   ;;  %s9857_s0 = inlined_call_operand.vmem [shape: f32[2,16,64], index: 0, kind: input, shape index: {}]   ;;  %s9858_s2 = inlined_call_operand.vmem [shape: f32[2,3,5,5], index: 2, kind: input, shape index: {}]   ;;  %s9859_s4 = inlined_call_operand.vmem [shape: f32[2,25,128], index: 4, kind: input, shape index: {}]   ;;  %s9860_s3 = inlined_call_operand.vmem [shape: f32[4,4], index: 3, kind: input, shape index: {}]   ;;  %s9861_s5 = inlined_call_operand.vmem [shape: f32[160,32], index: 5, kind: input, shape index: {}]   ;;  %s9862_s6 = inlined_call_operand.vmem [shape: f32[3,128], index: 6, kind: input, shape index: {}]   ;;  %s9863_s7 = inlined_call_operand.vmem [shape: f32[4,2], index: 7, kind: output, shape index: {}]  }
   0x1   :  { %v32_v0 = vld [vmem:[%s9856_s1] sm:$0xff]  ;;  %v33_v1 = vld [vmem:[%s9856_s1 + $0x8] sm:$0xff]  ;;  %8073 = vmatprep.subr.mxu0 %v8490_v2  ;;  %8077 = vmatprep.mubr.msk.f32.mxu0 %vm8491_vm0, %v8490_v2  ;;  %s8494_s11 = smov 96   ;;  %v8495_v11 = vmov 1983009808   ;;  %vm773_vm2 = vcmask 1044480  }
   0x2   :  { %v69_v3 = vld [vmem:[%s9857_s0 + $0x8] sm:$0xff]  ;;  %v34_v4 = vmax.f32 %v32_v0, 0.0  ;;  %v68_v5 = vld [vmem:[%s9857_s0] sm:$0xff]  ;;  %8104 = vmatprep.subr.mxu1 %v8490_v2  ;;  %8106 = vmatprep.mubr.msk.f32.mxu1 %vm8491_vm0, %v8490_v2  ;;  %v35_v6 = vmax.f32 %v33_v1, 0.0  ;;  %v157_v12 = vunpack.c.l.s4 %v8495_v11  ;;  %v8496_v13 = vmov 1934713408  }
   0x3   :  { %8074 = vmatpush3.msra.mxu0 %v69_v3  ;;  %v189_v14 = vunpack.c.l.s4 %v8496_v13  ;;  %v8571_v15 = vshrl.u32 %v26_v10, 7  ;;  %v8497_v31 = vmov 1966171168   ;;  %vm766_vm3 = vcmask 39936   ;;  %s8499_s25 = smov 5   ;;  %s8500_s26 = smov 15  }
   0x4   :  { %8075 = vmatprep.subr.mxu0 %v8490_v2  ;;  %36 = vxpose.xlu0.b32.start [1/2] (short) (narrow) %v34_v4, 8  ;;  %v158_v16 = vunpack.c.0.s8 %v157_v12  ;;  %v276_v32 = vunpack.c.l.s4 %v8497_v31  ;;  %vm1210_vm5 = vcmask 36864   ;;  %s8501_s24 = smov 20  }
   0x5   :  { %8076 = vmatpush3.msra.mxu0 %v68_v5  ;;  %v190_v19 = vunpack.c.0.s8 %v189_v14 }
   0x6   :  { %8080 = vmatprep.subr.mxu0 %v8490_v2  ;;  %v8574_v20 = vsub.s32 %v158_v16, %v8571_v15  ;;  %v277_v39 = vunpack.c.0.s8 %v276_v32 }
   0x7   :  { %v8577_v26 = vsub.s32 %v190_v19, %v8571_v15 }
   0x8   :  { %37 = vxpose.xlu0.b32.end [2/2] (short) (narrow) %v35_v6, 8  ;;  %v8592_v47 = vsub.s32 %v277_v39, %v8571_v15 }
  0x80   :  { %v52_v7 = vpop.trf.xlu0 }
  0x81   :  { %8078 = vmatmul.mubr.msk.f32.vlgmr.msra.gmra.mxu0 %vm70_vm1, %v52_v7 }
  0x82   :  { %8081 = vmatpush3.msra.mxu0 %v35_v6  ;;  %8084 = vmatprep.mubr.msk.f32.mxu0 %vm8491_vm0, %v8490_v2 }
  0x83   :  { %8082 = vmatprep.subr.mxu0 %v8490_v2 }
  0x84   :  { %8083 = vmatpush3.msra.mxu0 %v34_v4 }
  0x85   :  { %8093 = vmatprep.subr.mxu0 %v8490_v2 }
 0x141   :  { %v140_v8 = vpop.f32.mrf.mxu0 }
 0x142   :  { %151 = vrot.lane.b32.xlu0 %v140_v8, %s8492_s9  ;;  %145 = vrot.lane.b32.xlu1 %v140_v8, %s8493_s10 }
 0x143   :  { %v8079_v9 = vpop.f32.mrf.mxu0 }
 0x146   :  { %148 = vrot.lane.b32.xlu1 %v140_v8, %s8494_s11 }
 0x1b4   :  { %v152_v17 = vpop.permute.xlu0 %151  ;;  %v146_v18 = vpop.permute.xlu1 %145 }
 0x1b5   :  { %v170_v21 = vcombine.low %v146_v18, %v152_v17  ;;  %v171_v22 = vcombine.high %v146_v18, %v152_v17 }
 0x1b7   :  { %v178_v27 = vrot.slane %v170_v21, %v8574_v20  ;;  %v185_v28 = vrot.slane %v171_v22, %v8574_v20 }
 0x1b8   :  { %v149_v23 = vpop.permute.xlu1 %148 }
 0x1b9   :  { %v154_v24 = vcombine.low %v140_v8, %v149_v23  ;;  %v155_v25 = vcombine.high %v140_v8, %v149_v23 }
 0x1bb   :  { %v162_v29 = vrot.slane %v154_v24, %v8574_v20  ;;  %v169_v30 = vrot.slane %v155_v25, %v8574_v20 }
 0x1bd   :  { %v186_v33 = vcombine.low %v162_v29, %v178_v27  ;;  %v187_v34 = vcombine.high %v162_v29, %v178_v27  ;;  %v202_v35 = vcombine.low %v169_v30, %v185_v28 }
 0x1bf   :  { %v194_v36 = vrot.slane %v186_v33, %v8577_v26  ;;  %v201_v37 = vrot.slane %v187_v34, %v8577_v26  ;;  %v227_v38 = vrot.slane %v202_v35, %v8577_v26 }
 0x1c1   :  { %v205_v40 = vcombine.low %v194_v36, %v201_v37  ;;  %v7852_v41 = vcombine.high %v194_v36, %v201_v37  ;;  %v234_v42 = vrot.slane %v227_v38, %v8574_v20 }
 0x1c3   :  { %v212_v43 = vrot.slane %v205_v40, %v8574_v20  ;;  %v220_v44 = vrot.slane %v7852_v41, %v8574_v20  ;;  %v251_v45 = vcombine.high %v234_v42, %v8490_v2  ;;  %v258_v46 = vrot.slane %v234_v42, %v8577_v26 }
 0x1c5   :  { %v235_v48 = vcombine.low %v212_v43, %v220_v44  ;;  %v236_v49 = vcombine.high %v212_v43, %v220_v44  ;;  %v265_v50 = vrot.slane %v251_v45, %v8577_v26  ;;  %v7853_v51 = vcombine.low %v258_v46, %v258_v46 }
 0x1c6   :  { %v7854_v52 = vcombine.high %v258_v46, %v258_v46 }
 0x1c7   :  { %v243_v53 = vrot.slane %v235_v48, %v8577_v26  ;;  %v250_v54 = vrot.slane %v236_v49, %v8577_v26  ;;  %v7855_v55 = vcombine.low %v265_v50, %v265_v50  ;;  %v288_v56 = vrot.slane %v7853_v51, %v8592_v47 }
 0x1c8   :  { %v327_v57 = vrot.slane %v7854_v52, %v8592_v47  ;;  %v7856_v58 = vcombine.high %v265_v50, %v265_v50 }
 0x1c9   :  { %v266_v59 = vcombine.low %v243_v53, %v258_v46  ;;  %v267_v60 = vcombine.high %v243_v53, %v258_v46  ;;  %v268_v61 = vcombine.low %v250_v54, %v265_v50  ;;  %v269_v62 = vcombine.high %v250_v54, %v265_v50 }
 0x1ca   :  { %v366_v63 = vrot.slane %v7855_v55, %v8592_v47  ;;  %v405_v0 = vrot.slane %v7856_v58, %v8592_v47  ;;  %v303_v6 = vrot.slane %v288_v56, %v8592_v47  ;;  %v342_v7 = vrot.slane %v327_v57, %v8592_v47 }
 0x1cb   :  { %v281_v1 = vrot.slane %v266_v59, %v8592_v47  ;;  %v320_v3 = vrot.slane %v267_v60, %v8592_v47  ;;  %v359_v4 = vrot.slane %v268_v61, %v8592_v47  ;;  %v398_v5 = vrot.slane %v269_v62, %v8592_v47 }
 0x1cc   :  { %v381_v8 = vrot.slane %v366_v63, %v8592_v47  ;;  %v420_v13 = vrot.slane %v405_v0, %v8592_v47  ;;  %v763_v63 = vld [vmem:[%s9858_s2] sm:$0x1f] }
 0x1cd   :  { %v289_v9 = vcombine.high %v281_v1, %v281_v1  ;;  %v328_v11 = vcombine.high %v320_v3, %v320_v3  ;;  %v335_v12 = vrot.slane %v320_v3, %v8592_v47  ;;  %v296_v14 = vrot.slane %v281_v1, %v8592_v47 }
 0x1ce   :  { %v367_v16 = vcombine.high %v359_v4, %v359_v4  ;;  %v413_v17 = vrot.slane %v398_v5, %v8592_v47  ;;  %v406_v18 = vcombine.high %v398_v5, %v398_v5  ;;  %v374_v24 = vrot.slane %v359_v4, %v8592_v47 }
 0x1cf   :  { %v310_v19 = vrot.slane %v289_v9, %v8592_v47  ;;  %v349_v21 = vrot.slane %v328_v11, %v8592_v47  ;;  %v350_v22 = vcombine.high %v335_v12, %v335_v12  ;;  %v432_v23 = vcombine.low %v303_v6, %v335_v12 }
 0x1d0   :  { %v388_v25 = vrot.slane %v367_v16, %v8592_v47  ;;  %v482_v27 = vcombine.low %v381_v8, %v413_v17  ;;  %v427_v28 = vrot.slane %v406_v18, %v8592_v47  ;;  %v428_v32 = vcombine.high %v413_v17, %v413_v17 }
 0x1d1   :  { %v430_v29 = vcombine.low %v296_v14, %v310_v19  ;;  %v7857_v30 = vcombine.high %v296_v14, %v310_v19  ;;  %v433_v31 = vcombine.low %v349_v21, %v350_v22  ;;  %v454_v33 = vrot.slane %v432_v23, %v8592_v47 }
 0x1d2   :  { %v351_v34 = vcombine.high %v349_v21, %v349_v21  ;;  %v480_v35 = vcombine.low %v374_v24, %v388_v25  ;;  %v7858_v36 = vcombine.high %v374_v24, %v388_v25  ;;  %v429_v40 = vcombine.high %v427_v28, %v427_v28 }
 0x1d3   :  { %v440_v37 = vrot.slane %v430_v29, %v8592_v47  ;;  %v447_v38 = vrot.slane %v7857_v30, %v8592_v47  ;;  %v461_v39 = vrot.slane %v433_v31, %v8592_v47  ;;  %v510_v45 = vrot.slane %v482_v27, %v8592_v47 }
 0x1d4   :  { %v479_v41 = vcombine.low %v351_v34, %v342_v7  ;;  %v503_v42 = vrot.slane %v7858_v36, %v8592_v47  ;;  %v529_v46 = vcombine.low %v429_v40, %v420_v13  ;;  %v496_v49 = vrot.slane %v480_v35, %v8592_v47 }
 0x1d5   :  { %v462_v43 = vcombine.low %v440_v37, %v447_v38  ;;  %v463_v44 = vcombine.low %v454_v33, %v461_v39  ;;  %v528_v53 = vcombine.low %v427_v28, %v428_v32 }
 0x1d6   :  { %v489_v48 = vrot.slane %v479_v41, %v8592_v47  ;;  %v512_v52 = vcombine.low %v503_v42, %v510_v45  ;;  %v543_v56 = vrot.slane %v529_v46, %v8592_v47 }
 0x1d7   :  { %v470_v50 = vrot.slane %v462_v43, %v8592_v47  ;;  %v477_v51 = vrot.slane %v463_v44, %v8592_v47  ;;  %v536_v59 = vrot.slane %v528_v53, %v8592_v47 }
 0x1d8   :  { %v511_v54 = vcombine.low %v489_v48, %v496_v49  ;;  %v526_v58 = vrot.slane %v512_v52, %v8592_v47  ;;  %v764_v52 = vld [vmem:[%s9858_s2 + $0x8] sm:$0x1f] }
 0x1d9   :  { %v478_v55 = vcombine.low %v470_v50, %v477_v51  ;;  %v544_v61 = vcombine.low %v536_v59, %v543_v56  ;;  %8105 = vmatpush3.msk.msra.mxu1 %vm773_vm2, %v764_v52  ;;  %v8710_v56 = vand.u32 127, %v26_v10 }
 0x1da   :  { %v519_v57 = vrot.slane %v511_v54, %v8592_v47  ;;  %8115 = vmatprep.subr.mxu1 %v8490_v2 }
 0x1db   :  { %8085 = vmatmul.mubr.msk.f32.vlgmr.msra.gmra.mxu0 %vm70_vm1, %v478_v55  ;;  %v551_v62 = vrot.slane %v544_v61, %v8592_v47  ;;  %vm30_vm4 = vcmp.eq.s32.totalorder %v8571_v15, %v8710_v56 }
 0x1dc   :  { %8087 = vmatprep.mubr.msk.f32.mxu0 %vm8491_vm0, %v8490_v2  ;;  %v527_v60 = vcombine.low %v519_v57, %v526_v58  ;;  %8094 = vmatpush3.msk.msra.mxu0 %vm773_vm2, %v763_v63 }
 0x1dd   :  { %8120 = vmatprep.subr.mxu0 %v8490_v2 }
 0x1df   :  { %8088 = vmatmul.mubr.msk.f32.gmra.mxu0 %vm70_vm1, %v527_v60 }
 0x1e0   :  { %8090 = vmatprep.mubr.msk.f32.mxu0 %vm8491_vm0, %v8490_v2 }
 0x1e3   :  { %8091 = vmatmul.mubr.msk.f32.gmra.mxu0 %vm70_vm1, %v551_v62 }
 0x1e4   :  { %8095 = vmatprep.mubr.msk.f32.mxu0 %vm8491_vm0, %v8490_v2 }
 0x29b   :  { %v8646_v0 = vpop.f32.mrf.mxu0 }
 0x29c   :  { %v641_v1 = vcombine.high %v8646_v0, %v8646_v0  ;;  %8096 = vmatmul.mubr.msk.f32.vlgmr.msra.gmra.mxu0 %vm766_vm3, %v8646_v0 }
 0x29d   :  { %v8086_v3 = vpop.f32.mrf.mxu0  ;;  %8098 = vmatprep.mubr.msk.f32.mxu0 %vm8491_vm0, %v8490_v2 }
 0x29e   :  { %v655_v4 = vrot.slane %v641_v1, %v8592_v47 }
 0x29f   :  { %v629_v5 = vpop.f32.mrf.mxu0 }
 0x2a0   :  { %v657_v6 = vcombine.high %v655_v4, %v655_v4  ;;  %v8656_v7 = vrot.slane %v655_v4, %v8592_v47  ;;  %v690_v8 = vcombine.high %v629_v5, %v629_v5  ;;  %8099 = vmatmul.mubr.msk.f32.gmra.mxu0 %vm766_vm3, %v629_v5  ;;  %v697_v9 = vrot.slane %v629_v5, %v8592_v47 }
 0x2a1   :  { %v8089_v11 = vpop.f32.mrf.mxu0  ;;  %8101 = vmatprep.mubr.msk.f32.mxu0 %vm8491_vm0, %v8490_v2 }
 0x2a2   :  { %v685_v12 = vrot.slane %v657_v6, %v8592_v47  ;;  %v687_v13 = vcombine.high %v8656_v7, %v8656_v7  ;;  %v8666_v14 = vrot.slane %v690_v8, %v8592_v47  ;;  %v705_v16 = vcombine.high %v697_v9, %v697_v9 }
 0x2a3   :  { %v634_v17 = vpop.f32.mrf.mxu0  ;;  %v8669_v21 = vrot.slane %v697_v9, %v8592_v47 }
 0x2a4   :  { %v1976_v18 = vcombine.low %v685_v12, %v687_v13  ;;  %v689_v19 = vcombine.high %v685_v12, %v685_v12  ;;  %8102 = vmatmul.mubr.msk.f32.gmra.mxu0 %vm766_vm3, %v634_v17  ;;  %v706_v22 = vcombine.high %v8666_v14, %v8666_v14  ;;  %v8675_v23 = vrot.slane %v705_v16, %v8592_v47 }
 0x2a5   :  { %v8092_v24 = vpop.f32.mrf.mxu0  ;;  %8122 = vmatprep.mubr.msk.f32.mxu0 %vm8491_vm0, %v8490_v2  ;;  %v745_v27 = vrot.slane %v634_v17, %v8592_v47 }
 0x2a6   :  { %v1977_v25 = vcombine.low %v689_v19, %v8669_v21  ;;  %v8682_v28 = vrot.slane %v706_v22, %v8592_v47  ;;  %v1984_v29 = vrot.slane %v1976_v18, %v8592_v47  ;;  %v1998_v31 = vrot.slane %v8675_v23, %v8592_v47 }
 0x2a7   :  { %v746_v32 = vcombine.high %v745_v27, %v745_v27  ;;  %v753_v33 = vrot.slane %v745_v27, %v8592_v47 }
 0x2a8   :  { %v1991_v30 = vrot.slane %v1977_v25, %v8592_v47  ;;  %v738_v35 = vcombine.high %v8682_v28, %v8682_v28  ;;  %v2013_v39 = vrot.slane %v1998_v31, %v8592_v47 }
 0x2a9   :  { %v760_v36 = vrot.slane %v746_v32, %v8592_v47  ;;  %v761_v37 = vcombine.high %v753_v33, %v753_v33 }
 0x2aa   :  { %v1999_v34 = vcombine.low %v1984_v29, %v1991_v30  ;;  %v2280_v41 = vcombine.low %v738_v35, %v753_v33 }
 0x2ab   :  { %v762_v40 = vcombine.high %v760_v36, %v760_v36  ;;  %v2281_v42 = vcombine.low %v760_v36, %v761_v37  ;;  %v8728_v36 = vsel %vm30_vm4, 1.0, %v8490_v2 }
 0x2ac   :  { %v2006_v38 = vrot.slane %v1999_v34, %v8592_v47  ;;  %v2288_v44 = vrot.slane %v2280_v41, %v8592_v47 }
 0x2ad   :  { %v2295_v45 = vrot.slane %v2281_v42, %v8592_v47  ;;  %v2302_v46 = vrot.slane %v762_v40, %v8592_v47 }
 0x2ae   :  { %v8694_v43 = vcombine.low %v2006_v38, %v2013_v39 }
 0x2af   :  { %v2303_v48 = vcombine.low %v2288_v44, %v2295_v45  ;;  %v2317_v50 = vrot.slane %v2302_v46, %v8592_v47 }
 0x2b1   :  { %v2310_v49 = vrot.slane %v2303_v48, %v8592_v47 }
 0x2b3   :  { %v8701_v51 = vcombine.low %v2310_v49, %v2317_v50 }
 0x35c   :  { %v843_v53 = vpop.f32.mrf.mxu0 }
 0x35d   :  { %v860_v54 = vcombine.high %v843_v53, %v843_v53  ;;  %v867_v55 = vrot.slane %v843_v53, %v8592_v47 }
 0x35e   :  { %v8097_v57 = vpop.f32.mrf.mxu0 }
 0x35f   :  { %v874_v58 = vrot.slane %v860_v54, %v8592_v47  ;;  %v875_v59 = vcombine.high %v867_v55, %v867_v55  ;;  %v883_v60 = vrot.slane %v867_v55, %v8592_v47 }
 0x360   :  { %v848_v61 = vpop.f32.mrf.mxu0 }
 0x361   :  { %v876_v62 = vcombine.high %v874_v58, %v874_v58  ;;  %v890_v63 = vrot.slane %v874_v58, %v8592_v47  ;;  %v897_v1 = vrot.slane %v875_v59, %v8592_v47  ;;  %v905_v3 = vcombine.high %v883_v60, %v883_v60 }
 0x362   :  { %v909_v4 = vcombine.high %v848_v61, %v848_v61  ;;  %v916_v10 = vrot.slane %v848_v61, %v8592_v47  ;;  %v8100_v5 = vpop.f32.mrf.mxu0  ;;  %v1002_v12 = vmul.f32 0.85, %v883_v60 }
 0x363   :  { %v904_v6 = vrot.slane %v876_v62, %v8592_v47  ;;  %v906_v8 = vcombine.high %v890_v63, %v890_v63  ;;  %v907_v9 = vcombine.high %v897_v1, %v897_v1  ;;  %v1003_v11 = vmul.f32 0.85, %v897_v1 }
 0x364   :  { %v1006_v13 = vmul.f32 0.85, %v890_v63  ;;  %v923_v16 = vrot.slane %v909_v4, %v8592_v47  ;;  %v924_v17 = vcombine.high %v916_v10, %v916_v10  ;;  %v853_v18 = vpop.f32.mrf.mxu0  ;;  %v1004_v22 = vmul.f32 0.85, %v905_v3 }
 0x365   :  { %v908_v19 = vcombine.high %v904_v6, %v904_v6  ;;  %v1005_v24 = vmul.f32 0.85, %v907_v9  ;;  %v1007_v25 = vmul.f32 0.85, %v904_v6  ;;  %v1008_v27 = vmul.f32 0.85, %v906_v8 }
 0x366   :  { %v1042_v29 = vcombine.low %v1002_v12, %v1003_v11  ;;  %v925_v30 = vcombine.high %v923_v16, %v923_v16  ;;  %v932_v31 = vrot.slane %v916_v10, %v8592_v47  ;;  %v8103_v32 = vpop.f32.mrf.mxu0  ;;  %v939_v34 = vrot.slane %v923_v16, %v8592_v47 }
 0x367   :  { %v1043_v33 = vcombine.low %v1004_v22, %v1005_v24  ;;  %v946_v35 = vrot.slane %v924_v17, %v8592_v47  ;;  %v1064_v37 = vrot.slane %v1006_v13, %v8592_v47  ;;  %v1081_v45 = vcombine.low %v1007_v25, %v1008_v27 }
 0x368   :  { %v953_v38 = vrot.slane %v925_v30, %v8592_v47  ;;  %v954_v39 = vcombine.high %v932_v31, %v932_v31  ;;  %v1050_v40 = vrot.slane %v1042_v29, %v8592_v47  ;;  %v955_v42 = vcombine.high %v939_v34, %v939_v34 }
 0x369   :  { %v1057_v41 = vrot.slane %v1043_v33, %v8592_v47  ;;  %v956_v44 = vcombine.high %v946_v35, %v946_v35  ;;  %v1009_v46 = vmul.f32 0.85, %v908_v19  ;;  %v1010_v48 = vmul.f32 0.85, %v932_v31 }
 0x36a   :  { %v1011_v49 = vmul.f32 0.85, %v946_v35  ;;  %v1012_v52 = vmul.f32 0.85, %v954_v39  ;;  %v957_v54 = vcombine.high %v953_v38, %v953_v38  ;;  %v1014_v55 = vmul.f32 0.85, %v939_v34 }
 0x36b   :  { %v1065_v50 = vcombine.low %v1050_v40, %v1057_v41  ;;  %v1013_v53 = vmul.f32 0.85, %v956_v44  ;;  %v1015_v57 = vmul.f32 0.85, %v953_v38  ;;  %v1016_v58 = vmul.f32 0.85, %v955_v42 }
 0x36c   :  { %v1082_v59 = vcombine.low %v1009_v46, %v1010_v48  ;;  %v1079_v61 = vrot.slane %v1064_v37, %v8592_v47  ;;  %v964_v63 = vrot.slane %v853_v18, %v8592_v47  ;;  %v1089_v1 = vrot.slane %v1081_v45, %v8592_v47 }
 0x36d   :  { %v1072_v60 = vrot.slane %v1065_v50, %v8592_v47  ;;  %v1120_v62 = vcombine.low %v1012_v52, %v1013_v53  ;;  %v1103_v4 = vrot.slane %v1011_v49, %v8592_v47  ;;  %v1121_v10 = vcombine.low %v1014_v55, %v1015_v57 }
 0x36e   :  { %v1096_v3 = vrot.slane %v1082_v59, %v8592_v47  ;;  %v965_v8 = vcombine.high %v964_v63, %v964_v63  ;;  %v972_v9 = vrot.slane %v964_v63, %v8592_v47  ;;  %v1142_v13 = vrot.slane %v1016_v58, %v8592_v47 }
 0x36f   :  { %v1080_v5 = vcombine.low %v1072_v60, %v1079_v61  ;;  %v1128_v6 = vrot.slane %v1120_v62, %v8592_v47  ;;  %v1135_v12 = vrot.slane %v1121_v10, %v8592_v47  ;;  %v1017_v16 = vmul.f32 0.85, %v957_v54 }
 0x370   :  { %v1104_v11 = vcombine.low %v1089_v1, %v1096_v3  ;;  %v979_v18 = vrot.slane %v965_v8, %v8592_v47  ;;  %v980_v19 = vcombine.high %v972_v9, %v972_v9  ;;  %v1118_v24 = vrot.slane %v1103_v4, %v8592_v47 }
 0x371   :  { %v8745_v17 = vadd.f32 %v1080_v5, %v8728_v36  ;;  %v1143_v25 = vcombine.low %v1128_v6, %v1135_v12  ;;  %v1018_v27 = vmul.f32 0.85, %v972_v9  ;;  %v1157_v35 = vrot.slane %v1142_v13, %v8592_v47 }
 0x372   :  { %v1111_v22 = vrot.slane %v1104_v11, %v8592_v47  ;;  %v981_v30 = vcombine.high %v979_v18, %v979_v18  ;;  %v1019_v31 = vmul.f32 0.85, %v979_v18  ;;  %v1020_v32 = vmul.f32 0.85, %v980_v19 }
 0x373   :  { %v1206_v29 = vmax.f32 %v8745_v17, 0.0  ;;  %v1150_v34 = vrot.slane %v1143_v25, %v8592_v47  ;;  %v1159_v37 = vcombine.low %v1017_v16, %v1018_v27 }
 0x374   :  { %v1119_v33 = vcombine.low %v1111_v22, %v1118_v24  ;;  %v1021_v39 = vmul.f32 0.85, %v981_v30  ;;  %v1160_v40 = vcombine.low %v1019_v31, %v1020_v32 }
 0x375   :  { %v1211_v38 = vsel %vm1210_vm5, %v1206_v29, 0.0  ;;  %v1158_v42 = vcombine.low %v1150_v34, %v1157_v35  ;;  %v1167_v45 = vrot.slane %v1159_v37, %v8592_v47 }
 0x376   :  { %v1212_v41 = vrot.slane %v1211_v38, 4  ;;  %v1203_v44 = vadd.f32 %v1119_v33, %v8728_v36  ;;  %v1174_v46 = vrot.slane %v1160_v40, %v8592_v47  ;;  %v1181_v48 = vrot.slane %v1021_v39, %v8592_v47 }
 0x377   :  { %v1204_v50 = vadd.f32 %v1158_v42, %v8728_v36 }
 0x378   :  { %v1213_v49 = vadd.f32 %v1212_v41, %v1211_v38  ;;  %v1207_v52 = vmax.f32 %v1203_v44, 0.0  ;;  %v1182_v53 = vcombine.low %v1167_v45, %v1174_v46  ;;  %v1196_v60 = vrot.slane %v1181_v48, %v8592_v47 }
 0x379   :  { %v1208_v55 = vmax.f32 %v1204_v50, 0.0 }
 0x37a   :  { %v1214_v54 = vrot.slane %v1213_v49, 2  ;;  %v1218_v57 = vsel %vm1210_vm5, %v1207_v52, 0.0  ;;  %v1189_v59 = vrot.slane %v1182_v53, %v8592_v47 }
 0x37b   :  { %v1219_v58 = vrot.slane %v1218_v57, 4  ;;  %v1225_v62 = vsel %vm1210_vm5, %v1208_v55, 0.0 }
 0x37c   :  { %v1215_v61 = vadd.f32 %v1214_v54, %v1213_v49  ;;  %v1226_v1 = vrot.slane %v1225_v62, 4  ;;  %v1197_v3 = vcombine.low %v1189_v59, %v1196_v60 }
 0x37d   :  { %v1220_v63 = vadd.f32 %v1219_v58, %v1218_v57 }
 0x37e   :  { %v1216_v4 = vrot.slane %v1215_v61, 1  ;;  %v1227_v5 = vadd.f32 %v1226_v1, %v1225_v62  ;;  %v1205_v6 = vadd.f32 %v1197_v3, %v8728_v36 }
 0x37f   :  { %v1221_v10 = vrot.slane %v1220_v63, 2 }
 0x380   :  { %v1217_v8 = vadd.f32 %v1216_v4, %v1215_v61  ;;  %v1228_v11 = vrot.slane %v1227_v5, 2  ;;  %v1209_v12 = vmax.f32 %v1205_v6, 0.0 }
 0x381   :  { %v1222_v9 = vadd.f32 %v1221_v10, %v1220_v63 }
 0x382   :  { %v1240_v13 = vmul.f32 0.2, %v1217_v8  ;;  %v1229_v18 = vadd.f32 %v1228_v11, %v1227_v5  ;;  %v1232_v19 = vsel %vm1210_vm5, %v1209_v12, 0.0 }
 0x383   :  { %v1223_v16 = vrot.slane %v1222_v9, 1  ;;  %v1233_v24 = vrot.slane %v1232_v19, 4 }
 0x384   :  { %v1244_v22 = vadd.f32 1e-06, %v1240_v13  ;;  %v1230_v27 = vrot.slane %v1229_v18, 1 }
 0x385   :  { %v1224_v25 = vadd.f32 %v1223_v16, %v1222_v9  ;;  %v1234_v30 = vadd.f32 %v1233_v24, %v1232_v19 }
 0x386   :  { %8344 = vrcp.f32 %v1244_v22  ;;  %v1231_v31 = vadd.f32 %v1230_v27, %v1229_v18 }
 0x387   :  { %v1241_v32 = vmul.f32 0.2, %v1224_v25  ;;  %v1235_v33 = vrot.slane %v1234_v30, 2 }
 0x388   :  { %v1242_v34 = vmul.f32 0.2, %v1231_v31 }
 0x389   :  { %v1245_v35 = vadd.f32 1e-06, %v1241_v32  ;;  %v1236_v37 = vadd.f32 %v1235_v33, %v1234_v30 }
 0x38a   :  { %v1246_v38 = vadd.f32 1e-06, %v1242_v34 }
 0x38b   :  { %8346 = vrcp.f32 %v1245_v35  ;;  %v1237_v39 = vrot.slane %v1236_v37, 1 }
 0x38c   :  { %8348 = vrcp.f32 %v1246_v38 }
 0x38d   :  { %v1238_v40 = vadd.f32 %v1237_v39, %v1236_v37 }
 0x38f   :  { %v1243_v41 = vmul.f32 0.2, %v1238_v40 }
 0x391   :  { %v1247_v42 = vadd.f32 1e-06, %v1243_v41 }
 0x393   :  { %v8345_v44 = vpop.eup %8344  ;;  %8350 = vrcp.f32 %v1247_v42 }
 0x394   :  { %v1249_v45 = vmul.f32 %v8345_v44, %v1206_v29 }
 0x396   :  { %v1268_v46 = vand.u32 2147483647, %v1249_v45  ;;  %v1256_v27 = vmax.f32 %v1249_v45, 0.0  ;;  %vm1260_vm7 = vcmp.ne.f32.partialorder %v1249_v45, %v1249_v45 }
 0x398   :  { %v8347_v48 = vpop.eup %8346  ;;  %v1272_v49 = vsub.f32 0.0, %v1268_v46 }
 0x399   :  { %v8769_v50 = vmul.f32 %v8347_v48, %v1207_v52  ;;  %v8349_v53 = vpop.eup %8348 }
 0x39a   :  { %v1276_v54 = vmul.f32 1.442695, %v1272_v49  ;;  %v8771_v57 = vmul.f32 %v8349_v53, %v1208_v55 }
 0x39b   :  { %v1269_v58 = vand.u32 2147483647, %v8769_v50  ;;  %v1257_v39 = vmax.f32 %v8769_v50, 0.0  ;;  %vm1261_vm10 = vcmp.ne.f32.partialorder %v8769_v50, %v8769_v50 }
 0x39c   :  { %8352 = vpow2.f32 %v1276_v54  ;;  %v1270_v59 = vand.u32 2147483647, %v8771_v57  ;;  %v1258_v46 = vmax.f32 %v8771_v57, 0.0  ;;  %vm1262_vm11 = vcmp.ne.f32.partialorder %v8771_v57, %v8771_v57 }
 0x39d   :  { %v1273_v60 = vsub.f32 0.0, %v1269_v58 }
 0x39e   :  { %v1274_v61 = vsub.f32 0.0, %v1270_v59 }
 0x39f   :  { %v1278_v62 = vmul.f32 1.442695, %v1273_v60 }
 0x3a0   :  { %v8351_v17 = vpop.eup %8350  ;;  %v1280_v29 = vmul.f32 1.442695, %v1274_v61 }
 0x3a1   :  { %8354 = vpow2.f32 %v1278_v62  ;;  %v8775_v63 = vmul.f32 %v8351_v17, %v1209_v12 }
 0x3a2   :  { %8356 = vpow2.f32 %v1280_v29 }
 0x3a3   :  { %v1271_v52 = vand.u32 2147483647, %v8775_v63  ;;  %v1259_v17 = vmax.f32 %v8775_v63, 0.0  ;;  %vm1263_vm13 = vcmp.ne.f32.partialorder %v8775_v63, %v8775_v63 }
 0x3a5   :  { %v1275_v1 = vsub.f32 0.0, %v1271_v52 }
 0x3a7   :  { %v1282_v3 = vmul.f32 1.442695, %v1275_v1 }
 0x3a9   :  { %v8353_v55 = vpop.eup %8352  ;;  %8358 = vpow2.f32 %v1282_v3 }
 0x3aa   :  { %v1284_v4 = vadd.f32 1.0, %v8353_v55  ;;  %v1287_v9 = vmul.f32 -0.5, %v8353_v55  ;;  %v1290_v12 = vand.u32 2147483647, %v8353_v55 }
 0x3ac   :  { %8360 = vlog2.f32 %v1284_v4  ;;  %v1288_v11 = vadd.f32 1.0, %v1287_v9  ;;  %vm1291_vm6 = vcmp.lt.f32.partialorder %v1290_v12, 0.0004427343 }
 0x3ae   :  { %v8355_v10 = vpop.eup %8354  ;;  %v1289_v25 = vmul.f32 %v8353_v55, %v1288_v11 }
 0x3af   :  { %v1293_v5 = vadd.f32 1.0, %v8355_v10  ;;  %v8357_v6 = vpop.eup %8356  ;;  %v1296_v16 = vmul.f32 -0.5, %v8355_v10  ;;  %v1299_v32 = vand.u32 2147483647, %v8355_v10 }
 0x3b0   :  { %v1302_v8 = vadd.f32 1.0, %v8357_v6  ;;  %v1305_v22 = vmul.f32 -0.5, %v8357_v6  ;;  %v1308_v35 = vand.u32 2147483647, %v8357_v6 }
 0x3b1   :  { %8362 = vlog2.f32 %v1293_v5  ;;  %v1297_v30 = vadd.f32 1.0, %v1296_v16  ;;  %vm1300_vm8 = vcmp.lt.f32.partialorder %v1299_v32, 0.0004427343 }
 0x3b2   :  { %8364 = vlog2.f32 %v1302_v8  ;;  %v1306_v34 = vadd.f32 1.0, %v1305_v22  ;;  %vm1309_vm9 = vcmp.lt.f32.partialorder %v1308_v35, 0.0004427343 }
 0x3b3   :  { %v1298_v41 = vmul.f32 %v8355_v10, %v1297_v30 }
 0x3b4   :  { %v1307_v58 = vmul.f32 %v8357_v6, %v1306_v34 }
 0x3b6   :  { %v8778_v13 = vpop.eup %8358 }
 0x3b7   :  { %v1311_v18 = vadd.f32 1.0, %v8778_v13  ;;  %v1314_v38 = vmul.f32 -0.5, %v8778_v13  ;;  %v1317_v10 = vand.u32 2147483647, %v8778_v13 }
 0x3b9   :  { %v8361_v19 = vpop.eup %8360  ;;  %8366 = vlog2.f32 %v1311_v18  ;;  %v1315_v62 = vadd.f32 1.0, %v1314_v38  ;;  %vm1318_vm12 = vcmp.lt.f32.partialorder %v1317_v10, 0.0004427343 }
 0x3ba   :  { %v1286_v24 = vmul.f32 0.6931472, %v8361_v19 }
 0x3bb   :  { %v1316_v9 = vmul.f32 %v8778_v13, %v1315_v62 }
 0x3bc   :  { %v1292_v31 = vsel %vm1291_vm6, %v1289_v25, %v1286_v24 }
 0x3bd   :  { %v1320_v33 = vadd.f32 %v1292_v31, %v1256_v27 }
 0x3be   :  { %v8363_v37 = vpop.eup %8362 }
 0x3bf   :  { %v1295_v40 = vmul.f32 0.6931472, %v8363_v37  ;;  %v1324_v42 = vsel %vm1260_vm7, %v1249_v45, %v1320_v33  ;;  %v8365_v44 = vpop.eup %8364 }
 0x3c0   :  { %v1332_v48 = vcombine.high %v1324_v42, %v1324_v42  ;;  %v1339_v49 = vrot.slane %v1324_v42, %v8592_v47  ;;  %v1304_v54 = vmul.f32 0.6931472, %v8365_v44 }
 0x3c1   :  { %v1301_v53 = vsel %vm1300_vm8, %v1298_v41, %v1295_v40 }
 0x3c2   :  { %v1321_v59 = vadd.f32 %v1301_v53, %v1257_v39  ;;  %v1346_v60 = vrot.slane %v1332_v48, %v8592_v47  ;;  %v1347_v61 = vcombine.high %v1339_v49, %v1339_v49  ;;  %v1310_v45 = vsel %vm1309_vm9, %v1307_v58, %v1304_v54 }
 0x3c3   :  { %v1354_v52 = vrot.slane %v1339_v49, %v8592_v47  ;;  %v1322_v3 = vadd.f32 %v1310_v45, %v1258_v46 }
 0x3c4   :  { %v1325_v29 = vsel %vm1261_vm10, %v8769_v50, %v1321_v59  ;;  %v1368_v1 = vrot.slane %v1347_v61, %v8592_v47  ;;  %v1361_v55 = vrot.slane %v1346_v60, %v8592_v47 }
 0x3c5   :  { %v1378_v4 = vrot.slane %v1325_v29, %v8592_v47  ;;  %v1371_v5 = vcombine.high %v1325_v29, %v1325_v29  ;;  %v1326_v11 = vsel %vm1262_vm11, %v8771_v57, %v1322_v3 }
 0x3c6   :  { %v1488_v6 = vcombine.low %v1354_v52, %v1368_v1  ;;  %v7866_v8 = vcombine.high %v1354_v52, %v1368_v1  ;;  %v8367_v12 = vpop.eup %8366  ;;  %v1410_v19 = vcombine.high %v1326_v11, %v1326_v11  ;;  %v1417_v27 = vrot.slane %v1326_v11, %v8592_v47 }
 0x3c7   :  { %v1386_v50 = vcombine.high %v1378_v4, %v1378_v4  ;;  %v1393_v16 = vrot.slane %v1378_v4, %v8592_v47  ;;  %v1385_v18 = vrot.slane %v1371_v5, %v8592_v47  ;;  %v1313_v25 = vmul.f32 0.6931472, %v8367_v12 }
 0x3c8   :  { %v1498_v22 = vrot.slane %v1488_v6, %v8592_v47  ;;  %v1505_v24 = vrot.slane %v7866_v8, %v8592_v47  ;;  %v1424_v32 = vrot.slane %v1410_v19, %v8592_v47  ;;  %v1425_v33 = vcombine.high %v1417_v27, %v1417_v27 }
 0x3c9   :  { %v1407_v30 = vrot.slane %v1386_v50, %v8592_v47  ;;  %v1408_v31 = vcombine.high %v1393_v16, %v1393_v16  ;;  %v1490_v13 = vcombine.low %v1361_v55, %v1393_v16  ;;  %v1319_v57 = vsel %vm1318_vm12, %v1316_v9, %v1313_v25 }
 0x3ca   :  { %v1323_v35 = vadd.f32 %v1319_v57, %v1259_v17  ;;  %v1400_v37 = vrot.slane %v1385_v18, %v8592_v47  ;;  %v1520_v40 = vcombine.low %v1498_v22, %v1505_v24  ;;  %v1432_v41 = vrot.slane %v1417_v27, %v8592_v47 }
 0x3cb   :  { %v1491_v34 = vcombine.low %v1407_v30, %v1408_v31  ;;  %v1409_v38 = vcombine.high %v1407_v30, %v1407_v30  ;;  %v1512_v39 = vrot.slane %v1490_v13, %v8592_v47  ;;  %v1446_v42 = vrot.slane %v1425_v33, %v8592_v47 }
 0x3cc   :  { %v1327_v46 = vsel %vm1263_vm13, %v8775_v63, %v1323_v35  ;;  %v1439_v48 = vrot.slane %v1424_v32, %v8592_v47  ;;  %v1528_v45 = vrot.slane %v1520_v40, %v8592_v47  ;;  %v648_v30 = vrot.slane %v8646_v0, %v8592_v47 }
 0x3cd   :  { %v1519_v44 = vrot.slane %v1491_v34, %v8592_v47  ;;  %v1537_v49 = vcombine.low %v1409_v38, %v1400_v37  ;;  %v1456_v53 = vrot.slane %v1327_v46, %v8592_v47  ;;  %v1538_v54 = vcombine.low %v1432_v41, %v1446_v42 }
 0x3ce   :  { %v7867_v58 = vcombine.high %v1432_v41, %v1446_v42  ;;  %v1449_v59 = vcombine.high %v1327_v46, %v1327_v46  ;;  %v656_v31 = vcombine.high %v648_v30, %v648_v30  ;;  %v664_v57 = vrot.slane %v648_v30, %v8592_v47 }
 0x3cf   :  { %v1521_v60 = vcombine.low %v1512_v39, %v1519_v44  ;;  %v1547_v61 = vrot.slane %v1537_v49, %v8592_v47  ;;  %v1471_v62 = vrot.slane %v1456_v53, %v8592_v47  ;;  %v1554_v17 = vrot.slane %v1538_v54, %v8592_v47 }
 0x3d0   :  { %v1463_v63 = vrot.slane %v1449_v59, %v8592_v47  ;;  %v1464_v52 = vcombine.high %v1456_v53, %v1456_v53  ;;  %v1561_v3 = vrot.slane %v7867_v58, %v8592_v47  ;;  %v678_v13 = vrot.slane %v656_v31, %v8592_v47 }
 0x3d1   :  { %v1535_v29 = vrot.slane %v1521_v60, %v8592_v47  ;;  %v1540_v1 = vcombine.low %v1439_v48, %v1471_v62  ;;  %v1569_v55 = vcombine.low %v1547_v61, %v1554_v17  ;;  %v1486_v4 = vcombine.high %v1471_v62, %v1471_v62 }
 0x3d2   :  { %v1485_v5 = vrot.slane %v1464_v52, %v8592_v47  ;;  %v1478_v8 = vrot.slane %v1463_v63, %v8592_v47  ;;  %v1824_v32 = vcombine.low %v664_v57, %v678_v13  ;;  %v7872_v33 = vcombine.high %v664_v57, %v678_v13 }
 0x3d3   :  { %v1536_v10 = vcombine.low %v1528_v45, %v1535_v29  ;;  %v1568_v6 = vrot.slane %v1540_v1, %v8592_v47  ;;  %v1577_v50 = vrot.slane %v1569_v55, %v8592_v47  ;;  %v1846_v44 = vrot.slane %v8656_v7, %v8592_v47 }
 0x3d4   :  { %v1487_v9 = vcombine.high %v1485_v5, %v1485_v5  ;;  %v1586_v11 = vcombine.low %v1485_v5, %v1486_v4  ;;  %v1832_v34 = vrot.slane %v1824_v32, %v8592_v47  ;;  %v1839_v35 = vrot.slane %v7872_v33, %v8592_v47 }
 0x3d5   :  { %8107 = vmatmul.mubr.msk.f32.vlgmr.msra.gmra.mxu1 %vm766_vm3, %v1536_v10  ;;  %v1570_v12 = vcombine.low %v1561_v3, %v1568_v6  ;;  %v8852_v46 = vrot.slane %v8666_v14, %v8592_v47  ;;  %v7878_v59 = vcombine.high %v8669_v21, %v8675_v23  ;;  %v1861_v45 = vrot.slane %v1846_v44, %v8592_v47 }
 0x3d6   :  { %8109 = vmatprep.mubr.msk.f32.mxu1 %vm8491_vm0, %v8490_v2  ;;  %v1587_v16 = vcombine.low %v1487_v9, %v1478_v8  ;;  %v1594_v19 = vrot.slane %v1586_v11, %v8592_v47  ;;  %v1847_v40 = vcombine.low %v1832_v34, %v1839_v35 }
 0x3d7   :  { %v1584_v18 = vrot.slane %v1570_v12, %v8592_v47  ;;  %v2129_v60 = vcombine.low %v8852_v46, %v8682_v28  ;;  %v736_v55 = vcombine.high %v8852_v46, %v8852_v46  ;;  %v2136_v8 = vrot.slane %v7878_v59, %v8592_v47 }
 0x3d8   :  { %v1601_v22 = vrot.slane %v1587_v16, %v8592_v47  ;;  %v1854_v58 = vrot.slane %v1847_v40, %v8592_v47 }
 0x3d9   :  { %v1585_v24 = vcombine.low %v1577_v50, %v1584_v18  ;;  %v2143_v9 = vrot.slane %v2129_v60, %v8592_v47 }
 0x3da   :  { %v1602_v25 = vcombine.low %v1594_v19, %v1601_v22  ;;  %v8872_v6 = vcombine.low %v1854_v58, %v1861_v45 }
 0x3db   :  { %8110 = vmatmul.mubr.msk.f32.gmra.mxu1 %vm766_vm3, %v1585_v24 }
 0x3dc   :  { %8112 = vmatprep.mubr.msk.f32.mxu1 %vm8491_vm0, %v8490_v2  ;;  %v1609_v27 = vrot.slane %v1602_v25, %v8592_v47 }
 0x3df   :  { %8113 = vmatmul.mubr.msk.f32.gmra.mxu1 %vm766_vm3, %v1609_v27 }
 0x3e0   :  { %8117 = vmatprep.mubr.msk.f32.mxu1 %vm8491_vm0, %v8490_v2 }
 0x495   :  { %v1685_v37 = vpop.f32.mrf.mxu1 }
 0x496   :  { %v1702_v38 = vcombine.high %v1685_v37, %v1685_v37  ;;  %v1709_v39 = vrot.slane %v1685_v37, %v8592_v47 }
 0x497   :  { %v8108_v41 = vpop.f32.mrf.mxu1 }
 0x498   :  { %v1716_v42 = vrot.slane %v1702_v38, %v8592_v47  ;;  %v1717_v0 = vcombine.high %v1709_v39, %v1709_v39  ;;  %v1725_v49 = vrot.slane %v1709_v39, %v8592_v47  ;;  %v2151_v38 = vcombine.low %v2136_v8, %v2143_v9 }
 0x49a   :  { %v1718_v48 = vcombine.high %v1716_v42, %v1716_v42  ;;  %v1732_v53 = vrot.slane %v1716_v42, %v8592_v47  ;;  %v1739_v54 = vrot.slane %v1717_v0, %v8592_v47 }
 0x49b   :  { %v1690_v17 = vpop.f32.mrf.mxu1 }
 0x49c   :  { %v1746_v7 = vrot.slane %v1718_v48, %v8592_v47  ;;  %v1748_v61 = vcombine.high %v1732_v53, %v1732_v53  ;;  %v1863_v14 = vcombine.low %v1725_v49, %v1739_v54  ;;  %v7873_v62 = vcombine.high %v1725_v49, %v1739_v54 }
 0x49d   :  { %v1885_v29 = vrot.slane %v1732_v53, %v8592_v47  ;;  %v1751_v63 = vcombine.high %v1690_v17, %v1690_v17  ;;  %v1758_v52 = vrot.slane %v1690_v17, %v8592_v47  ;;  %v8111_v28 = vpop.f32.mrf.mxu1  ;;  %v2150_v54 = vrot.slane %v736_v55, %v8592_v47 }
 0x49e   :  { %v1871_v1 = vrot.slane %v1863_v14, %v8592_v47  ;;  %v1878_v21 = vrot.slane %v7873_v62, %v8592_v47  ;;  %v2015_v23 = vcombine.low %v1746_v7, %v1748_v61  ;;  %v1750_v3 = vcombine.high %v1746_v7, %v1746_v7 }
 0x49f   :  { %v1765_v4 = vrot.slane %v1751_v63, %v8592_v47  ;;  %v1766_v10 = vcombine.high %v1758_v52, %v1758_v52  ;;  %v1774_v5 = vrot.slane %v1758_v52, %v8592_v47  ;;  %v1695_v12 = vpop.f32.mrf.mxu1  ;;  %v1900_v24 = vrot.slane %v1885_v29, %v8592_v47 }
 0x4a0   :  { %v1886_v11 = vcombine.low %v1871_v1, %v1878_v21  ;;  %v2023_v25 = vrot.slane %v2015_v23, %v8592_v47  ;;  %v1806_v27 = vrot.slane %v1695_v12, %v8592_v47  ;;  %v2158_v14 = vrot.slane %v2151_v38, %v8592_v47 }
 0x4a1   :  { %v1767_v50 = vcombine.high %v1765_v4, %v1765_v4  ;;  %v1781_v16 = vrot.slane %v1765_v4, %v8592_v47  ;;  %v1788_v18 = vrot.slane %v1766_v10, %v8592_v47  ;;  %v2016_v19 = vcombine.low %v1750_v3, %v1774_v5  ;;  %v8114_v30 = vpop.f32.mrf.mxu1  ;;  %v765_v4 = vld [vmem:[%s9858_s2 + $0x10] sm:$0x1f] }
 0x4a2   :  { %v1893_v22 = vrot.slane %v1886_v11, %v8592_v47  ;;  %v1807_v35 = vcombine.high %v1806_v27, %v1806_v27  ;;  %v1814_v37 = vrot.slane %v1806_v27, %v8592_v47  ;;  %v2165_v52 = vrot.slane %v2150_v54, %v8592_v47  ;;  %v8936_v10 = vld [vmem:[%s9856_s1 + $0x10] sm:$0xff] }
 0x4a3   :  { %v1795_v31 = vrot.slane %v1767_v50, %v8592_v47  ;;  %v1797_v13 = vcombine.high %v1781_v16, %v1781_v16  ;;  %v2030_v57 = vrot.slane %v2016_v19, %v8592_v47  ;;  %v2037_v32 = vrot.slane %v1788_v18, %v8592_v47 }
 0x4a4   :  { %v1901_v33 = vcombine.low %v1893_v22, %v1900_v24  ;;  %v7879_v34 = vcombine.high %v1774_v5, %v1788_v18  ;;  %v1821_v44 = vrot.slane %v1807_v35, %v8592_v47  ;;  %v1822_v46 = vcombine.high %v1814_v37, %v1814_v37  ;;  %v8941_v5 = vld [vmem:[%s9856_s1 + $0x18] sm:$0xff] }
 0x4a5   :  { %v2038_v39 = vcombine.low %v2023_v25, %v2030_v57  ;;  %v2052_v40 = vrot.slane %v2037_v32, %v8592_v47  ;;  %v2168_v41 = vcombine.low %v1781_v16, %v1795_v31  ;;  %v2189_v42 = vrot.slane %v1797_v13, %v8592_v47 }
 0x4a6   :  { %v1799_v0 = vcombine.high %v1795_v31, %v1795_v31  ;;  %8116 = vmatpush3.msk.msra.mxu1 %vm773_vm2, %v1901_v33  ;;  %v2175_v49 = vrot.slane %v7879_v34, %v8592_v47  ;;  %v1823_v58 = vcombine.high %v1821_v44, %v1821_v44  ;;  %v2320_v60 = vcombine.low %v1821_v44, %v1822_v46 }
 0x4a7   :  { %v2045_v48 = vrot.slane %v2038_v39, %v8592_v47  ;;  %v2182_v53 = vrot.slane %v2168_v41, %v8592_v47  ;;  %8118 = vmatmul.mubr.msk.f32.vlgmr.msra.gmra.mxu1 %vm766_vm3, %v8872_v6  ;;  %8130 = vmatprep.subr.mxu1 %v8490_v2  ;;  %v2204_v63 = vrot.slane %v2189_v42, %v8592_v47  ;;  %v3712_v8 = vmax.f32 %v8936_v10, 0.0 }
 0x4a8   :  { %v2319_v59 = vcombine.low %v1799_v0, %v1814_v37  ;;  %8132 = vmatprep.mubr.msk.f32.mxu1 %vm8491_vm0, %v8490_v2  ;;  %v2334_v17 = vrot.slane %v2320_v60, %v8592_v47  ;;  %v2341_v45 = vrot.slane %v1823_v58, %v8592_v47  ;;  %v8914_v28 = vcombine.low %v2158_v14, %v2165_v52 }
 0x4a9   :  { %v2053_v7 = vcombine.low %v2045_v48, %v2052_v40  ;;  %v2190_v61 = vcombine.low %v2175_v49, %v2182_v53  ;;  %3714 = vxpose.xlu1.b32.start [1/2] (short) (narrow) %v3712_v8, 8  ;;  %v3713_v9 = vmax.f32 %v8941_v5, 0.0 }
 0x4aa   :  { %v2327_v62 = vrot.slane %v2319_v59, %v8592_v47  ;;  %v2356_v3 = vrot.slane %v2341_v45, %v8592_v47 }
 0x4ab   :  { %v2197_v29 = vrot.slane %v2190_v61, %v8592_v47  ;;  %8121 = vmatpush3.msk.msra.mxu0 %vm773_vm2, %v2053_v7 }
 0x4ac   :  { %v2342_v1 = vcombine.low %v2327_v62, %v2334_v17  ;;  %8123 = vmatmul.mubr.msk.f32.vlgmr.msra.gmra.mxu0 %vm766_vm3, %v8694_v43  ;;  %8125 = vmatprep.subr.mxu0 %v8490_v2 }
 0x4ad   :  { %v2205_v21 = vcombine.low %v2197_v29, %v2204_v63  ;;  %8127 = vmatprep.mubr.msk.f32.mxu0 %vm8491_vm0, %v8490_v2  ;;  %3715 = vxpose.xlu1.b32.end [2/2] (short) (narrow) %v3713_v9, 8 }
 0x4ae   :  { %v2349_v23 = vrot.slane %v2342_v1, %v8592_v47 }
 0x4af   :  { %8126 = vmatpush3.msk.msra.mxu0 %vm773_vm2, %v2205_v21 }
 0x4b0   :  { %v2357_v55 = vcombine.low %v2349_v23, %v2356_v3  ;;  %8128 = vmatmul.mubr.msk.f32.vlgmr.msra.gmra.mxu0 %vm766_vm3, %v8914_v28  ;;  %8135 = vmatprep.subr.mxu0 %v8490_v2 }
 0x4b1   :  { %8137 = vmatprep.mubr.msk.f32.mxu0 %vm8491_vm0, %v8490_v2  ;;  %8136 = vmatpush3.msk.msra.mxu0 %vm773_vm2, %v765_v4 }
 0x4b2   :  { %8131 = vmatpush3.msk.msra.mxu1 %vm773_vm2, %v2357_v55  ;;  %8161 = vmatprep.subr.mxu0 %v8490_v2 }
 0x4b3   :  { %8133 = vmatmul.mubr.msk.f32.vlgmr.msra.gmra.mxu1 %vm766_vm3, %v8701_v51  ;;  %8146 = vmatprep.subr.mxu1 %v8490_v2 }
 0x4b4   :  { %8148 = vmatprep.mubr.msk.f32.mxu1 %vm8491_vm0, %v8490_v2 }
 0x567   :  { %v1972_v11 = vpop.f32.mrf.mxu1 }
 0x568   :  { %v2432_v12 = vmul.f32 0.85, %v1972_v11 }
 0x569   :  { %v8119_v50 = vpop.f32.mrf.mxu1 }
 0x56a   :  { %v2436_v16 = vadd.f32 %v2432_v12, %v8728_v36 }
 0x56c   :  { %v2440_v18 = vmax.f32 %v2436_v16, 0.0  ;;  %v2124_v19 = vpop.f32.mrf.mxu0 }
 0x56d   :  { %v2433_v22 = vmul.f32 0.85, %v2124_v19 }
 0x56e   :  { %v2444_v24 = vsel %vm1210_vm5, %v2440_v18, 0.0  ;;  %v8124_v25 = vpop.f32.mrf.mxu0 }
 0x56f   :  { %v2445_v27 = vrot.slane %v2444_v24, 4  ;;  %v2437_v30 = vadd.f32 %v2433_v22, %v8728_v36 }
 0x570   :  { %v2276_v31 = vpop.f32.mrf.mxu0 }
 0x571   :  { %v2446_v13 = vadd.f32 %v2445_v27, %v2444_v24  ;;  %v2441_v57 = vmax.f32 %v2437_v30, 0.0  ;;  %v2434_v32 = vmul.f32 0.85, %v2276_v31 }
 0x572   :  { %v8129_v33 = vpop.f32.mrf.mxu0 }
 0x573   :  { %v2447_v34 = vrot.slane %v2446_v13, 2  ;;  %v2451_v35 = vsel %vm1210_vm5, %v2441_v57, 0.0  ;;  %v2438_v37 = vadd.f32 %v2434_v32, %v8728_v36  ;;  %v2428_v38 = vpop.f32.mrf.mxu1 }
 0x574   :  { %v2452_v39 = vrot.slane %v2451_v35, 4  ;;  %v2435_v40 = vmul.f32 0.85, %v2428_v38 }
 0x575   :  { %v2448_v41 = vadd.f32 %v2447_v34, %v2446_v13  ;;  %v2442_v42 = vmax.f32 %v2438_v37, 0.0  ;;  %v8134_v0 = vpop.f32.mrf.mxu1 }
 0x576   :  { %v2453_v44 = vadd.f32 %v2452_v39, %v2451_v35  ;;  %v2439_v46 = vadd.f32 %v2435_v40, %v8728_v36 }
 0x577   :  { %v2449_v48 = vrot.slane %v2448_v41, 1  ;;  %v2458_v49 = vsel %vm1210_vm5, %v2442_v42, 0.0 }
 0x578   :  { %v2454_v53 = vrot.slane %v2453_v44, 2  ;;  %v2459_v54 = vrot.slane %v2458_v49, 4  ;;  %v2443_v58 = vmax.f32 %v2439_v46, 0.0 }
 0x579   :  { %v2450_v59 = vadd.f32 %v2449_v48, %v2448_v41 }
 0x57a   :  { %v2455_v60 = vadd.f32 %v2454_v53, %v2453_v44  ;;  %v2460_v7 = vadd.f32 %v2459_v54, %v2458_v49  ;;  %v2465_v61 = vsel %vm1210_vm5, %v2443_v58, 0.0 }
 0x57b   :  { %v2472_v14 = vmul.f32 0.2, %v2450_v59  ;;  %v2466_v62 = vrot.slane %v2465_v61, 4 }
 0x57c   :  { %v2456_v17 = vrot.slane %v2455_v60, 1  ;;  %v2461_v45 = vrot.slane %v2460_v7, 2 }
 0x57d   :  { %v2476_v29 = vadd.f32 1e-06, %v2472_v14  ;;  %v2467_v63 = vadd.f32 %v2466_v62, %v2465_v61 }
 0x57e   :  { %v2457_v52 = vadd.f32 %v2456_v17, %v2455_v60  ;;  %v2462_v1 = vadd.f32 %v2461_v45, %v2460_v7 }
 0x57f   :  { %8368 = vrcp.f32 %v2476_v29  ;;  %v2468_v21 = vrot.slane %v2467_v63, 2 }
 0x580   :  { %v2473_v23 = vmul.f32 0.2, %v2457_v52  ;;  %v2463_v3 = vrot.slane %v2462_v1, 1 }
 0x581   :  { %v2469_v55 = vadd.f32 %v2468_v21, %v2467_v63 }
 0x582   :  { %v2477_v4 = vadd.f32 1e-06, %v2473_v23  ;;  %v2464_v11 = vadd.f32 %v2463_v3, %v2462_v1 }
 0x583   :  { %v2470_v12 = vrot.slane %v2469_v55, 1 }
 0x584   :  { %8370 = vrcp.f32 %v2477_v4  ;;  %v2474_v50 = vmul.f32 0.2, %v2464_v11 }
 0x585   :  { %v2471_v16 = vadd.f32 %v2470_v12, %v2469_v55 }
 0x586   :  { %v2478_v19 = vadd.f32 1e-06, %v2474_v50 }
 0x587   :  { %v2475_v22 = vmul.f32 0.2, %v2471_v16 }
 0x588   :  { %8372 = vrcp.f32 %v2478_v19 }
 0x589   :  { %v2479_v24 = vadd.f32 1e-06, %v2475_v22 }
 0x58b   :  { %8374 = vrcp.f32 %v2479_v24 }
 0x58c   :  { %v8369_v25 = vpop.eup %8368 }
 0x58d   :  { %v2481_v27 = vmul.f32 %v8369_v25, %v2440_v18 }
 0x58f   :  { %v2500_v30 = vand.u32 2147483647, %v2481_v27  ;;  %v2488_v1 = vmax.f32 %v2481_v27, 0.0  ;;  %vm2492_vm15 = vcmp.ne.f32.partialorder %v2481_v27, %v2481_v27 }
 0x591   :  { %v8371_v31 = vpop.eup %8370  ;;  %v2504_v13 = vsub.f32 0.0, %v2500_v30 }
 0x592   :  { %v8957_v32 = vmul.f32 %v8371_v31, %v2441_v57 }
 0x593   :  { %v2508_v33 = vmul.f32 1.442695, %v2504_v13 }
 0x594   :  { %v2501_v34 = vand.u32 2147483647, %v8957_v32  ;;  %v2489_v12 = vmax.f32 %v8957_v32, 0.0  ;;  %vm2493_vm7 = vcmp.ne.f32.partialorder %v8957_v32, %v8957_v32 }
 0x595   :  { %v8373_v35 = vpop.eup %8372  ;;  %8376 = vpow2.f32 %v2508_v33 }
 0x596   :  { %v2505_v37 = vsub.f32 0.0, %v2501_v34  ;;  %v8960_v38 = vmul.f32 %v8373_v35, %v2442_v42 }
 0x598   :  { %v8375_v39 = vpop.eup %8374  ;;  %v2510_v40 = vmul.f32 1.442695, %v2505_v37  ;;  %v2502_v41 = vand.u32 2147483647, %v8960_v38  ;;  %v2490_v33 = vmax.f32 %v8960_v38, 0.0  ;;  %vm2494_vm8 = vcmp.ne.f32.partialorder %v8960_v38, %v8960_v38 }
 0x599   :  { %v8963_v0 = vmul.f32 %v8375_v39, %v2443_v58 }
 0x59a   :  { %8378 = vpow2.f32 %v2510_v40  ;;  %v2506_v18 = vsub.f32 0.0, %v2502_v41 }
 0x59b   :  { %v2503_v44 = vand.u32 2147483647, %v8963_v0  ;;  %vm2495_vm11 = vcmp.ne.f32.partialorder %v8963_v0, %v8963_v0 }
 0x59c   :  { %v2512_v57 = vmul.f32 1.442695, %v2506_v18 }
 0x59d   :  { %v2507_v46 = vsub.f32 0.0, %v2503_v44 }
 0x59e   :  { %8380 = vpow2.f32 %v2512_v57 }
 0x59f   :  { %v2514_v48 = vmul.f32 1.442695, %v2507_v46 }
 0x5a1   :  { %8382 = vpow2.f32 %v2514_v48 }
 0x5a2   :  { %v8377_v49 = vpop.eup %8376 }
 0x5a3   :  { %v2516_v53 = vadd.f32 1.0, %v8377_v49  ;;  %v2519_v60 = vmul.f32 -0.5, %v8377_v49  ;;  %v2522_v17 = vand.u32 2147483647, %v8377_v49 }
 0x5a5   :  { %8384 = vlog2.f32 %v2516_v53  ;;  %v2520_v61 = vadd.f32 1.0, %v2519_v60  ;;  %vm2523_vm14 = vcmp.lt.f32.partialorder %v2522_v17, 0.0004427343 }
 0x5a7   :  { %v8379_v42 = vpop.eup %8378  ;;  %v2521_v63 = vmul.f32 %v8377_v49, %v2520_v61 }
 0x5a8   :  { %v2525_v54 = vadd.f32 1.0, %v8379_v42  ;;  %v2528_v14 = vmul.f32 -0.5, %v8379_v42  ;;  %v2531_v3 = vand.u32 2147483647, %v8379_v42 }
 0x5aa   :  { %8386 = vlog2.f32 %v2525_v54  ;;  %v2529_v52 = vadd.f32 1.0, %v2528_v14  ;;  %vm2532_vm6 = vcmp.lt.f32.partialorder %v2531_v3, 0.0004427343 }
 0x5ab   :  { %v8381_v59 = vpop.eup %8380 }
 0x5ac   :  { %v2534_v7 = vadd.f32 1.0, %v8381_v59  ;;  %v2537_v21 = vmul.f32 -0.5, %v8381_v59  ;;  %v2530_v50 = vmul.f32 %v8379_v42, %v2529_v52  ;;  %v2540_v24 = vand.u32 2147483647, %v8381_v59 }
 0x5ae   :  { %v8383_v58 = vpop.eup %8382  ;;  %8388 = vlog2.f32 %v2534_v7  ;;  %v2538_v22 = vadd.f32 1.0, %v2537_v21  ;;  %vm2541_vm9 = vcmp.lt.f32.partialorder %v2540_v24, 0.0004427343 }
 0x5af   :  { %v2543_v62 = vadd.f32 1.0, %v8383_v58  ;;  %v2546_v4 = vmul.f32 -0.5, %v8383_v58  ;;  %v2549_v31 = vand.u32 2147483647, %v8383_v58 }
 0x5b0   :  { %v2539_v18 = vmul.f32 %v8381_v59, %v2538_v22 }
 0x5b1   :  { %8390 = vlog2.f32 %v2543_v62  ;;  %v2547_v34 = vadd.f32 1.0, %v2546_v4  ;;  %vm8978_vm10 = vcmp.lt.f32.partialorder %v2549_v31, 0.0004427343 }
 0x5b2   :  { %v8385_v45 = vpop.eup %8384 }
 0x5b3   :  { %v2518_v29 = vmul.f32 0.6931472, %v8385_v45  ;;  %v2548_v60 = vmul.f32 %v8383_v58, %v2547_v34 }
 0x5b5   :  { %v2524_v23 = vsel %vm2523_vm14, %v2521_v63, %v2518_v29 }
 0x5b6   :  { %v2552_v55 = vadd.f32 %v2524_v23, %v2488_v1 }
 0x5b7   :  { %v8387_v11 = vpop.eup %8386 }
 0x5b8   :  { %v2556_v16 = vsel %vm2492_vm15, %v2481_v27, %v2552_v55  ;;  %v2527_v19 = vmul.f32 0.6931472, %v8387_v11  ;;  %v2491_v27 = vmax.f32 %v8963_v0, 0.0 }
 0x5b9   :  { %v2564_v25 = vcombine.high %v2556_v16, %v2556_v16  ;;  %v2571_v30 = vrot.slane %v2556_v16, %v8592_v47 }
 0x5ba   :  { %v2533_v13 = vsel %vm2532_vm6, %v2530_v50, %v2527_v19 }
 0x5bb   :  { %v8389_v35 = vpop.eup %8388  ;;  %v2579_v37 = vcombine.high %v2571_v30, %v2571_v30  ;;  %v2553_v39 = vadd.f32 %v2533_v13, %v2489_v12  ;;  %v2578_v40 = vrot.slane %v2564_v25, %v8592_v47  ;;  %v2586_v44 = vrot.slane %v2571_v30, %v8592_v47 }
 0x5bc   :  { %v2536_v41 = vmul.f32 0.6931472, %v8389_v35 }
 0x5bd   :  { %v2600_v57 = vrot.slane %v2579_v37, %v8592_v47  ;;  %v2557_v46 = vsel %vm2493_vm7, %v8957_v32, %v2553_v39  ;;  %v2593_v62 = vrot.slane %v2578_v40, %v8592_v47 }
 0x5be   :  { %v8391_v49 = vpop.eup %8390  ;;  %v2603_v53 = vcombine.high %v2557_v46, %v2557_v46  ;;  %v2610_v42 = vrot.slane %v2557_v46, %v8592_v47  ;;  %v2542_v54 = vsel %vm2541_vm9, %v2539_v18, %v2536_v41 }
 0x5bf   :  { %v2720_v7 = vcombine.low %v2586_v44, %v2600_v57  ;;  %v7884_v61 = vcombine.high %v2586_v44, %v2600_v57  ;;  %v2554_v59 = vadd.f32 %v2542_v54, %v2490_v33  ;;  %v2545_v14 = vmul.f32 0.6931472, %v8391_v49 }
 0x5c0   :  { %v2617_v17 = vrot.slane %v2603_v53, %v8592_v47  ;;  %v2618_v45 = vcombine.high %v2610_v42, %v2610_v42  ;;  %v2625_v32 = vrot.slane %v2610_v42, %v8592_v47 }
 0x5c1   :  { %v2558_v29 = vsel %vm2494_vm8, %v8960_v38, %v2554_v59  ;;  %v2551_v63 = vsel %vm8978_vm10, %v2548_v60, %v2545_v14  ;;  %v2730_v58 = vrot.slane %v2720_v7, %v8592_v47  ;;  %v2737_v52 = vrot.slane %v7884_v61, %v8592_v47 }
 0x5c2   :  { %v2639_v1 = vrot.slane %v2618_v45, %v8592_v47  ;;  %v2640_v21 = vcombine.high %v2625_v32, %v2625_v32  ;;  %v2722_v23 = vcombine.low %v2593_v62, %v2625_v32  ;;  %v2642_v3 = vcombine.high %v2558_v29, %v2558_v29 }
 0x5c3   :  { %v2649_v55 = vrot.slane %v2558_v29, %v8592_v47  ;;  %v2555_v4 = vadd.f32 %v2551_v63, %v2491_v27  ;;  %v2752_v12 = vcombine.low %v2730_v58, %v2737_v52  ;;  %v2632_v24 = vrot.slane %v2617_v17, %v8592_v47 }
 0x5c4   :  { %v2656_v38 = vrot.slane %v2642_v3, %v8592_v47  ;;  %v2723_v11 = vcombine.low %v2639_v1, %v2640_v21  ;;  %v2641_v50 = vcombine.high %v2639_v1, %v2639_v1  ;;  %v2744_v22 = vrot.slane %v2722_v23, %v8592_v47 }
 0x5c5   :  { %v2657_v16 = vcombine.high %v2649_v55, %v2649_v55  ;;  %v2559_v19 = vsel %vm2495_vm11, %v8963_v0, %v2555_v4  ;;  %v2664_v33 = vrot.slane %v2649_v55, %v8592_v47  ;;  %v2760_v18 = vrot.slane %v2752_v12, %v8592_v47 }
 0x5c6   :  { %v2681_v25 = vcombine.high %v2559_v19, %v2559_v19  ;;  %v2688_v30 = vrot.slane %v2559_v19, %v8592_v47  ;;  %v2751_v31 = vrot.slane %v2723_v11, %v8592_v47  ;;  %v2671_v13 = vrot.slane %v2656_v38, %v8592_v47 }
 0x5c7   :  { %v2678_v34 = vrot.slane %v2657_v16, %v8592_v47  ;;  %v2769_v35 = vcombine.low %v2641_v50, %v2632_v24 }
 0x5c8   :  { %v2695_v37 = vrot.slane %v2681_v25, %v8592_v47  ;;  %v2696_v39 = vcombine.high %v2688_v30, %v2688_v30  ;;  %v2703_v0 = vrot.slane %v2688_v30, %v8592_v47  ;;  %v2753_v27 = vcombine.low %v2744_v22, %v2751_v31 }
 0x5c9   :  { %v2770_v40 = vcombine.low %v2664_v33, %v2678_v34  ;;  %v7885_v41 = vcombine.high %v2664_v33, %v2678_v34  ;;  %v2779_v48 = vrot.slane %v2769_v35, %v8592_v47 }
 0x5ca   :  { %v2767_v44 = vrot.slane %v2753_v27, %v8592_v47  ;;  %v2772_v57 = vcombine.low %v2671_v13, %v2703_v0  ;;  %v2717_v46 = vrot.slane %v2696_v39, %v8592_v47  ;;  %v2718_v42 = vcombine.high %v2703_v0, %v2703_v0 }
 0x5cb   :  { %v2786_v49 = vrot.slane %v2770_v40, %v8592_v47  ;;  %v2793_v53 = vrot.slane %v7885_v41, %v8592_v47  ;;  %v2710_v7 = vrot.slane %v2695_v37, %v8592_v47 }
 0x5cc   :  { %v2768_v54 = vcombine.low %v2760_v18, %v2767_v44  ;;  %v2800_v60 = vrot.slane %v2772_v57, %v8592_v47  ;;  %v2719_v61 = vcombine.high %v2717_v46, %v2717_v46  ;;  %v2818_v14 = vcombine.low %v2717_v46, %v2718_v42 }
 0x5cd   :  { %v2801_v59 = vcombine.low %v2779_v48, %v2786_v49 }
 0x5ce   :  { %8138 = vmatmul.mubr.msk.f32.vlgmr.msra.gmra.mxu0 %vm766_vm3, %v2768_v54  ;;  %v2802_v62 = vcombine.low %v2793_v53, %v2800_v60  ;;  %v2819_v17 = vcombine.low %v2719_v61, %v2710_v7  ;;  %v2826_v29 = vrot.slane %v2818_v14, %v8592_v47 }
 0x5cf   :  { %8140 = vmatprep.mubr.msk.f32.mxu0 %vm8491_vm0, %v8490_v2  ;;  %v2809_v45 = vrot.slane %v2801_v59, %v8592_v47 }
 0x5d0   :  { %v2816_v32 = vrot.slane %v2802_v62, %v8592_v47  ;;  %v2833_v63 = vrot.slane %v2819_v17, %v8592_v47 }
 0x5d2   :  { %v2817_v58 = vcombine.low %v2809_v45, %v2816_v32  ;;  %v2834_v52 = vcombine.low %v2826_v29, %v2833_v63 }
 0x5d4   :  { %8141 = vmatmul.mubr.msk.f32.gmra.mxu0 %vm766_vm3, %v2817_v58  ;;  %v2841_v1 = vrot.slane %v2834_v52, %v8592_v47 }
 0x5d5   :  { %8143 = vmatprep.mubr.msk.f32.mxu0 %vm8491_vm0, %v8490_v2 }
 0x5d8   :  { %8144 = vmatmul.mubr.msk.f32.gmra.mxu0 %vm766_vm3, %v2841_v1 }
 0x5d9   :  { %8163 = vmatprep.mubr.msk.f32.mxu0 %vm8491_vm0, %v8490_v2 }
 0x68e   :  { %v2917_v21 = vpop.f32.mrf.mxu0 }
 0x68f   :  { %v2934_v23 = vcombine.high %v2917_v21, %v2917_v21  ;;  %v2941_v3 = vrot.slane %v2917_v21, %v8592_v47 }
 0x690   :  { %v8139_v55 = vpop.f32.mrf.mxu0 }
 0x691   :  { %v2948_v4 = vrot.slane %v2934_v23, %v8592_v47  ;;  %v2949_v38 = vcombine.high %v2941_v3, %v2941_v3  ;;  %v2957_v12 = vrot.slane %v2941_v3, %v8592_v47 }
 0x693   :  { %v2950_v11 = vcombine.high %v2948_v4, %v2948_v4  ;;  %v2964_v50 = vrot.slane %v2948_v4, %v8592_v47  ;;  %v2971_v16 = vrot.slane %v2949_v38, %v8592_v47 }
 0x694   :  { %v2922_v19 = vpop.f32.mrf.mxu0 }
 0x695   :  { %v2978_v22 = vrot.slane %v2950_v11, %v8592_v47  ;;  %v2980_v24 = vcombine.high %v2964_v50, %v2964_v50  ;;  %v3056_v25 = vcombine.low %v2957_v12, %v2971_v16  ;;  %v7890_v30 = vcombine.high %v2957_v12, %v2971_v16 }
 0x696   :  { %v3078_v31 = vrot.slane %v2964_v50, %v8592_v47  ;;  %v2983_v13 = vcombine.high %v2922_v19, %v2922_v19  ;;  %v2990_v33 = vrot.slane %v2922_v19, %v8592_v47  ;;  %v8142_v34 = vpop.f32.mrf.mxu0 }
 0x697   :  { %v3064_v35 = vrot.slane %v3056_v25, %v8592_v47  ;;  %v3071_v37 = vrot.slane %v7890_v30, %v8592_v47  ;;  %v3167_v39 = vcombine.low %v2978_v22, %v2980_v24  ;;  %v2982_v0 = vcombine.high %v2978_v22, %v2978_v22 }
 0x698   :  { %v2997_v27 = vrot.slane %v2983_v13, %v8592_v47  ;;  %v2998_v40 = vcombine.high %v2990_v33, %v2990_v33  ;;  %v3006_v41 = vrot.slane %v2990_v33, %v8592_v47  ;;  %v2927_v18 = vpop.f32.mrf.mxu0  ;;  %v3093_v57 = vrot.slane %v3078_v31, %v8592_v47 }
 0x699   :  { %v3079_v44 = vcombine.low %v3064_v35, %v3071_v37  ;;  %v3038_v46 = vrot.slane %v2927_v18, %v8592_v47  ;;  %v3175_v7 = vrot.slane %v3167_v39, %v8592_v47  ;;  %v7903_v35 = vld [vmem:[%s9857_s0 + $0x18] sm:$0xff]  ;;  %v3730_v39 = vpop.trf.xlu1 }
 0x69a   :  { %v2999_v48 = vcombine.high %v2997_v27, %v2997_v27  ;;  %v3013_v49 = vrot.slane %v2997_v27, %v8592_v47  ;;  %v3020_v53 = vrot.slane %v2998_v40, %v8592_v47  ;;  %v3168_v42 = vcombine.low %v2982_v0, %v3006_v41  ;;  %v8145_v54 = vpop.f32.mrf.mxu0 }
 0x69b   :  { %v3086_v60 = vrot.slane %v3079_v44, %v8592_v47  ;;  %v3039_v61 = vcombine.high %v3038_v46, %v3038_v46  ;;  %v3046_v59 = vrot.slane %v3038_v46, %v8592_v47 }
 0x69c   :  { %v3027_v14 = vrot.slane %v2999_v48, %v8592_v47  ;;  %v3029_v62 = vcombine.high %v3013_v49, %v3013_v49  ;;  %v3182_v17 = vrot.slane %v3168_v42, %v8592_v47  ;;  %v3189_v45 = vrot.slane %v3020_v53, %v8592_v47 }
 0x69d   :  { %v3094_v32 = vcombine.low %v3086_v60, %v3093_v57  ;;  %v7895_v29 = vcombine.high %v3006_v41, %v3020_v53  ;;  %v3053_v63 = vrot.slane %v3039_v61, %v8592_v47  ;;  %v3054_v58 = vcombine.high %v3046_v59, %v3046_v59 }
 0x69e   :  { %v3190_v52 = vcombine.low %v3175_v7, %v3182_v17  ;;  %v3204_v1 = vrot.slane %v3189_v45, %v8592_v47  ;;  %v3279_v21 = vcombine.low %v3013_v49, %v3027_v14  ;;  %v3300_v23 = vrot.slane %v3029_v62, %v8592_v47 }
 0x69f   :  { %v3031_v3 = vcombine.high %v3027_v14, %v3027_v14  ;;  %v3055_v55 = vcombine.high %v3053_v63, %v3053_v63  ;;  %v3390_v4 = vcombine.low %v3053_v63, %v3054_v58  ;;  %8147 = vmatpush3.msk.msra.mxu1 %vm773_vm2, %v3094_v32  ;;  %v3286_v11 = vrot.slane %v7895_v29, %v8592_v47 }
 0x6a0   :  { %v3197_v38 = vrot.slane %v3190_v52, %v8592_v47  ;;  %v3293_v12 = vrot.slane %v3279_v21, %v8592_v47  ;;  %8149 = vmatmul.mubr.msk.f32.vlgmr.msra.gmra.mxu1 %vm766_vm3, %v8872_v6  ;;  %8151 = vmatprep.subr.mxu1 %v8490_v2  ;;  %v3315_v31 = vrot.slane %v3300_v23, %v8592_v47 }
 0x6a1   :  { %v3389_v50 = vcombine.low %v3031_v3, %v3046_v59  ;;  %v3404_v16 = vrot.slane %v3390_v4, %v8592_v47  ;;  %8153 = vmatprep.mubr.msk.f32.mxu1 %vm8491_vm0, %v8490_v2  ;;  %v3411_v25 = vrot.slane %v3055_v55, %v8592_v47 }
 0x6a2   :  { %v3205_v19 = vcombine.low %v3197_v38, %v3204_v1  ;;  %v3301_v22 = vcombine.low %v3286_v11, %v3293_v12 }
 0x6a3   :  { %v3397_v24 = vrot.slane %v3389_v50, %v8592_v47  ;;  %v3426_v34 = vrot.slane %v3411_v25, %v8592_v47 }
 0x6a4   :  { %v3308_v30 = vrot.slane %v3301_v22, %v8592_v47  ;;  %8152 = vmatpush3.msk.msra.mxu1 %vm773_vm2, %v3205_v19 }
 0x6a5   :  { %v3412_v6 = vcombine.low %v3397_v24, %v3404_v16  ;;  %8154 = vmatmul.mubr.msk.f32.vlgmr.msra.gmra.mxu1 %vm766_vm3, %v8694_v43  ;;  %8156 = vmatprep.subr.mxu1 %v8490_v2  ;;  %v7902_v43 = vld [vmem:[%s9857_s0 + $0x10] sm:$0xff]  ;;  %s8498_s0 = smov 10  }
 0x6a6   :  { %v3316_v13 = vcombine.low %v3308_v30, %v3315_v31  ;;  %8158 = vmatprep.mubr.msk.f32.mxu1 %vm8491_vm0, %v8490_v2 }
 0x6a7   :  { %v3419_v33 = vrot.slane %v3412_v6, %v8592_v47 }
 0x6a8   :  { %8157 = vmatpush3.msk.msra.mxu1 %vm773_vm2, %v3316_v13 }
 0x6a9   :  { %v3427_v37 = vcombine.low %v3419_v33, %v3426_v34  ;;  %8159 = vmatmul.mubr.msk.f32.vlgmr.msra.gmra.mxu1 %vm766_vm3, %v8914_v28  ;;  %8166 = vmatprep.subr.mxu1 %v8490_v2 }
 0x6aa   :  { %8167 = vmatpush3.msra.mxu1 %v7903_v35  ;;  %8170 = vmatprep.mubr.msk.f32.mxu1 %vm8491_vm0, %v8490_v2 }
 0x6ab   :  { %8162 = vmatpush3.msk.msra.mxu0 %vm773_vm2, %v3427_v37  ;;  %8168 = vmatprep.subr.mxu1 %v8490_v2 }
 0x6ac   :  { %8164 = vmatmul.mubr.msk.f32.vlgmr.msra.gmra.mxu0 %vm766_vm3, %v8701_v51  ;;  %8169 = vmatpush3.msra.mxu1 %v7902_v43 }
 0x6ad   :  { %8171 = vmatmul.mubr.msk.f32.vlgmr.msra.gmra.mxu1 %vm70_vm1, %v3730_v39  ;;  %8173 = vmatprep.subr.mxu0 %v8490_v2 }
 0x6ae   :  { %8174 = vmatpush3.msra.mxu0 %v3713_v9  ;;  %8177 = vmatprep.mubr.msk.f32.mxu0 %vm8491_vm0, %v8490_v2 }
 0x6af   :  { %8175 = vmatprep.subr.mxu0 %v8490_v2  ;;  %8186 = vmatprep.subr.mxu1 %v8490_v2 }
 0x6b0   :  { %8176 = vmatpush3.msra.mxu0 %v3712_v8  ;;  %8188 = vmatprep.mubr.msk.f32.mxu1 %vm8491_vm0, %v8490_v2 }
 0x6b1   :  { %8197 = vmatprep.subr.mxu0 %v8490_v2 }
 0x760   :  { %v3163_v51 = vpop.f32.mrf.mxu1 }
 0x761   :  { %v3500_v28 = vmul.f32 0.85, %v3163_v51 }
 0x762   :  { %v8150_v0 = vpop.f32.mrf.mxu1 }
 0x763   :  { %v9108_v5 = vadd.f32 %v3500_v28, %v8728_v36 }
 0x765   :  { %v3508_v9 = vmax.f32 %v9108_v5, 0.0  ;;  %v3274_v27 = vpop.f32.mrf.mxu1 }
 0x766   :  { %v3501_v40 = vmul.f32 0.85, %v3274_v27 }
 0x767   :  { %v3512_v41 = vsel %vm1210_vm5, %v3508_v9, 0.0  ;;  %v8155_v18 = vpop.f32.mrf.mxu1 }
 0x768   :  { %v3513_v10 = vrot.slane %v3512_v41, 4  ;;  %v3505_v8 = vadd.f32 %v3501_v40, %v8728_v36 }
 0x769   :  { %v3385_v44 = vpop.f32.mrf.mxu1 }
 0x76a   :  { %v3514_v57 = vadd.f32 %v3513_v10, %v3512_v41  ;;  %v3509_v46 = vmax.f32 %v3505_v8, 0.0  ;;  %v3502_v48 = vmul.f32 0.85, %v3385_v44 }
 0x76b   :  { %v8160_v49 = vpop.f32.mrf.mxu1 }
 0x76c   :  { %v3515_v53 = vrot.slane %v3514_v57, 2  ;;  %v3519_v42 = vsel %vm1210_vm5, %v3509_v46, 0.0  ;;  %v3506_v54 = vadd.f32 %v3502_v48, %v8728_v36  ;;  %v3496_v60 = vpop.f32.mrf.mxu0 }
 0x76d   :  { %v3520_v7 = vrot.slane %v3519_v42, 4  ;;  %v3503_v61 = vmul.f32 0.85, %v3496_v60  ;;  %v9115_v59 = vpop.f32.mrf.mxu1 }
 0x76e   :  { %v3516_v14 = vadd.f32 %v3515_v53, %v3514_v57  ;;  %v3510_v62 = vmax.f32 %v3506_v54, 0.0  ;;  %v8165_v17 = vpop.f32.mrf.mxu0  ;;  %3829 = vrot.lane.b32.xlu1 %v9115_v59, %s8492_s9  ;;  %3823 = vrot.lane.b32.xlu0 %v9115_v59, %s8493_s10 }
 0x76f   :  { %v3521_v45 = vadd.f32 %v3520_v7, %v3519_v42  ;;  %v3507_v32 = vadd.f32 %v3503_v61, %v8728_v36  ;;  %v8172_v29 = vpop.f32.mrf.mxu1 }
 0x770   :  { %v3517_v63 = vrot.slane %v3516_v14, 1  ;;  %v3526_v58 = vsel %vm1210_vm5, %v3510_v62, 0.0 }
 0x771   :  { %v3522_v52 = vrot.slane %v3521_v45, 2  ;;  %v3527_v1 = vrot.slane %v3526_v58, 4  ;;  %v3511_v21 = vmax.f32 %v3507_v32, 0.0 }
 0x772   :  { %v3518_v23 = vadd.f32 %v3517_v63, %v3516_v14  ;;  %3826 = vrot.lane.b32.xlu0 %v9115_v59, %s8494_s11 }
 0x773   :  { %v3523_v3 = vadd.f32 %v3522_v52, %v3521_v45  ;;  %v3528_v55 = vadd.f32 %v3527_v1, %v3526_v58  ;;  %v3533_v4 = vsel %vm1210_vm5, %v3511_v21, 0.0 }
 0x774   :  { %v3540_v38 = vmul.f32 0.2, %v3518_v23  ;;  %v3534_v11 = vrot.slane %v3533_v4, 4 }
 0x775   :  { %v3524_v12 = vrot.slane %v3523_v3, 1  ;;  %v3529_v50 = vrot.slane %v3528_v55, 2 }
 0x776   :  { %v3544_v16 = vadd.f32 1e-06, %v3540_v38  ;;  %v3535_v19 = vadd.f32 %v3534_v11, %v3533_v4 }
 0x777   :  { %v3525_v22 = vadd.f32 %v3524_v12, %v3523_v3  ;;  %v3530_v24 = vadd.f32 %v3529_v50, %v3528_v55 }
 0x778   :  { %8392 = vrcp.f32 %v3544_v16  ;;  %v3536_v25 = vrot.slane %v3535_v19, 2 }
 0x779   :  { %v3541_v30 = vmul.f32 0.2, %v3525_v22  ;;  %v3531_v31 = vrot.slane %v3530_v24, 1 }
 0x77a   :  { %v3537_v6 = vadd.f32 %v3536_v25, %v3535_v19 }
 0x77b   :  { %v3545_v13 = vadd.f32 1e-06, %v3541_v30  ;;  %v3532_v33 = vadd.f32 %v3531_v31, %v3530_v24 }
 0x77c   :  { %v3538_v34 = vrot.slane %v3537_v6, 1 }
 0x77d   :  { %8394 = vrcp.f32 %v3545_v13  ;;  %v3542_v35 = vmul.f32 0.2, %v3532_v33 }
 0x77e   :  { %v3539_v37 = vadd.f32 %v3538_v34, %v3537_v6 }
 0x77f   :  { %v3546_v43 = vadd.f32 1e-06, %v3542_v35 }
 0x780   :  { %v3543_v39 = vmul.f32 0.2, %v3539_v37 }
 0x781   :  { %8396 = vrcp.f32 %v3546_v43 }
 0x782   :  { %v3547_v51 = vadd.f32 1e-06, %v3543_v39 }
 0x784   :  { %8398 = vrcp.f32 %v3547_v51 }
 0x785   :  { %v8393_v28 = vpop.eup %8392 }
 0x786   :  { %v9126_v0 = vmul.f32 %v8393_v28, %v3508_v9 }
 0x788   :  { %v3568_v5 = vand.u32 2147483647, %v9126_v0  ;;  %v3556_v30 = vmax.f32 %v9126_v0, 0.0  ;;  %vm3560_vm15 = vcmp.ne.f32.partialorder %v9126_v0, %v9126_v0 }
 0x78a   :  { %v8395_v27 = vpop.eup %8394  ;;  %v3572_v40 = vsub.f32 0.0, %v3568_v5 }
 0x78b   :  { %v9129_v41 = vmul.f32 %v8395_v27, %v3509_v46 }
 0x78c   :  { %v3576_v18 = vmul.f32 1.442695, %v3572_v40 }
 0x78d   :  { %v3569_v10 = vand.u32 2147483647, %v9129_v41  ;;  %v3557_v51 = vmax.f32 %v9129_v41, 0.0  ;;  %vm3561_vm8 = vcmp.ne.f32.partialorder %v9129_v41, %v9129_v41 }
 0x78e   :  { %v8397_v8 = vpop.eup %8396  ;;  %8400 = vpow2.f32 %v3576_v18 }
 0x78f   :  { %v3573_v44 = vsub.f32 0.0, %v3569_v10  ;;  %v9132_v57 = vmul.f32 %v8397_v8, %v3510_v62 }
 0x791   :  { %v8399_v48 = vpop.eup %8398  ;;  %v3578_v49 = vmul.f32 1.442695, %v3573_v44  ;;  %v3570_v53 = vand.u32 2147483647, %v9132_v57  ;;  %v3558_v43 = vmax.f32 %v9132_v57, 0.0  ;;  %vm3562_vm6 = vcmp.ne.f32.partialorder %v9132_v57, %v9132_v57 }
 0x792   :  { %v9135_v9 = vmul.f32 %v8399_v48, %v3511_v21 }
 0x793   :  { %8402 = vpow2.f32 %v3578_v49  ;;  %v3574_v42 = vsub.f32 0.0, %v3570_v53 }
 0x794   :  { %v3571_v54 = vand.u32 2147483647, %v9135_v9  ;;  %v3559_v10 = vmax.f32 %v9135_v9, 0.0  ;;  %vm3563_vm9 = vcmp.ne.f32.partialorder %v9135_v9, %v9135_v9 }
 0x795   :  { %v3580_v46 = vmul.f32 1.442695, %v3574_v42 }
 0x796   :  { %v3575_v60 = vsub.f32 0.0, %v3571_v54 }
 0x797   :  { %8404 = vpow2.f32 %v3580_v46 }
 0x798   :  { %v3582_v7 = vmul.f32 1.442695, %v3575_v60 }
 0x79a   :  { %8406 = vpow2.f32 %v3582_v7 }
 0x79b   :  { %v8401_v61 = vpop.eup %8400 }
 0x79c   :  { %v3584_v14 = vadd.f32 1.0, %v8401_v61  ;;  %v3587_v58 = vmul.f32 -0.5, %v8401_v61  ;;  %v3590_v3 = vand.u32 2147483647, %v8401_v61 }
 0x79e   :  { %8408 = vlog2.f32 %v3584_v14  ;;  %v3588_v21 = vadd.f32 1.0, %v3587_v58  ;;  %vm3591_vm12 = vcmp.lt.f32.partialorder %v3590_v3, 0.0004427343 }
 0x7a0   :  { %v8403_v62 = vpop.eup %8402  ;;  %v3589_v12 = vmul.f32 %v8401_v61, %v3588_v21 }
 0x7a1   :  { %v3593_v17 = vadd.f32 1.0, %v8403_v62  ;;  %v3596_v1 = vmul.f32 -0.5, %v8403_v62  ;;  %v3599_v50 = vand.u32 2147483647, %v8403_v62 }
 0x7a3   :  { %8410 = vlog2.f32 %v3593_v17  ;;  %v3597_v38 = vadd.f32 1.0, %v3596_v1  ;;  %vm3600_vm13 = vcmp.lt.f32.partialorder %v3599_v50, 0.0004427343 }
 0x7a4   :  { %v8405_v45 = vpop.eup %8404 }
 0x7a5   :  { %v3602_v32 = vadd.f32 1.0, %v8405_v45  ;;  %v3605_v23 = vmul.f32 -0.5, %v8405_v45  ;;  %v3608_v22 = vand.u32 2147483647, %v8405_v45  ;;  %v3598_v31 = vmul.f32 %v8403_v62, %v3597_v38 }
 0x7a7   :  { %v8407_v29 = vpop.eup %8406  ;;  %8412 = vlog2.f32 %v3602_v32  ;;  %v3606_v16 = vadd.f32 1.0, %v3605_v23  ;;  %vm3609_vm14 = vcmp.lt.f32.partialorder %v3608_v22, 0.0004427343 }
 0x7a8   :  { %v3611_v63 = vadd.f32 1.0, %v8407_v29  ;;  %v3614_v11 = vmul.f32 -0.5, %v8407_v29  ;;  %v3617_v34 = vand.u32 2147483647, %v8407_v29 }
 0x7a9   :  { %v3607_v33 = vmul.f32 %v8405_v45, %v3606_v16 }
 0x7aa   :  { %8414 = vlog2.f32 %v3611_v63  ;;  %v3615_v6 = vadd.f32 1.0, %v3614_v11  ;;  %vm3618_vm7 = vcmp.lt.f32.partialorder %v3617_v34, 0.0004427343 }
 0x7ab   :  { %v8409_v52 = vpop.eup %8408 }
 0x7ac   :  { %v3586_v55 = vmul.f32 0.6931472, %v8409_v52  ;;  %v3616_v40 = vmul.f32 %v8407_v29, %v3615_v6 }
 0x7ae   :  { %v3592_v24 = vsel %vm3591_vm12, %v3589_v12, %v3586_v55 }
 0x7af   :  { %v3620_v35 = vadd.f32 %v3592_v24, %v3556_v30 }
 0x7b0   :  { %v8411_v4 = vpop.eup %8410 }
 0x7b1   :  { %v3595_v19 = vmul.f32 0.6931472, %v8411_v4  ;;  %v3624_v44 = vsel %vm3560_vm15, %v9126_v0, %v3620_v35 }
 0x7b3   :  { %v3601_v37 = vsel %vm3600_vm13, %v3598_v31, %v3595_v19 }
 0x7b4   :  { %v8413_v25 = vpop.eup %8412  ;;  %v3621_v18 = vadd.f32 %v3601_v37, %v3557_v51 }
 0x7b5   :  { %v3604_v13 = vmul.f32 0.6931472, %v8413_v25 }
 0x7b6   :  { %v3625_v54 = vsel %vm3561_vm8, %v9129_v41, %v3621_v18 }
 0x7b7   :  { %v8415_v39 = vpop.eup %8414  ;;  %v3610_v28 = vsel %vm3609_vm14, %v3607_v33, %v3604_v13 }
 0x7b8   :  { %v3622_v5 = vadd.f32 %v3610_v28, %v3558_v43  ;;  %v3613_v27 = vmul.f32 0.6931472, %v8415_v39 }
 0x7ba   :  { %v3619_v8 = vsel %vm3618_vm7, %v3616_v40, %v3613_v27  ;;  %v3626_v48 = vsel %vm3562_vm6, %v9132_v57, %v3622_v5 }
 0x7bb   :  { %v3623_v49 = vadd.f32 %v3619_v8, %v3559_v10  ;;  %v3628_v53 = vcombine.low %v3624_v44, %v3626_v48  ;;  %v3629_v42 = vcombine.high %v3624_v44, %v3626_v48 }
 0x7bd   :  { %v3627_v46 = vsel %vm3563_vm9, %v9135_v9, %v3623_v49  ;;  %v3636_v60 = vrot.slane %v3628_v53, %v8574_v20  ;;  %v9156_v0 = vrot.slane %v3629_v42, %v8574_v20 }
 0x7be   :  { %v3644_v7 = vcombine.low %v3625_v54, %v3627_v46  ;;  %v3645_v57 = vcombine.high %v3625_v54, %v3627_v46 }
 0x7c0   :  { %v3652_v61 = vrot.slane %v3644_v7, %v8574_v20  ;;  %v9160_v14 = vrot.slane %v3645_v57, %v8574_v20 }
 0x7c2   :  { %v3661_v62 = vcombine.high %v3636_v60, %v3652_v61  ;;  %v3660_v17 = vcombine.low %v3636_v60, %v3652_v61  ;;  %v3676_v45 = vcombine.low %v9156_v0, %v9160_v14 }
 0x7c4   :  { %v3675_v41 = vrot.slane %v3661_v62, %v8577_v26  ;;  %v9166_v9 = vrot.slane %v3660_v17, %v8577_v26 }
 0x7c6   :  { %3691 = vrot.lane.b32.xlu0 %v3675_v41, %s8498_s0  ;;  %v3677_v32 = vcombine.high %v9166_v9, %v8490_v2  ;;  %v3678_v29 = vcombine.high %v3675_v41, %v8490_v2 }
 0x7ca   :  { %3687 = vrot.lane.b32.xlu0 %v3677_v32, %s8499_s25 }
 0x7ce   :  { %3695 = vrot.lane.b32.xlu0 %v3678_v29, %s8500_s26 }
 0x7e0   :  { %v3830_v63 = vpop.permute.xlu1 %3829  ;;  %v3824_v58 = vpop.permute.xlu0 %3823 }
 0x7e1   :  { %v3848_v52 = vcombine.low %v3824_v58, %v3830_v63  ;;  %v3849_v1 = vcombine.high %v3824_v58, %v3830_v63 }
 0x7e3   :  { %v3856_v55 = vrot.slane %v3848_v52, %v8574_v20  ;;  %v3863_v4 = vrot.slane %v3849_v1, %v8574_v20 }
 0x7e4   :  { %v3827_v21 = vpop.permute.xlu0 %3826 }
 0x7e5   :  { %v3832_v23 = vcombine.low %v9115_v59, %v3827_v21  ;;  %v3833_v3 = vcombine.high %v9115_v59, %v3827_v21 }
 0x7e7   :  { %v3840_v38 = vrot.slane %v3832_v23, %v8574_v20  ;;  %v3847_v11 = vrot.slane %v3833_v3, %v8574_v20 }
 0x7e9   :  { %v3864_v12 = vcombine.low %v3840_v38, %v3856_v55  ;;  %v3865_v50 = vcombine.high %v3840_v38, %v3856_v55  ;;  %v3880_v16 = vcombine.low %v3847_v11, %v3863_v4 }
 0x7eb   :  { %v3872_v19 = vrot.slane %v3864_v12, %v8577_v26  ;;  %v3879_v22 = vrot.slane %v3865_v50, %v8577_v26  ;;  %v3905_v24 = vrot.slane %v3880_v16, %v8577_v26 }
 0x7ed   :  { %v3883_v25 = vcombine.low %v3872_v19, %v3879_v22  ;;  %v7905_v30 = vcombine.high %v3872_v19, %v3879_v22  ;;  %v3912_v59 = vrot.slane %v3905_v24, %v8574_v20 }
 0x7ef   :  { %v3890_v31 = vrot.slane %v3883_v25, %v8574_v20  ;;  %v3898_v6 = vrot.slane %v7905_v30, %v8574_v20  ;;  %v3929_v13 = vcombine.high %v3912_v59, %v8490_v2  ;;  %v3936_v33 = vrot.slane %v3912_v59, %v8577_v26 }
 0x7f1   :  { %v3913_v34 = vcombine.low %v3890_v31, %v3898_v6  ;;  %v3914_v35 = vcombine.high %v3890_v31, %v3898_v6  ;;  %v3943_v37 = vrot.slane %v3929_v13, %v8577_v26  ;;  %v7906_v43 = vcombine.low %v3936_v33, %v3936_v33 }
 0x7f2   :  { %v7907_v39 = vcombine.high %v3936_v33, %v3936_v33 }
 0x7f3   :  { %v3921_v51 = vrot.slane %v3913_v34, %v8577_v26  ;;  %v3928_v28 = vrot.slane %v3914_v35, %v8577_v26  ;;  %v7908_v5 = vcombine.low %v3943_v37, %v3943_v37  ;;  %v3966_v27 = vrot.slane %v7906_v43, %v8592_v47 }
 0x7f4   :  { %v4005_v40 = vrot.slane %v7907_v39, %v8592_v47  ;;  %v7909_v18 = vcombine.high %v3943_v37, %v3943_v37 }
 0x7f5   :  { %v3944_v10 = vcombine.low %v3921_v51, %v3936_v33  ;;  %v3945_v8 = vcombine.high %v3921_v51, %v3936_v33  ;;  %v3946_v44 = vcombine.low %v3928_v28, %v3943_v37  ;;  %v3947_v48 = vcombine.high %v3928_v28, %v3943_v37 }
 0x7f6   :  { %v4044_v49 = vrot.slane %v7908_v5, %v8592_v47  ;;  %v4083_v53 = vrot.slane %v7909_v18, %v8592_v47  ;;  %v3981_v7 = vrot.slane %v3966_v27, %v8592_v47  ;;  %v4020_v57 = vrot.slane %v4005_v40, %v8592_v47 }
 0x7f7   :  { %v3959_v42 = vrot.slane %v3944_v10, %v8592_v47  ;;  %v3998_v54 = vrot.slane %v3945_v8, %v8592_v47  ;;  %v4037_v46 = vrot.slane %v3946_v44, %v8592_v47  ;;  %v4076_v60 = vrot.slane %v3947_v48, %v8592_v47 }
 0x7f8   :  { %v4059_v61 = vrot.slane %v4044_v49, %v8592_v47  ;;  %v4098_v32 = vrot.slane %v4083_v53, %v8592_v47 }
 0x7f9   :  { %v3967_v62 = vcombine.high %v3959_v42, %v3959_v42  ;;  %v4006_v17 = vcombine.high %v3998_v54, %v3998_v54  ;;  %v4013_v41 = vrot.slane %v3998_v54, %v8592_v47  ;;  %v3974_v29 = vrot.slane %v3959_v42, %v8592_v47 }
 0x7fa   :  { %v4045_v63 = vcombine.high %v4037_v46, %v4037_v46  ;;  %v4091_v58 = vrot.slane %v4076_v60, %v8592_v47  ;;  %v4084_v52 = vcombine.high %v4076_v60, %v4076_v60  ;;  %v4052_v55 = vrot.slane %v4037_v46, %v8592_v47  ;;  %v7915_v60 = vld [vmem:[%s9858_s2 + $0x18] sm:$0x1f] }
 0x7fb   :  { %v3988_v1 = vrot.slane %v3967_v62, %v8592_v47  ;;  %v4027_v21 = vrot.slane %v4006_v17, %v8592_v47  ;;  %v4028_v23 = vcombine.high %v4013_v41, %v4013_v41  ;;  %v4110_v3 = vcombine.low %v3981_v7, %v4013_v41  ;;  %8187 = vmatpush3.msk.msra.mxu1 %vm773_vm2, %v7915_v60 }
 0x7fc   :  { %v4066_v4 = vrot.slane %v4045_v63, %v8592_v47  ;;  %v4160_v38 = vcombine.low %v4059_v61, %v4091_v58  ;;  %v4105_v11 = vrot.slane %v4084_v52, %v8592_v47  ;;  %v4106_v19 = vcombine.high %v4091_v58, %v4091_v58  ;;  %8208 = vmatprep.subr.mxu1 %v8490_v2 }
 0x7fd   :  { %v4108_v12 = vcombine.low %v3974_v29, %v3988_v1  ;;  %v7910_v50 = vcombine.high %v3974_v29, %v3988_v1  ;;  %v4111_v16 = vcombine.low %v4027_v21, %v4028_v23  ;;  %v4132_v22 = vrot.slane %v4110_v3, %v8592_v47 }
 0x7fe   :  { %v4029_v24 = vcombine.high %v4027_v21, %v4027_v21  ;;  %v4158_v25 = vcombine.low %v4052_v55, %v4066_v4  ;;  %v7911_v30 = vcombine.high %v4052_v55, %v4066_v4  ;;  %v4107_v13 = vcombine.high %v4105_v11, %v4105_v11 }
 0x7ff   :  { %v4118_v59 = vrot.slane %v4108_v12, %v8592_v47  ;;  %v4125_v31 = vrot.slane %v7910_v50, %v8592_v47  ;;  %v4139_v6 = vrot.slane %v4111_v16, %v8592_v47  ;;  %v4188_v43 = vrot.slane %v4160_v38, %v8592_v47 }
 0x800   :  { %v4157_v33 = vcombine.low %v4029_v24, %v4020_v57  ;;  %v4181_v34 = vrot.slane %v7911_v30, %v8592_v47  ;;  %v4207_v39 = vcombine.low %v4107_v13, %v4098_v32  ;;  %v4174_v28 = vrot.slane %v4158_v25, %v8592_v47 }
 0x801   :  { %v4140_v35 = vcombine.low %v4118_v59, %v4125_v31  ;;  %v4141_v37 = vcombine.low %v4132_v22, %v4139_v6  ;;  %v4206_v18 = vcombine.low %v4105_v11, %v4106_v19 }
 0x802   :  { %v4167_v51 = vrot.slane %v4157_v33, %v8592_v47  ;;  %v4190_v40 = vcombine.low %v4181_v34, %v4188_v43  ;;  %v4221_v44 = vrot.slane %v4207_v39, %v8592_v47 }
 0x803   :  { %v4148_v5 = vrot.slane %v4140_v35, %v8592_v47  ;;  %v4155_v27 = vrot.slane %v4141_v37, %v8592_v47  ;;  %v4214_v53 = vrot.slane %v4206_v18, %v8592_v47 }
 0x804   :  { %v4189_v10 = vcombine.low %v4167_v51, %v4174_v28  ;;  %v4204_v49 = vrot.slane %v4190_v40, %v8592_v47 }
 0x805   :  { %v4156_v8 = vcombine.low %v4148_v5, %v4155_v27  ;;  %v4222_v54 = vcombine.low %v4214_v53, %v4221_v44 }
 0x806   :  { %v4197_v48 = vrot.slane %v4189_v10, %v8592_v47 }
 0x807   :  { %8178 = vmatmul.mubr.msk.f32.vlgmr.msra.gmra.mxu0 %vm70_vm1, %v4156_v8  ;;  %v4229_v46 = vrot.slane %v4222_v54, %v8592_v47 }
 0x808   :  { %8180 = vmatprep.mubr.msk.f32.mxu0 %vm8491_vm0, %v8490_v2  ;;  %v4205_v42 = vcombine.low %v4197_v48, %v4204_v49  ;;  %v7916_v48 = vld [vmem:[%s9858_s2 + $0x20] sm:$0x1f] }
 0x809   :  { %8198 = vmatpush3.msk.msra.mxu0 %vm773_vm2, %v7916_v48 }
 0x80a   :  { %8223 = vmatprep.subr.mxu0 %v8490_v2 }
 0x80b   :  { %8181 = vmatmul.mubr.msk.f32.gmra.mxu0 %vm70_vm1, %v4205_v42 }
 0x80c   :  { %8183 = vmatprep.mubr.msk.f32.mxu0 %vm8491_vm0, %v8490_v2 }
 0x80f   :  { %8184 = vmatmul.mubr.msk.f32.gmra.mxu0 %vm70_vm1, %v4229_v46 }
 0x810   :  { %8199 = vmatprep.mubr.msk.f32.mxu0 %vm8491_vm0, %v8490_v2 }
 0x8c7   :  { %v9240_v7 = vpop.f32.mrf.mxu0 }
 0x8c8   :  { %v4319_v57 = vcombine.high %v9240_v7, %v9240_v7  ;;  %8189 = vmatmul.mubr.msk.f32.vlgmr.msra.gmra.mxu1 %vm766_vm3, %v9240_v7 }
 0x8c9   :  { %v8179_v61 = vpop.f32.mrf.mxu0  ;;  %8191 = vmatprep.mubr.msk.f32.mxu1 %vm8491_vm0, %v8490_v2 }
 0x8ca   :  { %v4333_v62 = vrot.slane %v4319_v57, %v8592_v47 }
 0x8cb   :  { %v4307_v17 = vpop.f32.mrf.mxu0 }
 0x8cc   :  { %v4335_v41 = vcombine.high %v4333_v62, %v4333_v62  ;;  %v9250_v32 = vrot.slane %v4333_v62, %v8592_v47  ;;  %v4368_v29 = vcombine.high %v4307_v17, %v4307_v17  ;;  %8192 = vmatmul.mubr.msk.f32.gmra.mxu1 %vm766_vm3, %v4307_v17  ;;  %v4375_v63 = vrot.slane %v4307_v17, %v8592_v47 }
 0x8cd   :  { %v8182_v58 = vpop.f32.mrf.mxu0  ;;  %8194 = vmatprep.mubr.msk.f32.mxu1 %vm8491_vm0, %v8490_v2 }
 0x8ce   :  { %v4363_v52 = vrot.slane %v4335_v41, %v8592_v47  ;;  %v4365_v1 = vcombine.high %v9250_v32, %v9250_v32  ;;  %v9260_v21 = vrot.slane %v4368_v29, %v8592_v47  ;;  %v4383_v23 = vcombine.high %v4375_v63, %v4375_v63 }
 0x8cf   :  { %v4312_v3 = vpop.f32.mrf.mxu0  ;;  %v9263_v38 = vrot.slane %v4375_v63, %v8592_v47 }
 0x8d0   :  { %v5651_v55 = vcombine.low %v4363_v52, %v4365_v1  ;;  %v4367_v4 = vcombine.high %v4363_v52, %v4363_v52  ;;  %8195 = vmatmul.mubr.msk.f32.gmra.mxu1 %vm766_vm3, %v4312_v3  ;;  %v4384_v11 = vcombine.high %v9260_v21, %v9260_v21  ;;  %v9269_v12 = vrot.slane %v4383_v23, %v8592_v47 }
 0x8d1   :  { %v8185_v50 = vpop.f32.mrf.mxu0  ;;  %8210 = vmatprep.mubr.msk.f32.mxu1 %vm8491_vm0, %v8490_v2  ;;  %v4423_v19 = vrot.slane %v4312_v3, %v8592_v47 }
 0x8d2   :  { %v5652_v16 = vcombine.low %v4367_v4, %v9263_v38  ;;  %v9276_v22 = vrot.slane %v4384_v11, %v8592_v47  ;;  %v5659_v24 = vrot.slane %v5651_v55, %v8592_v47  ;;  %v5673_v30 = vrot.slane %v9269_v12, %v8592_v47 }
 0x8d3   :  { %v4424_v59 = vcombine.high %v4423_v19, %v4423_v19  ;;  %v4431_v31 = vrot.slane %v4423_v19, %v8592_v47 }
 0x8d4   :  { %v5666_v25 = vrot.slane %v5652_v16, %v8592_v47  ;;  %v4416_v13 = vcombine.high %v9276_v22, %v9276_v22  ;;  %v5688_v37 = vrot.slane %v5673_v30, %v8592_v47 }
 0x8d5   :  { %v4438_v33 = vrot.slane %v4424_v59, %v8592_v47  ;;  %v4439_v34 = vcombine.high %v4431_v31, %v4431_v31 }
 0x8d6   :  { %v5674_v6 = vcombine.low %v5659_v24, %v5666_v25  ;;  %v5955_v39 = vcombine.low %v4416_v13, %v4431_v31 }
 0x8d7   :  { %v4440_v43 = vcombine.high %v4438_v33, %v4438_v33  ;;  %v5956_v51 = vcombine.low %v4438_v33, %v4439_v34 }
 0x8d8   :  { %v5681_v35 = vrot.slane %v5674_v6, %v8592_v47  ;;  %v5963_v28 = vrot.slane %v5955_v39, %v8592_v47 }
 0x8d9   :  { %v5970_v27 = vrot.slane %v5956_v51, %v8592_v47  ;;  %v5977_v40 = vrot.slane %v4440_v43, %v8592_v47 }
 0x8da   :  { %v9289_v5 = vcombine.low %v5681_v35, %v5688_v37 }
 0x8db   :  { %v5978_v18 = vcombine.low %v5963_v28, %v5970_v27  ;;  %v5992_v8 = vrot.slane %v5977_v40, %v8592_v47 }
 0x8dd   :  { %v5985_v10 = vrot.slane %v5978_v18, %v8592_v47 }
 0x8df   :  { %v9295_v44 = vcombine.low %v5985_v10, %v5992_v8 }
 0x988   :  { %v4520_v49 = vpop.f32.mrf.mxu1 }
 0x989   :  { %v4537_v53 = vcombine.high %v4520_v49, %v4520_v49  ;;  %v4544_v42 = vrot.slane %v4520_v49, %v8592_v47 }
 0x98a   :  { %v8190_v54 = vpop.f32.mrf.mxu1 }
 0x98b   :  { %v4551_v46 = vrot.slane %v4537_v53, %v8592_v47  ;;  %v4552_v60 = vcombine.high %v4544_v42, %v4544_v42  ;;  %v4560_v57 = vrot.slane %v4544_v42, %v8592_v47 }
 0x98c   :  { %v4525_v61 = vpop.f32.mrf.mxu1 }
 0x98d   :  { %v4553_v62 = vcombine.high %v4551_v46, %v4551_v46  ;;  %v4567_v17 = vrot.slane %v4551_v46, %v8592_v47  ;;  %v4574_v41 = vrot.slane %v4552_v60, %v8592_v47  ;;  %v4582_v29 = vcombine.high %v4560_v57, %v4560_v57 }
 0x98e   :  { %v4586_v63 = vcombine.high %v4525_v61, %v4525_v61  ;;  %v4593_v58 = vrot.slane %v4525_v61, %v8592_v47  ;;  %v8193_v52 = vpop.f32.mrf.mxu1  ;;  %v4679_v4 = vmul.f32 0.85, %v4560_v57 }
 0x98f   :  { %v4581_v1 = vrot.slane %v4553_v62, %v8592_v47  ;;  %v4583_v23 = vcombine.high %v4567_v17, %v4567_v17  ;;  %v4584_v3 = vcombine.high %v4574_v41, %v4574_v41  ;;  %v4680_v55 = vmul.f32 0.85, %v4574_v41 }
 0x990   :  { %v4683_v11 = vmul.f32 0.85, %v4567_v17  ;;  %v4600_v50 = vrot.slane %v4586_v63, %v8592_v47  ;;  %v4601_v16 = vcombine.high %v4593_v58, %v4593_v58  ;;  %v4530_v19 = vpop.f32.mrf.mxu1  ;;  %v4681_v25 = vmul.f32 0.85, %v4582_v29 }
 0x991   :  { %v4585_v24 = vcombine.high %v4581_v1, %v4581_v1  ;;  %v4682_v30 = vmul.f32 0.85, %v4584_v3  ;;  %v4684_v59 = vmul.f32 0.85, %v4581_v1  ;;  %v4685_v31 = vmul.f32 0.85, %v4583_v23 }
 0x992   :  { %v4719_v6 = vcombine.low %v4679_v4, %v4680_v55  ;;  %v4602_v13 = vcombine.high %v4600_v50, %v4600_v50  ;;  %v4609_v33 = vrot.slane %v4593_v58, %v8592_v47  ;;  %v8196_v34 = vpop.f32.mrf.mxu1  ;;  %v4616_v37 = vrot.slane %v4600_v50, %v8592_v47 }
 0x993   :  { %v4720_v35 = vcombine.low %v4681_v25, %v4682_v30  ;;  %v4623_v43 = vrot.slane %v4601_v16, %v8592_v47  ;;  %v4741_v39 = vrot.slane %v4683_v11, %v8592_v47  ;;  %v4758_v8 = vcombine.low %v4684_v59, %v4685_v31 }
 0x994   :  { %v4630_v51 = vrot.slane %v4602_v13, %v8592_v47  ;;  %v4631_v28 = vcombine.high %v4609_v33, %v4609_v33  ;;  %v4727_v27 = vrot.slane %v4719_v6, %v8592_v47  ;;  %v4632_v18 = vcombine.high %v4616_v37, %v4616_v37 }
 0x995   :  { %v4734_v40 = vrot.slane %v4720_v35, %v8592_v47  ;;  %v4633_v10 = vcombine.high %v4623_v43, %v4623_v43  ;;  %v4686_v48 = vmul.f32 0.85, %v4585_v24  ;;  %v4687_v49 = vmul.f32 0.85, %v4609_v33 }
 0x996   :  { %v4688_v53 = vmul.f32 0.85, %v4623_v43  ;;  %v4689_v54 = vmul.f32 0.85, %v4631_v28  ;;  %v4634_v60 = vcombine.high %v4630_v51, %v4630_v51  ;;  %v4691_v57 = vmul.f32 0.85, %v4616_v37 }
 0x997   :  { %v4742_v42 = vcombine.low %v4727_v27, %v4734_v40  ;;  %v4690_v46 = vmul.f32 0.85, %v4633_v10  ;;  %v4692_v61 = vmul.f32 0.85, %v4630_v51  ;;  %v4693_v62 = vmul.f32 0.85, %v4632_v18 }
 0x998   :  { %v4759_v17 = vcombine.low %v4686_v48, %v4687_v49  ;;  %v4756_v29 = vrot.slane %v4741_v39, %v8592_v47  ;;  %v4641_v58 = vrot.slane %v4530_v19, %v8592_v47  ;;  %v4766_v52 = vrot.slane %v4758_v8, %v8592_v47 }
 0x999   :  { %v4749_v41 = vrot.slane %v4742_v42, %v8592_v47  ;;  %v4797_v63 = vcombine.low %v4689_v54, %v4690_v46  ;;  %v4780_v23 = vrot.slane %v4688_v53, %v8592_v47  ;;  %v4798_v3 = vcombine.low %v4691_v57, %v4692_v61 }
 0x99a   :  { %v4773_v1 = vrot.slane %v4759_v17, %v8592_v47  ;;  %v4642_v11 = vcombine.high %v4641_v58, %v4641_v58  ;;  %v4649_v50 = vrot.slane %v4641_v58, %v8592_v47  ;;  %v4819_v25 = vrot.slane %v4693_v62, %v8592_v47 }
 0x99b   :  { %v4757_v55 = vcombine.low %v4749_v41, %v4756_v29  ;;  %v4805_v4 = vrot.slane %v4797_v63, %v8592_v47  ;;  %v4812_v24 = vrot.slane %v4798_v3, %v8592_v47  ;;  %v4694_v30 = vmul.f32 0.85, %v4634_v60 }
 0x99c   :  { %v4781_v16 = vcombine.low %v4766_v52, %v4773_v1  ;;  %v4656_v59 = vrot.slane %v4642_v11, %v8592_v47  ;;  %v4657_v31 = vcombine.high %v4649_v50, %v4649_v50  ;;  %v4795_v13 = vrot.slane %v4780_v23, %v8592_v47 }
 0x99d   :  { %v9328_v19 = vadd.f32 %v4757_v55, %v8728_v36  ;;  %v4820_v33 = vcombine.low %v4805_v4, %v4812_v24  ;;  %v4695_v34 = vmul.f32 0.85, %v4649_v50  ;;  %v4834_v27 = vrot.slane %v4819_v25, %v8592_v47 }
 0x99e   :  { %v4788_v6 = vrot.slane %v4781_v16, %v8592_v47  ;;  %v4658_v37 = vcombine.high %v4656_v59, %v4656_v59  ;;  %v4696_v43 = vmul.f32 0.85, %v4656_v59  ;;  %v4697_v39 = vmul.f32 0.85, %v4657_v31 }
 0x99f   :  { %v4883_v35 = vmax.f32 %v9328_v19, 0.0  ;;  %v4827_v28 = vrot.slane %v4820_v33, %v8592_v47  ;;  %v4836_v40 = vcombine.low %v4694_v30, %v4695_v34 }
 0x9a0   :  { %v4796_v51 = vcombine.low %v4788_v6, %v4795_v13  ;;  %v4698_v10 = vmul.f32 0.85, %v4658_v37  ;;  %v4837_v8 = vcombine.low %v4696_v43, %v4697_v39 }
 0x9a1   :  { %v4887_v18 = vsel %vm1210_vm5, %v4883_v35, 0.0  ;;  %v4835_v49 = vcombine.low %v4827_v28, %v4834_v27  ;;  %v4844_v42 = vrot.slane %v4836_v40, %v8592_v47 }
 0x9a2   :  { %v4888_v48 = vrot.slane %v4887_v18, 4  ;;  %v4880_v53 = vadd.f32 %v4796_v51, %v8728_v36  ;;  %v4851_v54 = vrot.slane %v4837_v8, %v8592_v47  ;;  %v4858_v46 = vrot.slane %v4698_v10, %v8592_v47 }
 0x9a3   :  { %v4881_v57 = vadd.f32 %v4835_v49, %v8728_v36 }
 0x9a4   :  { %v4889_v60 = vadd.f32 %v4888_v48, %v4887_v18  ;;  %v4884_v61 = vmax.f32 %v4880_v53, 0.0  ;;  %v4859_v62 = vcombine.low %v4844_v42, %v4851_v54  ;;  %v4873_v52 = vrot.slane %v4858_v46, %v8592_v47 }
 0x9a5   :  { %v4885_v41 = vmax.f32 %v4881_v57, 0.0 }
 0x9a6   :  { %v4890_v17 = vrot.slane %v4889_v60, 2  ;;  %v4894_v29 = vsel %vm1210_vm5, %v4884_v61, 0.0  ;;  %v4866_v58 = vrot.slane %v4859_v62, %v8592_v47 }
 0x9a7   :  { %v4895_v63 = vrot.slane %v4894_v29, 4  ;;  %v4901_v23 = vsel %vm1210_vm5, %v4885_v41, 0.0 }
 0x9a8   :  { %v4891_v1 = vadd.f32 %v4890_v17, %v4889_v60  ;;  %v4902_v55 = vrot.slane %v4901_v23, 4  ;;  %v4874_v4 = vcombine.low %v4866_v58, %v4873_v52 }
 0x9a9   :  { %v4896_v3 = vadd.f32 %v4895_v63, %v4894_v29 }
 0x9aa   :  { %v4892_v11 = vrot.slane %v4891_v1, 1  ;;  %v4903_v16 = vadd.f32 %v4902_v55, %v4901_v23  ;;  %v4882_v24 = vadd.f32 %v4874_v4, %v8728_v36 }
 0x9ab   :  { %v4897_v50 = vrot.slane %v4896_v3, 2 }
 0x9ac   :  { %v4893_v25 = vadd.f32 %v4892_v11, %v4891_v1  ;;  %v4904_v59 = vrot.slane %v4903_v16, 2  ;;  %v4886_v31 = vmax.f32 %v4882_v24, 0.0 }
 0x9ad   :  { %v4898_v30 = vadd.f32 %v4897_v50, %v4896_v3 }
 0x9ae   :  { %v4915_v6 = vmul.f32 0.2, %v4893_v25  ;;  %v4905_v33 = vadd.f32 %v4904_v59, %v4903_v16  ;;  %v4908_v34 = vsel %vm1210_vm5, %v4886_v31, 0.0 }
 0x9af   :  { %v4899_v13 = vrot.slane %v4898_v30, 1  ;;  %v4909_v43 = vrot.slane %v4908_v34, 4 }
 0x9b0   :  { %v4919_v37 = vadd.f32 1e-06, %v4915_v6  ;;  %v4906_v51 = vrot.slane %v4905_v33, 1 }
 0x9b1   :  { %v4900_v39 = vadd.f32 %v4899_v13, %v4898_v30  ;;  %v4910_v28 = vadd.f32 %v4909_v43, %v4908_v34 }
 0x9b2   :  { %8416 = vrcp.f32 %v4919_v37  ;;  %v4907_v27 = vadd.f32 %v4906_v51, %v4905_v33 }
 0x9b3   :  { %v4916_v40 = vmul.f32 0.2, %v4900_v39  ;;  %v4911_v18 = vrot.slane %v4910_v28, 2 }
 0x9b4   :  { %v4917_v10 = vmul.f32 0.2, %v4907_v27 }
 0x9b5   :  { %v4920_v8 = vadd.f32 1e-06, %v4916_v40  ;;  %v4912_v48 = vadd.f32 %v4911_v18, %v4910_v28 }
 0x9b6   :  { %v4921_v49 = vadd.f32 1e-06, %v4917_v10 }
 0x9b7   :  { %8418 = vrcp.f32 %v4920_v8  ;;  %v4913_v53 = vrot.slane %v4912_v48, 1 }
 0x9b8   :  { %8420 = vrcp.f32 %v4921_v49 }
 0x9b9   :  { %v4914_v42 = vadd.f32 %v4913_v53, %v4912_v48 }
 0x9bb   :  { %v4918_v54 = vmul.f32 0.2, %v4914_v42 }
 0x9bd   :  { %v4922_v46 = vadd.f32 1e-06, %v4918_v54 }
 0x9bf   :  { %v8417_v60 = vpop.eup %8416  ;;  %8422 = vrcp.f32 %v4922_v46 }
 0x9c0   :  { %v4924_v57 = vmul.f32 %v8417_v60, %v4883_v35 }
 0x9c2   :  { %v4943_v62 = vand.u32 2147483647, %v4924_v57  ;;  %v4931_v18 = vmax.f32 %v4924_v57, 0.0  ;;  %vm4935_vm10 = vcmp.ne.f32.partialorder %v4924_v57, %v4924_v57 }
 0x9c4   :  { %v8419_v17 = vpop.eup %8418  ;;  %v4947_v29 = vsub.f32 0.0, %v4943_v62 }
 0x9c5   :  { %v9352_v63 = vmul.f32 %v8419_v17, %v4884_v61  ;;  %v8421_v58 = vpop.eup %8420 }
 0x9c6   :  { %v4951_v52 = vmul.f32 1.442695, %v4947_v29  ;;  %v9354_v1 = vmul.f32 %v8421_v58, %v4885_v41 }
 0x9c7   :  { %v4944_v23 = vand.u32 2147483647, %v9352_v63  ;;  %v4932_v62 = vmax.f32 %v9352_v63, 0.0  ;;  %vm4936_vm13 = vcmp.ne.f32.partialorder %v9352_v63, %v9352_v63 }
 0x9c8   :  { %8424 = vpow2.f32 %v4951_v52  ;;  %v4945_v3 = vand.u32 2147483647, %v9354_v1  ;;  %vm4937_vm14 = vcmp.ne.f32.partialorder %v9354_v1, %v9354_v1 }
 0x9c9   :  { %v4948_v55 = vsub.f32 0.0, %v4944_v23 }
 0x9ca   :  { %v4949_v4 = vsub.f32 0.0, %v4945_v3  ;;  %v4933_v3 = vmax.f32 %v9354_v1, 0.0 }
 0x9cb   :  { %v4953_v11 = vmul.f32 1.442695, %v4948_v55 }
 0x9cc   :  { %v8423_v19 = vpop.eup %8422  ;;  %v4955_v35 = vmul.f32 1.442695, %v4949_v4 }
 0x9cd   :  { %8426 = vpow2.f32 %v4953_v11  ;;  %v9358_v50 = vmul.f32 %v8423_v19, %v4886_v31 }
 0x9ce   :  { %8428 = vpow2.f32 %v4955_v35 }
 0x9cf   :  { %v4946_v61 = vand.u32 2147483647, %v9358_v50  ;;  %vm4938_vm6 = vcmp.ne.f32.partialorder %v9358_v50, %v9358_v50 }
 0x9d1   :  { %v4950_v16 = vsub.f32 0.0, %v4946_v61 }
 0x9d3   :  { %v4957_v24 = vmul.f32 1.442695, %v4950_v16  ;;  %v4934_v16 = vmax.f32 %v9358_v50, 0.0 }
 0x9d5   :  { %v8425_v41 = vpop.eup %8424  ;;  %8430 = vpow2.f32 %v4957_v24 }
 0x9d6   :  { %v4959_v25 = vadd.f32 1.0, %v8425_v41  ;;  %v4962_v33 = vmul.f32 -0.5, %v8425_v41  ;;  %v4965_v31 = vand.u32 2147483647, %v8425_v41 }
 0x9d8   :  { %8432 = vlog2.f32 %v4959_v25  ;;  %v4963_v34 = vadd.f32 1.0, %v4962_v33  ;;  %vm4966_vm1 = vcmp.lt.f32.partialorder %v4965_v31, 0.0004427343 }
 0x9da   :  { %v8427_v30 = vpop.eup %8426  ;;  %v4964_v40 = vmul.f32 %v8425_v41, %v4963_v34 }
 0x9db   :  { %v4968_v59 = vadd.f32 1.0, %v8427_v30  ;;  %v8429_v6 = vpop.eup %8428  ;;  %v4971_v43 = vmul.f32 -0.5, %v8427_v30  ;;  %v4974_v48 = vand.u32 2147483647, %v8427_v30 }
 0x9dc   :  { %v4977_v13 = vadd.f32 1.0, %v8429_v6  ;;  %v4980_v28 = vmul.f32 -0.5, %v8429_v6  ;;  %v4983_v42 = vand.u32 2147483647, %v8429_v6 }
 0x9dd   :  { %8434 = vlog2.f32 %v4968_v59  ;;  %v4972_v10 = vadd.f32 1.0, %v4971_v43  ;;  %vm4975_vm11 = vcmp.lt.f32.partialorder %v4974_v48, 0.0004427343 }
 0x9de   :  { %8436 = vlog2.f32 %v4977_v13  ;;  %v4981_v53 = vadd.f32 1.0, %v4980_v28  ;;  %vm4984_vm12 = vcmp.lt.f32.partialorder %v4983_v42, 0.0004427343 }
 0x9df   :  { %v4973_v29 = vmul.f32 %v8427_v30, %v4972_v10 }
 0x9e0   :  { %v4982_v11 = vmul.f32 %v8429_v6, %v4981_v53 }
 0x9e2   :  { %v9361_v37 = vpop.eup %8430 }
 0x9e3   :  { %v4986_v39 = vadd.f32 1.0, %v9361_v37  ;;  %v4989_v46 = vmul.f32 -0.5, %v9361_v37  ;;  %v4992_v33 = vand.u32 2147483647, %v9361_v37 }
 0x9e5   :  { %v8433_v51 = vpop.eup %8432  ;;  %8438 = vlog2.f32 %v4986_v39  ;;  %vm4993_vm15 = vcmp.lt.f32.partialorder %v4992_v33, 0.0004427343 }
 0x9e6   :  { %v4961_v27 = vmul.f32 0.6931472, %v8433_v51 }
 0x9e8   :  { %v4967_v8 = vsel %vm4966_vm1, %v4964_v40, %v4961_v27 }
 0x9e9   :  { %v4995_v49 = vadd.f32 %v4967_v8, %v4931_v18 }
 0x9ea   :  { %v8435_v54 = vpop.eup %8434 }
 0x9eb   :  { %v4999_v60 = vsel %vm4935_vm10, %v4924_v57, %v4995_v49  ;;  %v4970_v17 = vmul.f32 0.6931472, %v8435_v54  ;;  %v8437_v58 = vpop.eup %8436  ;;  %v4990_v57 = vadd.f32 1.0, %v4989_v46 }
 0x9ec   :  { %v5007_v52 = vcombine.high %v4999_v60, %v4999_v60  ;;  %v5014_v23 = vrot.slane %v4999_v60, %v8592_v47  ;;  %v4979_v4 = vmul.f32 0.6931472, %v8437_v58 }
 0x9ed   :  { %v4976_v55 = vsel %vm4975_vm11, %v4973_v29, %v4970_v17  ;;  %v4991_v39 = vmul.f32 %v9361_v37, %v4990_v57 }
 0x9ee   :  { %v5021_v19 = vrot.slane %v5007_v52, %v8592_v47  ;;  %v5022_v35 = vcombine.high %v5014_v23, %v5014_v23  ;;  %v4996_v61 = vadd.f32 %v4976_v55, %v4932_v62  ;;  %v4985_v24 = vsel %vm4984_vm12, %v4982_v11, %v4979_v4 }
 0x9ef   :  { %v5029_v25 = vrot.slane %v5014_v23, %v8592_v47  ;;  %v4997_v59 = vadd.f32 %v4985_v24, %v4933_v3 }
 0x9f0   :  { %v5000_v41 = vsel %vm4936_vm13, %v9352_v63, %v4996_v61  ;;  %v5043_v30 = vrot.slane %v5022_v35, %v8592_v47  ;;  %v5036_v13 = vrot.slane %v5021_v19, %v8592_v47 }
 0x9f1   :  { %v5053_v6 = vrot.slane %v5000_v41, %v8592_v47  ;;  %v5046_v34 = vcombine.high %v5000_v41, %v5000_v41  ;;  %v5001_v51 = vsel %vm4937_vm14, %v9354_v1, %v4997_v59 }
 0x9f2   :  { %v5163_v31 = vcombine.low %v5029_v25, %v5043_v30  ;;  %v7922_v43 = vcombine.high %v5029_v25, %v5043_v30  ;;  %v8439_v28 = vpop.eup %8438  ;;  %v5085_v18 = vcombine.high %v5001_v51, %v5001_v51  ;;  %v5092_v49 = vrot.slane %v5001_v51, %v8592_v47 }
 0x9f3   :  { %v5061_v63 = vcombine.high %v5053_v6, %v5053_v6  ;;  %v5068_v27 = vrot.slane %v5053_v6, %v8592_v47  ;;  %v5060_v40 = vrot.slane %v5046_v34, %v8592_v47  ;;  %v4988_v48 = vmul.f32 0.6931472, %v8439_v28 }
 0x9f4   :  { %v5173_v10 = vrot.slane %v5163_v31, %v8592_v47  ;;  %v5180_v8 = vrot.slane %v7922_v43, %v8592_v47  ;;  %v5099_v54 = vrot.slane %v5085_v18, %v8592_v47  ;;  %v5100_v46 = vcombine.high %v5092_v49, %v5092_v49 }
 0x9f5   :  { %v5082_v53 = vrot.slane %v5061_v63, %v8592_v47  ;;  %v5083_v42 = vcombine.high %v5068_v27, %v5068_v27  ;;  %v5165_v37 = vcombine.low %v5036_v13, %v5068_v27  ;;  %v4994_v1 = vsel %vm4993_vm15, %v4991_v39, %v4988_v48 }
 0x9f6   :  { %v4998_v62 = vadd.f32 %v4994_v1, %v4934_v16  ;;  %v5075_v17 = vrot.slane %v5060_v40, %v8592_v47  ;;  %v5195_v52 = vcombine.low %v5173_v10, %v5180_v8  ;;  %v5107_v23 = vrot.slane %v5092_v49, %v8592_v47 }
 0x9f7   :  { %v5166_v60 = vcombine.low %v5082_v53, %v5083_v42  ;;  %v5084_v29 = vcombine.high %v5082_v53, %v5082_v53  ;;  %v5187_v58 = vrot.slane %v5165_v37, %v8592_v47  ;;  %v5121_v3 = vrot.slane %v5100_v46, %v8592_v47 }
 0x9f8   :  { %v5002_v4 = vsel %vm4938_vm6, %v9358_v50, %v4998_v62  ;;  %v5114_v11 = vrot.slane %v5099_v54, %v8592_v47  ;;  %v5203_v59 = vrot.slane %v5195_v52, %v8592_v47  ;;  %v4326_v54 = vrot.slane %v9240_v7, %v8592_v47 }
 0x9f9   :  { %v5194_v55 = vrot.slane %v5166_v60, %v8592_v47  ;;  %v5212_v19 = vcombine.low %v5084_v29, %v5075_v17  ;;  %v5131_v35 = vrot.slane %v5002_v4, %v8592_v47  ;;  %v5213_v61 = vcombine.low %v5107_v23, %v5121_v3 }
 0x9fa   :  { %v7923_v57 = vcombine.high %v5107_v23, %v5121_v3  ;;  %v5124_v16 = vcombine.high %v5002_v4, %v5002_v4  ;;  %v4334_v46 = vcombine.high %v4326_v54, %v4326_v54  ;;  %v4342_v62 = vrot.slane %v4326_v54, %v8592_v47 }
 0x9fb   :  { %v5196_v24 = vcombine.low %v5187_v58, %v5194_v55  ;;  %v5222_v41 = vrot.slane %v5212_v19, %v8592_v47  ;;  %v5146_v25 = vrot.slane %v5131_v35, %v8592_v47  ;;  %v5229_v30 = vrot.slane %v5213_v61, %v8592_v47 }
 0x9fc   :  { %v5138_v50 = vrot.slane %v5124_v16, %v8592_v47  ;;  %v5139_v13 = vcombine.high %v5131_v35, %v5131_v35  ;;  %v5236_v34 = vrot.slane %v7923_v57, %v8592_v47  ;;  %v4356_v60 = vrot.slane %v4334_v46, %v8592_v47 }
 0x9fd   :  { %v5210_v6 = vrot.slane %v5196_v24, %v8592_v47  ;;  %v5215_v33 = vcombine.low %v5114_v11, %v5146_v25  ;;  %v5244_v31 = vcombine.low %v5222_v41, %v5229_v30  ;;  %v5161_v43 = vcombine.high %v5146_v25, %v5146_v25 }
 0x9fe   :  { %v5160_v51 = vrot.slane %v5139_v13, %v8592_v47  ;;  %v5153_v63 = vrot.slane %v5138_v50, %v8592_v47  ;;  %v5499_v17 = vcombine.low %v4342_v62, %v4356_v60  ;;  %v7928_v29 = vcombine.high %v4342_v62, %v4356_v60 }
 0x9ff   :  { %v5211_v39 = vcombine.low %v5203_v59, %v5210_v6  ;;  %v5243_v28 = vrot.slane %v5215_v33, %v8592_v47  ;;  %v5252_v10 = vrot.slane %v5244_v31, %v8592_v47  ;;  %v5521_v35 = vrot.slane %v9250_v32, %v8592_v47 }
 0xa00   :  { %v5162_v27 = vcombine.high %v5160_v51, %v5160_v51  ;;  %v5261_v40 = vcombine.low %v5160_v51, %v5161_v43  ;;  %v5507_v58 = vrot.slane %v5499_v17, %v8592_v47  ;;  %v5514_v52 = vrot.slane %v7928_v29, %v8592_v47 }
 0xa01   :  { %8200 = vmatmul.mubr.msk.f32.vlgmr.msra.gmra.mxu0 %vm766_vm3, %v5211_v39  ;;  %v5245_v18 = vcombine.low %v5236_v34, %v5243_v28  ;;  %v9435_v61 = vrot.slane %v9260_v21, %v8592_v47  ;;  %v7934_v30 = vcombine.high %v9263_v38, %v9269_v12  ;;  %v5536_v33 = vrot.slane %v5521_v35, %v8592_v47 }
 0xa02   :  { %8202 = vmatprep.mubr.msk.f32.mxu0 %vm8491_vm0, %v8490_v2  ;;  %v5262_v8 = vcombine.low %v5162_v27, %v5153_v63  ;;  %v5269_v49 = vrot.slane %v5261_v40, %v8592_v47  ;;  %v5522_v4 = vcombine.low %v5507_v58, %v5514_v52  ;;  %vm7394_vm6 = vcmask 1040384  }
 0xa03   :  { %v5259_v48 = vrot.slane %v5245_v18, %v8592_v47  ;;  %v5804_v59 = vcombine.low %v9435_v61, %v9276_v22  ;;  %v4414_v28 = vcombine.high %v9435_v61, %v9435_v61 }
 0xa04   :  { %v5276_v53 = vrot.slane %v5262_v8, %v8592_v47  ;;  %v5529_v25 = vrot.slane %v5522_v4, %v8592_v47 }
 0xa05   :  { %v5260_v42 = vcombine.low %v5252_v10, %v5259_v48  ;;  %v5811_v10 = vrot.slane %v7934_v30, %v8592_v47  ;;  %v5818_v8 = vrot.slane %v5804_v59, %v8592_v47 }
 0xa06   :  { %v5277_v37 = vcombine.low %v5269_v49, %v5276_v53  ;;  %v9455_v18 = vcombine.low %v5529_v25, %v5536_v33 }
 0xa07   :  { %8203 = vmatmul.mubr.msk.f32.gmra.mxu0 %vm766_vm3, %v5260_v42 }
 0xa08   :  { %8205 = vmatprep.mubr.msk.f32.mxu0 %vm8491_vm0, %v8490_v2  ;;  %v5284_v1 = vrot.slane %v5277_v37, %v8592_v47 }
 0xa0b   :  { %8206 = vmatmul.mubr.msk.f32.gmra.mxu0 %vm766_vm3, %v5284_v1 }
 0xa0c   :  { %8225 = vmatprep.mubr.msk.f32.mxu0 %vm8491_vm0, %v8490_v2 }
 0xac1   :  { %v5360_v23 = vpop.f32.mrf.mxu0 }
 0xac2   :  { %v5377_v3 = vcombine.high %v5360_v23, %v5360_v23  ;;  %v5384_v55 = vrot.slane %v5360_v23, %v8592_v47 }
 0xac3   :  { %v8201_v11 = vpop.f32.mrf.mxu0 }
 0xac4   :  { %v5391_v19 = vrot.slane %v5377_v3, %v8592_v47  ;;  %v5392_v7 = vcombine.high %v5384_v55, %v5384_v55  ;;  %v5400_v16 = vrot.slane %v5384_v55, %v8592_v47 }
 0xac6   :  { %v5393_v57 = vcombine.high %v5391_v19, %v5391_v19  ;;  %v5407_v24 = vrot.slane %v5391_v19, %v8592_v47  ;;  %v5414_v41 = vrot.slane %v5392_v7, %v8592_v47  ;;  %v5826_v19 = vcombine.low %v5811_v10, %v5818_v8  ;;  %v7917_v8 = vld [vmem:[%s9858_s2 + $0x28] sm:$0x1f] }
 0xac7   :  { %v5365_v13 = vpop.f32.mrf.mxu0 }
 0xac8   :  { %v5421_v32 = vrot.slane %v5393_v57, %v8592_v47  ;;  %v5423_v6 = vcombine.high %v5407_v24, %v5407_v24  ;;  %v5538_v21 = vcombine.low %v5400_v16, %v5414_v41  ;;  %v7929_v50 = vcombine.high %v5400_v16, %v5414_v41 }
 0xac9   :  { %v5560_v34 = vrot.slane %v5407_v24, %v8592_v47  ;;  %v5426_v31 = vcombine.high %v5365_v13, %v5365_v13  ;;  %v5433_v43 = vrot.slane %v5365_v13, %v8592_v47  ;;  %v8204_v22 = vpop.f32.mrf.mxu0 }
 0xaca   :  { %v5546_v39 = vrot.slane %v5538_v21, %v8592_v47  ;;  %v5553_v38 = vrot.slane %v7929_v50, %v8592_v47  ;;  %v5690_v12 = vcombine.low %v5421_v32, %v5423_v6  ;;  %v5425_v51 = vcombine.high %v5421_v32, %v5421_v32 }
 0xacb   :  { %v5440_v63 = vrot.slane %v5426_v31, %v8592_v47  ;;  %v5441_v27 = vcombine.high %v5433_v43, %v5433_v43  ;;  %v5449_v40 = vrot.slane %v5433_v43, %v8592_v47  ;;  %v5370_v49 = vpop.f32.mrf.mxu0  ;;  %v5575_v46 = vrot.slane %v5560_v34, %v8592_v47 }
 0xacc   :  { %v5561_v48 = vcombine.low %v5546_v39, %v5553_v38  ;;  %v5698_v60 = vrot.slane %v5690_v12, %v8592_v47  ;;  %v5481_v62 = vrot.slane %v5370_v49, %v8592_v47  ;;  %v5825_v32 = vrot.slane %v4414_v28, %v8592_v47 }
 0xacd   :  { %v5442_v53 = vcombine.high %v5440_v63, %v5440_v63  ;;  %v5456_v42 = vrot.slane %v5440_v63, %v8592_v47  ;;  %v5463_v37 = vrot.slane %v5441_v27, %v8592_v47  ;;  %v5691_v1 = vcombine.low %v5425_v51, %v5449_v40  ;;  %v8207_v17 = vpop.f32.mrf.mxu0 }
 0xace   :  { %v5568_v54 = vrot.slane %v5561_v48, %v8592_v47  ;;  %v5482_v4 = vcombine.high %v5481_v62, %v5481_v62  ;;  %v5489_v11 = vrot.slane %v5481_v62, %v8592_v47  ;;  %v5833_v34 = vrot.slane %v5826_v19, %v8592_v47 }
 0xacf   :  { %v5470_v29 = vrot.slane %v5442_v53, %v8592_v47  ;;  %v5472_v58 = vcombine.high %v5456_v42, %v5456_v42  ;;  %v5705_v52 = vrot.slane %v5691_v1, %v8592_v47  ;;  %v5712_v23 = vrot.slane %v5463_v37, %v8592_v47 }
 0xad0   :  { %v5576_v3 = vcombine.low %v5568_v54, %v5575_v46  ;;  %v7935_v55 = vcombine.high %v5449_v40, %v5463_v37  ;;  %v5496_v24 = vrot.slane %v5482_v4, %v8592_v47  ;;  %v5497_v41 = vcombine.high %v5489_v11, %v5489_v11 }
 0xad1   :  { %v5713_v7 = vcombine.low %v5698_v60, %v5705_v52  ;;  %v5727_v35 = vrot.slane %v5712_v23, %v8592_v47  ;;  %v5843_v61 = vcombine.low %v5456_v42, %v5470_v29  ;;  %v5864_v57 = vrot.slane %v5472_v58, %v8592_v47 }
 0xad2   :  { %v5474_v16 = vcombine.high %v5470_v29, %v5470_v29  ;;  %8209 = vmatpush3.msk.msra.mxu1 %vm773_vm2, %v5576_v3  ;;  %v5850_v30 = vrot.slane %v7935_v55, %v8592_v47  ;;  %v5498_v6 = vcombine.high %v5496_v24, %v5496_v24  ;;  %v5995_v50 = vcombine.low %v5496_v24, %v5497_v41 }
 0xad3   :  { %v5720_v25 = vrot.slane %v5713_v7, %v8592_v47  ;;  %v5857_v59 = vrot.slane %v5843_v61, %v8592_v47  ;;  %8211 = vmatmul.mubr.msk.f32.vlgmr.msra.gmra.mxu1 %vm766_vm3, %v9455_v18  ;;  %8213 = vmatprep.subr.mxu1 %v8490_v2  ;;  %v5879_v12 = vrot.slane %v5864_v57, %v8592_v47 }
 0xad4   :  { %v5994_v21 = vcombine.low %v5474_v16, %v5489_v11  ;;  %8215 = vmatprep.mubr.msk.f32.mxu1 %vm8491_vm0, %v8490_v2  ;;  %v6009_v43 = vrot.slane %v5995_v50, %v8592_v47  ;;  %v6016_v39 = vrot.slane %v5498_v6, %v8592_v47  ;;  %v5840_v51 = vrot.slane %v5825_v32, %v8592_v47 }
 0xad5   :  { %v5728_v13 = vcombine.low %v5720_v25, %v5727_v35  ;;  %v5865_v33 = vcombine.low %v5850_v30, %v5857_v59 }
 0xad6   :  { %v6002_v31 = vrot.slane %v5994_v21, %v8592_v47  ;;  %v6031_v27 = vrot.slane %v6016_v39, %v8592_v47  ;;  %v9497_v40 = vcombine.low %v5833_v34, %v5840_v51 }
 0xad7   :  { %v5872_v38 = vrot.slane %v5865_v33, %v8592_v47  ;;  %8214 = vmatpush3.msk.msra.mxu1 %vm773_vm2, %v5728_v13 }
 0xad8   :  { %v6017_v22 = vcombine.low %v6002_v31, %v6009_v43  ;;  %8216 = vmatmul.mubr.msk.f32.vlgmr.msra.gmra.mxu1 %vm766_vm3, %v9289_v5  ;;  %8218 = vmatprep.subr.mxu1 %v8490_v2 }
 0xad9   :  { %v5880_v28 = vcombine.low %v5872_v38, %v5879_v12  ;;  %8220 = vmatprep.mubr.msk.f32.mxu1 %vm8491_vm0, %v8490_v2 }
 0xada   :  { %v6024_v63 = vrot.slane %v6017_v22, %v8592_v47 }
 0xadb   :  { %8219 = vmatpush3.msk.msra.mxu1 %vm773_vm2, %v5880_v28 }
 0xadc   :  { %v6032_v10 = vcombine.low %v6024_v63, %v6031_v27  ;;  %8221 = vmatmul.mubr.msk.f32.vlgmr.msra.gmra.mxu1 %vm766_vm3, %v9497_v40  ;;  %8228 = vmatprep.subr.mxu1 %v8490_v2 }
 0xadd   :  { %8230 = vmatprep.mubr.msk.f32.mxu1 %vm8491_vm0, %v8490_v2  ;;  %8229 = vmatpush3.msk.msra.mxu1 %vm773_vm2, %v7917_v8 }
 0xade   :  { %8224 = vmatpush3.msk.msra.mxu0 %vm773_vm2, %v6032_v10  ;;  %8254 = vmatprep.subr.mxu1 %v8490_v2 }
 0xadf   :  { %8226 = vmatmul.mubr.msk.f32.vlgmr.msra.gmra.mxu0 %vm766_vm3, %v9295_v44  ;;  %8239 = vmatprep.subr.mxu0 %v8490_v2 }
 0xae0   :  { %8241 = vmatprep.mubr.msk.f32.mxu0 %vm8491_vm0, %v8490_v2 }
 0xb93   :  { %v5647_v48 = vpop.f32.mrf.mxu1 }
 0xb94   :  { %v6107_v49 = vmul.f32 0.85, %v5647_v48 }
 0xb95   :  { %v8212_v53 = vpop.f32.mrf.mxu1 }
 0xb96   :  { %v6111_v42 = vadd.f32 %v6107_v49, %v8728_v36 }
 0xb98   :  { %v6115_v37 = vmax.f32 %v6111_v42, 0.0  ;;  %v5799_v1 = vpop.f32.mrf.mxu1 }
 0xb99   :  { %v6108_v54 = vmul.f32 0.85, %v5799_v1 }
 0xb9a   :  { %v6119_v46 = vsel %vm1210_vm5, %v6115_v37, 0.0  ;;  %v8217_v60 = vpop.f32.mrf.mxu1 }
 0xb9b   :  { %v6120_v62 = vrot.slane %v6119_v46, 4  ;;  %v6112_v17 = vadd.f32 %v6108_v54, %v8728_v36 }
 0xb9c   :  { %v5951_v29 = vpop.f32.mrf.mxu1 }
 0xb9d   :  { %v6121_v58 = vadd.f32 %v6120_v62, %v6119_v46  ;;  %v6116_v52 = vmax.f32 %v6112_v17, 0.0  ;;  %v6109_v23 = vmul.f32 0.85, %v5951_v29 }
 0xb9e   :  { %v8222_v3 = vpop.f32.mrf.mxu1 }
 0xb9f   :  { %v6122_v55 = vrot.slane %v6121_v58, 2  ;;  %v6126_v4 = vsel %vm1210_vm5, %v6116_v52, 0.0  ;;  %v6113_v11 = vadd.f32 %v6109_v23, %v8728_v36  ;;  %v6103_v19 = vpop.f32.mrf.mxu0 }
 0xba0   :  { %v6127_v7 = vrot.slane %v6126_v4, 4  ;;  %v6110_v35 = vmul.f32 0.85, %v6103_v19 }
 0xba1   :  { %v6123_v61 = vadd.f32 %v6122_v55, %v6121_v58  ;;  %v6117_v57 = vmax.f32 %v6113_v11, 0.0  ;;  %v8227_v16 = vpop.f32.mrf.mxu0 }
 0xba2   :  { %v6128_v24 = vadd.f32 %v6127_v7, %v6126_v4  ;;  %v6114_v41 = vadd.f32 %v6110_v35, %v8728_v36 }
 0xba3   :  { %v6124_v25 = vrot.slane %v6123_v61, 1  ;;  %v6133_v30 = vsel %vm1210_vm5, %v6117_v57, 0.0 }
 0xba4   :  { %v6129_v59 = vrot.slane %v6128_v24, 2  ;;  %v6134_v32 = vrot.slane %v6133_v30, 4  ;;  %v6118_v6 = vmax.f32 %v6114_v41, 0.0 }
 0xba5   :  { %v6125_v21 = vadd.f32 %v6124_v25, %v6123_v61 }
 0xba6   :  { %v6130_v50 = vadd.f32 %v6129_v59, %v6128_v24  ;;  %v6135_v13 = vadd.f32 %v6134_v32, %v6133_v30  ;;  %v6140_v33 = vsel %vm1210_vm5, %v6118_v6, 0.0 }
 0xba7   :  { %v6147_v34 = vmul.f32 0.2, %v6125_v21  ;;  %v6141_v31 = vrot.slane %v6140_v33, 4 }
 0xba8   :  { %v6131_v43 = vrot.slane %v6130_v50, 1  ;;  %v6136_v39 = vrot.slane %v6135_v13, 2 }
 0xba9   :  { %v6151_v38 = vadd.f32 1e-06, %v6147_v34  ;;  %v6142_v12 = vadd.f32 %v6141_v31, %v6140_v33 }
 0xbaa   :  { %v6132_v51 = vadd.f32 %v6131_v43, %v6130_v50  ;;  %v6137_v22 = vadd.f32 %v6136_v39, %v6135_v13 }
 0xbab   :  { %8440 = vrcp.f32 %v6151_v38  ;;  %v6143_v28 = vrot.slane %v6142_v12, 2 }
 0xbac   :  { %v6148_v63 = vmul.f32 0.2, %v6132_v51  ;;  %v6138_v27 = vrot.slane %v6137_v22, 1 }
 0xbad   :  { %v6144_v10 = vadd.f32 %v6143_v28, %v6142_v12 }
 0xbae   :  { %v6152_v8 = vadd.f32 1e-06, %v6148_v63  ;;  %v6139_v48 = vadd.f32 %v6138_v27, %v6137_v22 }
 0xbaf   :  { %v6145_v49 = vrot.slane %v6144_v10, 1 }
 0xbb0   :  { %8442 = vrcp.f32 %v6152_v8  ;;  %v6149_v53 = vmul.f32 0.2, %v6139_v48 }
 0xbb1   :  { %v6146_v42 = vadd.f32 %v6145_v49, %v6144_v10 }
 0xbb2   :  { %v6153_v1 = vadd.f32 1e-06, %v6149_v53 }
 0xbb3   :  { %v6150_v54 = vmul.f32 0.2, %v6146_v42 }
 0xbb4   :  { %8444 = vrcp.f32 %v6153_v1 }
 0xbb5   :  { %v6154_v46 = vadd.f32 1e-06, %v6150_v54 }
 0xbb7   :  { %8446 = vrcp.f32 %v6154_v46 }
 0xbb8   :  { %v8441_v60 = vpop.eup %8440 }
 0xbb9   :  { %v6156_v62 = vmul.f32 %v8441_v60, %v6115_v37 }
 0xbbb   :  { %v6175_v17 = vand.u32 2147483647, %v6156_v62  ;;  %v6163_v22 = vmax.f32 %v6156_v62, 0.0  ;;  %vm6167_vm8 = vcmp.ne.f32.partialorder %v6156_v62, %v6156_v62 }
 0xbbd   :  { %v8443_v29 = vpop.eup %8442  ;;  %v6179_v58 = vsub.f32 0.0, %v6175_v17 }
 0xbbe   :  { %v9524_v23 = vmul.f32 %v8443_v29, %v6116_v52 }
 0xbbf   :  { %v6183_v3 = vmul.f32 1.442695, %v6179_v58 }
 0xbc0   :  { %v6176_v55 = vand.u32 2147483647, %v9524_v23  ;;  %v6164_v49 = vmax.f32 %v9524_v23, 0.0  ;;  %vm6168_vm1 = vcmp.ne.f32.partialorder %v9524_v23, %v9524_v23 }
 0xbc1   :  { %v8445_v4 = vpop.eup %8444  ;;  %8448 = vpow2.f32 %v6183_v3 }
 0xbc2   :  { %v6180_v11 = vsub.f32 0.0, %v6176_v55  ;;  %v9527_v19 = vmul.f32 %v8445_v4, %v6117_v57 }
 0xbc4   :  { %v8447_v7 = vpop.eup %8446  ;;  %v6185_v35 = vmul.f32 1.442695, %v6180_v11  ;;  %v6177_v61 = vand.u32 2147483647, %v9527_v19  ;;  %v6165_v3 = vmax.f32 %v9527_v19, 0.0  ;;  %vm6169_vm10 = vcmp.ne.f32.partialorder %v9527_v19, %v9527_v19 }
 0xbc5   :  { %v9530_v16 = vmul.f32 %v8447_v7, %v6118_v6 }
 0xbc6   :  { %8450 = vpow2.f32 %v6185_v35  ;;  %v6181_v37 = vsub.f32 0.0, %v6177_v61 }
 0xbc7   :  { %v6178_v24 = vand.u32 2147483647, %v9530_v16  ;;  %vm6170_vm13 = vcmp.ne.f32.partialorder %v9530_v16, %v9530_v16 }
 0xbc8   :  { %v6187_v52 = vmul.f32 1.442695, %v6181_v37 }
 0xbc9   :  { %v6182_v41 = vsub.f32 0.0, %v6178_v24 }
 0xbca   :  { %8452 = vpow2.f32 %v6187_v52 }
 0xbcb   :  { %v6189_v25 = vmul.f32 1.442695, %v6182_v41 }
 0xbcd   :  { %8454 = vpow2.f32 %v6189_v25 }
 0xbce   :  { %v8449_v30 = vpop.eup %8448 }
 0xbcf   :  { %v6191_v59 = vadd.f32 1.0, %v8449_v30  ;;  %v6194_v50 = vmul.f32 -0.5, %v8449_v30  ;;  %v6197_v43 = vand.u32 2147483647, %v8449_v30 }
 0xbd1   :  { %8456 = vlog2.f32 %v6191_v59  ;;  %v6195_v33 = vadd.f32 1.0, %v6194_v50  ;;  %vm6198_vm7 = vcmp.lt.f32.partialorder %v6197_v43, 0.0004427343 }
 0xbd3   :  { %v8451_v57 = vpop.eup %8450  ;;  %v6196_v12 = vmul.f32 %v8449_v30, %v6195_v33 }
 0xbd4   :  { %v6200_v32 = vadd.f32 1.0, %v8451_v57  ;;  %v6203_v34 = vmul.f32 -0.5, %v8451_v57  ;;  %v6206_v27 = vand.u32 2147483647, %v8451_v57 }
 0xbd6   :  { %8458 = vlog2.f32 %v6200_v32  ;;  %v6204_v51 = vadd.f32 1.0, %v6203_v34  ;;  %vm6207_vm9 = vcmp.lt.f32.partialorder %v6206_v27, 0.0004427343 }
 0xbd7   :  { %v8453_v21 = vpop.eup %8452 }
 0xbd8   :  { %v6209_v13 = vadd.f32 1.0, %v8453_v21  ;;  %v6212_v28 = vmul.f32 -0.5, %v8453_v21  ;;  %v6205_v53 = vmul.f32 %v8451_v57, %v6204_v51  ;;  %v6215_v46 = vand.u32 2147483647, %v8453_v21 }
 0xbda   :  { %v8455_v6 = vpop.eup %8454  ;;  %8460 = vlog2.f32 %v6209_v13  ;;  %v6213_v54 = vadd.f32 1.0, %v6212_v28  ;;  %vm6216_vm11 = vcmp.lt.f32.partialorder %v6215_v46, 0.0004427343 }
 0xbdb   :  { %v6218_v31 = vadd.f32 1.0, %v8455_v6  ;;  %v6221_v8 = vmul.f32 -0.5, %v8455_v6  ;;  %v6224_v29 = vand.u32 2147483647, %v8455_v6 }
 0xbdc   :  { %v6214_v37 = vmul.f32 %v8453_v21, %v6213_v54 }
 0xbdd   :  { %8462 = vlog2.f32 %v6218_v31  ;;  %v6222_v55 = vadd.f32 1.0, %v6221_v8  ;;  %vm9545_vm12 = vcmp.lt.f32.partialorder %v6224_v29, 0.0004427343 }
 0xbde   :  { %v8457_v39 = vpop.eup %8456 }
 0xbdf   :  { %v6193_v38 = vmul.f32 0.6931472, %v8457_v39  ;;  %v6223_v50 = vmul.f32 %v8455_v6, %v6222_v55 }
 0xbe1   :  { %v6199_v63 = vsel %vm6198_vm7, %v6196_v12, %v6193_v38 }
 0xbe2   :  { %v6227_v10 = vadd.f32 %v6199_v63, %v6163_v22 }
 0xbe3   :  { %v8459_v48 = vpop.eup %8458 }
 0xbe4   :  { %v6231_v42 = vsel %vm6167_vm8, %v6156_v62, %v6227_v10  ;;  %v6202_v1 = vmul.f32 0.6931472, %v8459_v48  ;;  %v6166_v62 = vmax.f32 %v9530_v16, 0.0 }
 0xbe5   :  { %v6239_v60 = vcombine.high %v6231_v42, %v6231_v42  ;;  %v6246_v17 = vrot.slane %v6231_v42, %v8592_v47 }
 0xbe6   :  { %v6208_v58 = vsel %vm6207_vm9, %v6205_v53, %v6202_v1 }
 0xbe7   :  { %v8461_v4 = vpop.eup %8460  ;;  %v6254_v11 = vcombine.high %v6246_v17, %v6246_v17  ;;  %v6228_v7 = vadd.f32 %v6208_v58, %v6164_v49  ;;  %v6253_v35 = vrot.slane %v6239_v60, %v8592_v47  ;;  %v6261_v24 = vrot.slane %v6246_v17, %v8592_v47 }
 0xbe8   :  { %v6211_v61 = vmul.f32 0.6931472, %v8461_v4 }
 0xbe9   :  { %v6275_v52 = vrot.slane %v6254_v11, %v8592_v47  ;;  %v6232_v41 = vsel %vm6168_vm1, %v9524_v23, %v6228_v7  ;;  %v6268_v31 = vrot.slane %v6253_v35, %v8592_v47 }
 0xbea   :  { %v8463_v30 = vpop.eup %8462  ;;  %v6278_v59 = vcombine.high %v6232_v41, %v6232_v41  ;;  %v6285_v57 = vrot.slane %v6232_v41, %v8592_v47  ;;  %v6217_v32 = vsel %vm6216_vm11, %v6214_v37, %v6211_v61  ;;  %vm3703_vm11 = vcmask 80896  }
 0xbeb   :  { %v6395_v13 = vcombine.low %v6261_v24, %v6275_v52  ;;  %v7940_v33 = vcombine.high %v6261_v24, %v6275_v52  ;;  %v6229_v21 = vadd.f32 %v6217_v32, %v6165_v3  ;;  %v6220_v34 = vmul.f32 0.6931472, %v8463_v30 }
 0xbec   :  { %v6292_v43 = vrot.slane %v6278_v59, %v8592_v47  ;;  %v6293_v39 = vcombine.high %v6285_v57, %v6285_v57  ;;  %v6300_v23 = vrot.slane %v6285_v57, %v8592_v47 }
 0xbed   :  { %v6233_v38 = vsel %vm6169_vm10, %v9527_v19, %v6229_v21  ;;  %v6226_v12 = vsel %vm9545_vm12, %v6223_v50, %v6220_v34  ;;  %v6405_v6 = vrot.slane %v6395_v13, %v8592_v47  ;;  %v6412_v51 = vrot.slane %v7940_v33, %v8592_v47 }
 0xbee   :  { %v6314_v22 = vrot.slane %v6293_v39, %v8592_v47  ;;  %v6315_v28 = vcombine.high %v6300_v23, %v6300_v23  ;;  %v6397_v63 = vcombine.low %v6268_v31, %v6300_v23  ;;  %v6317_v27 = vcombine.high %v6233_v38, %v6233_v38 }
 0xbef   :  { %v6324_v10 = vrot.slane %v6233_v38, %v8592_v47  ;;  %v6230_v8 = vadd.f32 %v6226_v12, %v6166_v62  ;;  %v6427_v49 = vcombine.low %v6405_v6, %v6412_v51  ;;  %v6307_v46 = vrot.slane %v6292_v43, %v8592_v47 }
 0xbf0   :  { %v6331_v19 = vrot.slane %v6317_v27, %v8592_v47  ;;  %v6398_v48 = vcombine.low %v6314_v22, %v6315_v28  ;;  %v6316_v53 = vcombine.high %v6314_v22, %v6314_v22  ;;  %v6419_v54 = vrot.slane %v6397_v63, %v8592_v47 }
 0xbf1   :  { %v6332_v42 = vcombine.high %v6324_v10, %v6324_v10  ;;  %v6234_v1 = vsel %vm6170_vm13, %v9530_v16, %v6230_v8  ;;  %v6339_v3 = vrot.slane %v6324_v10, %v8592_v47  ;;  %v6435_v37 = vrot.slane %v6427_v49, %v8592_v47 }
 0xbf2   :  { %v6356_v60 = vcombine.high %v6234_v1, %v6234_v1  ;;  %v6363_v17 = vrot.slane %v6234_v1, %v8592_v47  ;;  %v6426_v29 = vrot.slane %v6398_v48, %v8592_v47  ;;  %v6346_v58 = vrot.slane %v6331_v19, %v8592_v47 }
 0xbf3   :  { %v6353_v55 = vrot.slane %v6332_v42, %v8592_v47  ;;  %v6444_v4 = vcombine.low %v6316_v53, %v6307_v46  ;;  %vm7546_vm10 = vcmask 27648   ;;  %vm3707_vm12 = vcmask 162816  }
 0xbf4   :  { %v6370_v11 = vrot.slane %v6356_v60, %v8592_v47  ;;  %v6371_v7 = vcombine.high %v6363_v17, %v6363_v17  ;;  %v6378_v16 = vrot.slane %v6363_v17, %v8592_v47  ;;  %v6428_v62 = vcombine.low %v6419_v54, %v6426_v29 }
 0xbf5   :  { %v6445_v35 = vcombine.low %v6339_v3, %v6353_v55  ;;  %v7941_v61 = vcombine.high %v6339_v3, %v6353_v55  ;;  %v6454_v25 = vrot.slane %v6444_v4, %v8592_v47  ;;  %vm3705_vm13 = vcmask 121856  }
 0xbf6   :  { %v6442_v24 = vrot.slane %v6428_v62, %v8592_v47  ;;  %v6447_v52 = vcombine.low %v6346_v58, %v6378_v16  ;;  %v6392_v41 = vrot.slane %v6371_v7, %v8592_v47  ;;  %v6393_v57 = vcombine.high %v6378_v16, %v6378_v16 }
 0xbf7   :  { %v6461_v30 = vrot.slane %v6445_v35, %v8592_v47  ;;  %v6468_v59 = vrot.slane %v7941_v61, %v8592_v47  ;;  %v6385_v13 = vrot.slane %v6370_v11, %v8592_v47 }
 0xbf8   :  { %v6443_v32 = vcombine.low %v6435_v37, %v6442_v24  ;;  %v6475_v50 = vrot.slane %v6447_v52, %v8592_v47  ;;  %v6394_v33 = vcombine.high %v6392_v41, %v6392_v41  ;;  %v6493_v34 = vcombine.low %v6392_v41, %v6393_v57 }
 0xbf9   :  { %v6476_v21 = vcombine.low %v6454_v25, %v6461_v30 }
 0xbfa   :  { %8231 = vmatmul.mubr.msk.f32.vlgmr.msra.gmra.mxu1 %vm766_vm3, %v6443_v32  ;;  %v6477_v31 = vcombine.low %v6468_v59, %v6475_v50  ;;  %v6494_v43 = vcombine.low %v6394_v33, %v6385_v13  ;;  %v6501_v38 = vrot.slane %v6493_v34, %v8592_v47 }
 0xbfb   :  { %8233 = vmatprep.mubr.msk.f32.mxu1 %vm8491_vm0, %v8490_v2  ;;  %v6484_v39 = vrot.slane %v6476_v21, %v8592_v47 }
 0xbfc   :  { %v6491_v23 = vrot.slane %v6477_v31, %v8592_v47  ;;  %v6508_v12 = vrot.slane %v6494_v43, %v8592_v47 }
 0xbfe   :  { %v6492_v6 = vcombine.low %v6484_v39, %v6491_v23  ;;  %v6509_v51 = vcombine.low %v6501_v38, %v6508_v12 }
 0xc00   :  { %8234 = vmatmul.mubr.msk.f32.gmra.mxu1 %vm766_vm3, %v6492_v6  ;;  %v6516_v22 = vrot.slane %v6509_v51, %v8592_v47 }
 0xc01   :  { %8236 = vmatprep.mubr.msk.f32.mxu1 %vm8491_vm0, %v8490_v2 }
 0xc04   :  { %8237 = vmatmul.mubr.msk.f32.gmra.mxu1 %vm766_vm3, %v6516_v22 }
 0xc05   :  { %8256 = vmatprep.mubr.msk.f32.mxu1 %vm8491_vm0, %v8490_v2 }
 0xcba   :  { %v6592_v28 = vpop.f32.mrf.mxu1 }
 0xcbb   :  { %v6609_v63 = vcombine.high %v6592_v28, %v6592_v28  ;;  %v6616_v27 = vrot.slane %v6592_v28, %v8592_v47 }
 0xcbc   :  { %v8232_v10 = vpop.f32.mrf.mxu1 }
 0xcbd   :  { %v6623_v8 = vrot.slane %v6609_v63, %v8592_v47  ;;  %v6624_v19 = vcombine.high %v6616_v27, %v6616_v27  ;;  %v6632_v49 = vrot.slane %v6616_v27, %v8592_v47 }
 0xcbf   :  { %v6625_v48 = vcombine.high %v6623_v8, %v6623_v8  ;;  %v6639_v53 = vrot.slane %v6623_v8, %v8592_v47  ;;  %v6646_v42 = vrot.slane %v6624_v19, %v8592_v47 }
 0xcc0   :  { %v6597_v1 = vpop.f32.mrf.mxu1 }
 0xcc1   :  { %v6653_v54 = vrot.slane %v6625_v48, %v8592_v47  ;;  %v6655_v46 = vcombine.high %v6639_v53, %v6639_v53  ;;  %v6731_v60 = vcombine.low %v6632_v49, %v6646_v42  ;;  %v7946_v17 = vcombine.high %v6632_v49, %v6646_v42 }
 0xcc2   :  { %v6753_v29 = vrot.slane %v6639_v53, %v8592_v47  ;;  %v6658_v58 = vcombine.high %v6597_v1, %v6597_v1  ;;  %v6665_v3 = vrot.slane %v6597_v1, %v8592_v47  ;;  %v8235_v55 = vpop.f32.mrf.mxu1 }
 0xcc3   :  { %v6739_v4 = vrot.slane %v6731_v60, %v8592_v47  ;;  %v6746_v11 = vrot.slane %v7946_v17, %v8592_v47  ;;  %v6842_v7 = vcombine.low %v6653_v54, %v6655_v46  ;;  %v6657_v16 = vcombine.high %v6653_v54, %v6653_v54 }
 0xcc4   :  { %v6672_v62 = vrot.slane %v6658_v58, %v8592_v47  ;;  %v6673_v35 = vcombine.high %v6665_v3, %v6665_v3  ;;  %v6681_v61 = vrot.slane %v6665_v3, %v8592_v47  ;;  %v6602_v37 = vpop.f32.mrf.mxu1  ;;  %v6768_v52 = vrot.slane %v6753_v29, %v8592_v47 }
 0xcc5   :  { %v6754_v24 = vcombine.low %v6739_v4, %v6746_v11  ;;  %v6713_v41 = vrot.slane %v6602_v37, %v8592_v47  ;;  %v6850_v13 = vrot.slane %v6842_v7, %v8592_v47 }
 0xcc6   :  { %v6674_v25 = vcombine.high %v6672_v62, %v6672_v62  ;;  %v6688_v30 = vrot.slane %v6672_v62, %v8592_v47  ;;  %v6695_v59 = vrot.slane %v6673_v35, %v8592_v47  ;;  %v6843_v57 = vcombine.low %v6657_v16, %v6681_v61  ;;  %v8238_v32 = vpop.f32.mrf.mxu1 }
 0xcc7   :  { %v6761_v50 = vrot.slane %v6754_v24, %v8592_v47  ;;  %v6714_v33 = vcombine.high %v6713_v41, %v6713_v41  ;;  %v6721_v21 = vrot.slane %v6713_v41, %v8592_v47 }
 0xcc8   :  { %v6702_v34 = vrot.slane %v6674_v25, %v8592_v47  ;;  %v6704_v31 = vcombine.high %v6688_v30, %v6688_v30  ;;  %v6857_v43 = vrot.slane %v6843_v57, %v8592_v47  ;;  %v6864_v39 = vrot.slane %v6695_v59, %v8592_v47 }
 0xcc9   :  { %v6769_v23 = vcombine.low %v6761_v50, %v6768_v52  ;;  %v7951_v38 = vcombine.high %v6681_v61, %v6695_v59  ;;  %v6728_v12 = vrot.slane %v6714_v33, %v8592_v47  ;;  %v6729_v6 = vcombine.high %v6721_v21, %v6721_v21 }
 0xcca   :  { %v6865_v51 = vcombine.low %v6850_v13, %v6857_v43  ;;  %v6879_v22 = vrot.slane %v6864_v39, %v8592_v47  ;;  %v6954_v28 = vcombine.low %v6688_v30, %v6702_v34  ;;  %v6975_v63 = vrot.slane %v6704_v31, %v8592_v47 }
 0xccb   :  { %v6706_v27 = vcombine.high %v6702_v34, %v6702_v34  ;;  %v6730_v10 = vcombine.high %v6728_v12, %v6728_v12  ;;  %v7065_v8 = vcombine.low %v6728_v12, %v6729_v6  ;;  %8240 = vmatpush3.msk.msra.mxu0 %vm773_vm2, %v6769_v23  ;;  %v6961_v48 = vrot.slane %v7951_v38, %v8592_v47 }
 0xccc   :  { %v6872_v19 = vrot.slane %v6865_v51, %v8592_v47  ;;  %v6968_v49 = vrot.slane %v6954_v28, %v8592_v47  ;;  %8242 = vmatmul.mubr.msk.f32.vlgmr.msra.gmra.mxu0 %vm766_vm3, %v9455_v18  ;;  %8244 = vmatprep.subr.mxu0 %v8490_v2  ;;  %v6990_v29 = vrot.slane %v6975_v63, %v8592_v47 }
 0xccd   :  { %v7064_v53 = vcombine.low %v6706_v27, %v6721_v21  ;;  %v7079_v42 = vrot.slane %v7065_v8, %v8592_v47  ;;  %8246 = vmatprep.mubr.msk.f32.mxu0 %vm8491_vm0, %v8490_v2  ;;  %v7086_v60 = vrot.slane %v6730_v10, %v8592_v47 }
 0xcce   :  { %v6880_v1 = vcombine.low %v6872_v19, %v6879_v22  ;;  %v6976_v54 = vcombine.low %v6961_v48, %v6968_v49 }
 0xccf   :  { %v7072_v46 = vrot.slane %v7064_v53, %v8592_v47  ;;  %v7101_v55 = vrot.slane %v7086_v60, %v8592_v47 }
 0xcd0   :  { %v6983_v17 = vrot.slane %v6976_v54, %v8592_v47  ;;  %8245 = vmatpush3.msk.msra.mxu0 %vm773_vm2, %v6880_v1 }
 0xcd1   :  { %v7087_v18 = vcombine.low %v7072_v46, %v7079_v42  ;;  %8247 = vmatmul.mubr.msk.f32.vlgmr.msra.gmra.mxu0 %vm766_vm3, %v9289_v5  ;;  %8249 = vmatprep.subr.mxu0 %v8490_v2 }
 0xcd2   :  { %v6991_v58 = vcombine.low %v6983_v17, %v6990_v29  ;;  %8251 = vmatprep.mubr.msk.f32.mxu0 %vm8491_vm0, %v8490_v2 }
 0xcd3   :  { %v7094_v3 = vrot.slane %v7087_v18, %v8592_v47 }
 0xcd4   :  { %8250 = vmatpush3.msk.msra.mxu0 %vm773_vm2, %v6991_v58 }
 0xcd5   :  { %v7102_v4 = vcombine.low %v7094_v3, %v7101_v55  ;;  %8252 = vmatmul.mubr.msk.f32.vlgmr.msra.gmra.mxu0 %vm766_vm3, %v9497_v40  ;;  %8259 = vmatprep.subr.mxu0 %v8490_v2 }
 0xcd6   :  { %8267 = vmatprep.mubr.msk.f32.mxu0 %vm8491_vm0, %v8490_v2 }
 0xcd7   :  { %8255 = vmatpush3.msk.msra.mxu1 %vm773_vm2, %v7102_v4 }
 0xcd8   :  { %8257 = vmatmul.mubr.msk.f32.vlgmr.msra.gmra.mxu1 %vm766_vm3, %v9295_v44  ;;  %8270 = vmatprep.subr.mxu1 %v8490_v2 }
 0xcd9   :  { %8278 = vmatprep.mubr.msk.f32.mxu1 %vm8491_vm0, %v8490_v2 }
 0xd8c   :  { %v6838_v47 = vpop.f32.mrf.mxu0 }
 0xd8d   :  { %v7175_v5 = vmul.f32 0.85, %v6838_v47 }
 0xd8e   :  { %v8243_v11 = vpop.f32.mrf.mxu0 }
 0xd8f   :  { %v7179_v40 = vadd.f32 %v7175_v5, %v8728_v36 }
 0xd91   :  { %v7183_v7 = vmax.f32 %v7179_v40, 0.0  ;;  %v6949_v16 = vpop.f32.mrf.mxu0 }
 0xd92   :  { %v7176_v62 = vmul.f32 0.85, %v6949_v16 }
 0xd93   :  { %v7187_v35 = vsel %vm1210_vm5, %v7183_v7, 0.0  ;;  %v8248_v61 = vpop.f32.mrf.mxu0 }
 0xd94   :  { %v7188_v37 = vrot.slane %v7187_v35, 4  ;;  %v7180_v24 = vadd.f32 %v7176_v62, %v8728_v36 }
 0xd95   :  { %v7060_v44 = vpop.f32.mrf.mxu0 }
 0xd96   :  { %v7189_v52 = vadd.f32 %v7188_v37, %v7187_v35  ;;  %v7184_v41 = vmax.f32 %v7180_v24, 0.0  ;;  %v7177_v25 = vmul.f32 0.85, %v7060_v44 }
 0xd97   :  { %v8253_v30 = vpop.f32.mrf.mxu0 }
 0xd98   :  { %v7190_v59 = vrot.slane %v7189_v52, 2  ;;  %v7194_v57 = vsel %vm1210_vm5, %v7184_v41, 0.0  ;;  %v7181_v32 = vadd.f32 %v7177_v25, %v8728_v36  ;;  %v7171_v50 = vpop.f32.mrf.mxu1 }
 0xd99   :  { %v7195_v13 = vrot.slane %v7194_v57, 4  ;;  %v7178_v33 = vmul.f32 0.85, %v7171_v50 }
 0xd9a   :  { %v7191_v21 = vadd.f32 %v7190_v59, %v7189_v52  ;;  %v7185_v34 = vmax.f32 %v7181_v32, 0.0  ;;  %v8258_v31 = vpop.f32.mrf.mxu1 }
 0xd9b   :  { %v7196_v43 = vadd.f32 %v7195_v13, %v7194_v57  ;;  %v7182_v39 = vadd.f32 %v7178_v33, %v8728_v36 }
 0xd9c   :  { %v7192_v23 = vrot.slane %v7191_v21, 1  ;;  %v7201_v38 = vsel %vm1210_vm5, %v7185_v34, 0.0 }
 0xd9d   :  { %v7197_v12 = vrot.slane %v7196_v43, 2  ;;  %v7202_v6 = vrot.slane %v7201_v38, 4  ;;  %v7186_v51 = vmax.f32 %v7182_v39, 0.0 }
 0xd9e   :  { %v7193_v22 = vadd.f32 %v7192_v23, %v7191_v21 }
 0xd9f   :  { %v7198_v28 = vadd.f32 %v7197_v12, %v7196_v43  ;;  %v7203_v63 = vadd.f32 %v7202_v6, %v7201_v38  ;;  %v7208_v27 = vsel %vm1210_vm5, %v7186_v51, 0.0 }
 0xda0   :  { %v7215_v10 = vmul.f32 0.2, %v7193_v22  ;;  %v7209_v8 = vrot.slane %v7208_v27, 4 }
 0xda1   :  { %v7199_v19 = vrot.slane %v7198_v28, 1  ;;  %v7204_v48 = vrot.slane %v7203_v63, 2 }
 0xda2   :  { %v7219_v49 = vadd.f32 1e-06, %v7215_v10  ;;  %v7210_v53 = vadd.f32 %v7209_v8, %v7208_v27 }
 0xda3   :  { %v7200_v42 = vadd.f32 %v7199_v19, %v7198_v28  ;;  %v7205_v1 = vadd.f32 %v7204_v48, %v7203_v63 }
 0xda4   :  { %8464 = vrcp.f32 %v7219_v49  ;;  %v7211_v36 = vrot.slane %v7210_v53, 2 }
 0xda5   :  { %v7216_v54 = vmul.f32 0.2, %v7200_v42  ;;  %v7206_v46 = vrot.slane %v7205_v1, 1 }
 0xda6   :  { %v7212_v60 = vadd.f32 %v7211_v36, %v7210_v53 }
 0xda7   :  { %v7220_v17 = vadd.f32 1e-06, %v7216_v54  ;;  %v7207_v29 = vadd.f32 %v7206_v46, %v7205_v1 }
 0xda8   :  { %v7213_v18 = vrot.slane %v7212_v60, 1 }
 0xda9   :  { %8466 = vrcp.f32 %v7220_v17  ;;  %v7217_v58 = vmul.f32 0.2, %v7207_v29 }
 0xdaa   :  { %v7214_v3 = vadd.f32 %v7213_v18, %v7212_v60 }
 0xdab   :  { %v7221_v55 = vadd.f32 1e-06, %v7217_v58 }
 0xdac   :  { %v7218_v4 = vmul.f32 0.2, %v7214_v3 }
 0xdad   :  { %8468 = vrcp.f32 %v7221_v55 }
 0xdae   :  { %v7222_v47 = vadd.f32 1e-06, %v7218_v4 }
 0xdb0   :  { %8470 = vrcp.f32 %v7222_v47 }
 0xdb1   :  { %v8465_v5 = vpop.eup %8464 }
 0xdb2   :  { %v9665_v11 = vmul.f32 %v8465_v5, %v7183_v7 }
 0xdb4   :  { %v7243_v40 = vand.u32 2147483647, %v9665_v11  ;;  %v7231_v46 = vmax.f32 %v9665_v11, 0.0  ;;  %vm7235_vm15 = vcmp.ne.f32.partialorder %v9665_v11, %v9665_v11 }
 0xdb6   :  { %v8467_v16 = vpop.eup %8466  ;;  %v7247_v62 = vsub.f32 0.0, %v7243_v40 }
 0xdb7   :  { %v9668_v35 = vmul.f32 %v8467_v16, %v7184_v41 }
 0xdb8   :  { %v7251_v61 = vmul.f32 1.442695, %v7247_v62 }
 0xdb9   :  { %v7244_v37 = vand.u32 2147483647, %v9668_v35  ;;  %v7232_v40 = vmax.f32 %v9668_v35, 0.0  ;;  %vm7236_vm9 = vcmp.ne.f32.partialorder %v9668_v35, %v9668_v35 }
 0xdba   :  { %v8469_v24 = vpop.eup %8468  ;;  %8472 = vpow2.f32 %v7251_v61 }
 0xdbb   :  { %v7248_v44 = vsub.f32 0.0, %v7244_v37  ;;  %v9671_v52 = vmul.f32 %v8469_v24, %v7185_v34 }
 0xdbd   :  { %v8471_v25 = vpop.eup %8470  ;;  %v7253_v30 = vmul.f32 1.442695, %v7248_v44  ;;  %v7245_v59 = vand.u32 2147483647, %v9671_v52  ;;  %v7233_v47 = vmax.f32 %v9671_v52, 0.0  ;;  %vm7237_vm7 = vcmp.ne.f32.partialorder %v9671_v52, %v9671_v52 }
 0xdbe   :  { %v9674_v7 = vmul.f32 %v8471_v25, %v7186_v51  ;;  %v7959_v25 = vld [vmem:[%s9859_s4 + $0x38] sm:$0x1] }
 0xdbf   :  { %8474 = vpow2.f32 %v7253_v30  ;;  %v7249_v57 = vsub.f32 0.0, %v7245_v59  ;;  %8260 = vmatpush3.msk.msra.mxu0 %vm7394_vm6, %v7959_v25  ;;  %v7597_v25 = vld [vmem:[%s9861_s5 + $0x30] sm:$0xff] }
 0xdc0   :  { %v7246_v32 = vand.u32 2147483647, %v9674_v7  ;;  %v7234_v44 = vmax.f32 %v9674_v7, 0.0  ;;  %8261 = vmatprep.subr.mxu0 %v8490_v2  ;;  %vm7238_vm1 = vcmp.ne.f32.partialorder %v9674_v7, %v9674_v7 }
 0xdc1   :  { %v7255_v41 = vmul.f32 1.442695, %v7249_v57 }
 0xdc2   :  { %v7250_v50 = vsub.f32 0.0, %v7246_v32 }
 0xdc3   :  { %8476 = vpow2.f32 %v7255_v41 }
 0xdc4   :  { %v7257_v13 = vmul.f32 1.442695, %v7250_v50 }
 0xdc6   :  { %8478 = vpow2.f32 %v7257_v13 }
 0xdc7   :  { %v8473_v33 = vpop.eup %8472 }
 0xdc8   :  { %v7259_v21 = vadd.f32 1.0, %v8473_v33  ;;  %v7262_v12 = vmul.f32 -0.5, %v8473_v33  ;;  %v7265_v63 = vand.u32 2147483647, %v8473_v33 }
 0xdca   :  { %8480 = vlog2.f32 %v7259_v21  ;;  %v7263_v22 = vadd.f32 1.0, %v7262_v12  ;;  %vm7266_vm2 = vcmp.lt.f32.partialorder %v7265_v63, 0.0004427343  ;;  %v7384_v21 = vld [vmem:[%s9859_s4 + $0x18] sm:$0x1] }
 0xdcb   :  { %8271 = vmatpush3.msk.msra.mxu1 %vm7394_vm6, %v7384_v21 }
 0xdcc   :  { %v8475_v34 = vpop.eup %8474  ;;  %v7264_v48 = vmul.f32 %v8473_v33, %v7263_v22  ;;  %8272 = vmatprep.subr.mxu1 %v8490_v2 }
 0xdcd   :  { %v7268_v31 = vadd.f32 1.0, %v8475_v34  ;;  %v7271_v51 = vmul.f32 -0.5, %v8475_v34  ;;  %v7274_v49 = vand.u32 2147483647, %v8475_v34 }
 0xdcf   :  { %8482 = vlog2.f32 %v7268_v31  ;;  %v7272_v8 = vadd.f32 1.0, %v7271_v51  ;;  %vm9678_vm5 = vcmp.lt.f32.partialorder %v7274_v49, 0.0004427343  ;;  %v7956_v51 = vld [vmem:[%s9859_s4 + $0x20] sm:$0xff] }
 0xdd0   :  { %v8477_v43 = vpop.eup %8476 }
 0xdd1   :  { %v7277_v39 = vadd.f32 1.0, %v8477_v43  ;;  %v7280_v28 = vmul.f32 -0.5, %v8477_v43  ;;  %v7283_v1 = vand.u32 2147483647, %v8477_v43  ;;  %v7273_v60 = vmul.f32 %v8475_v34, %v7272_v8  ;;  %v7957_v34 = vld [vmem:[%s9859_s4 + $0x28] sm:$0xff] }
 0xdd3   :  { %v8479_v23 = vpop.eup %8478  ;;  %8484 = vlog2.f32 %v7277_v39  ;;  %v7281_v53 = vadd.f32 1.0, %v7280_v28  ;;  %vm7284_vm14 = vcmp.lt.f32.partialorder %v7283_v1, 0.0004427343 }
 0xdd4   :  { %v7286_v38 = vadd.f32 1.0, %v8479_v23  ;;  %v7289_v19 = vmul.f32 -0.5, %v8479_v23  ;;  %v7292_v3 = vand.u32 2147483647, %v8479_v23 }
 0xdd5   :  { %v7282_v58 = vmul.f32 %v8477_v43, %v7281_v53 }
 0xdd6   :  { %8486 = vlog2.f32 %v7286_v38  ;;  %v7290_v17 = vadd.f32 1.0, %v7289_v19  ;;  %vm7293_vm8 = vcmp.lt.f32.partialorder %v7292_v3, 0.0004427343  ;;  %v3685_v19 = vrot.slane %v3676_v45, %v8577_v26 }
 0xdd7   :  { %v8481_v6 = vpop.eup %8480 }
 0xdd8   :  { %v7261_v27 = vmul.f32 0.6931472, %v8481_v6  ;;  %v7291_v37 = vmul.f32 %v8479_v23, %v7290_v17  ;;  %v7383_v23 = vld [vmem:[%s9859_s4 + $0x10] sm:$0xff] }
 0xdd9   :  { %8273 = vmatpush3.msra.mxu1 %v7383_v23  ;;  %v7609_v23 = vld [vmem:[%s9861_s5 + $0x90] sm:$0xff] }
 0xdda   :  { %v7267_v36 = vsel %vm7266_vm2, %v7264_v48, %v7261_v27  ;;  %8274 = vmatprep.subr.mxu1 %v8490_v2  ;;  %v7381_v27 = vld [vmem:[%s9859_s4] sm:$0xff]  ;;  %vm7615_vm2 = vcmask 31744  }
 0xddb   :  { %v7295_v55 = vadd.f32 %v7267_v36, %v7231_v46  ;;  %v7544_v48 = vld [vmem:[%s9860_s3] sm:$0xf] }
 0xddc   :  { %v8483_v10 = vpop.eup %8482  ;;  %v9755_v49 = vsel %vm30_vm4, 1.0, %v7544_v48  ;;  %vm7390_vm4 = vcmask 203776   ;;  %v7769_v48 = vsub.s32 2, %v8571_v15 }
 0xddd   :  { %v7270_v42 = vmul.f32 0.6931472, %v8483_v10  ;;  %v7299_v59 = vsel %vm7235_vm15, %v9665_v11, %v7295_v55  ;;  %v7547_v53 = vsel %vm7546_vm10, %v9755_v49, 0.0 }
 0xddf   :  { %v7276_v4 = vsel %vm9678_vm5, %v7273_v60, %v7270_v42  ;;  %v3692_v42 = vpop.permute.xlu0 %3691  ;;  %vm7845_vm5 = vcmask 11264  }
 0xde0   :  { %v8485_v54 = vpop.eup %8484  ;;  %v7296_v24 = vadd.f32 %v7276_v4, %v7232_v40  ;;  %v7604_v40 = vld [vmem:[%s9861_s5 + $0x68] sm:$0xff] }
 0xde1   :  { %v7279_v18 = vmul.f32 0.6931472, %v8485_v54 }
 0xde2   :  { %v7300_v13 = vsel %vm7236_vm9, %v9668_v35, %v7296_v24  ;;  %v7599_v24 = vld [vmem:[%s9861_s5 + $0x40] sm:$0xff] }
 0xde3   :  { %v8487_v5 = vpop.eup %8486  ;;  %v7285_v16 = vsel %vm7284_vm14, %v7282_v58, %v7279_v18  ;;  %v3688_v1 = vpop.permute.xlu0 %3687 }
 0xde4   :  { %v7297_v62 = vadd.f32 %v7285_v16, %v7233_v47  ;;  %v7288_v61 = vmul.f32 0.6931472, %v8487_v5  ;;  %v3702_v14 = vsel %vm766_vm3, %v9166_v9, %v3688_v1  ;;  %v7606_v47 = vld [vmem:[%s9861_s5 + $0x78] sm:$0xff]  ;;  %v7605_v5 = vld [vmem:[%s9861_s5 + $0x70] sm:$0xff]  ;;  %v7603_v16 = vld [vmem:[%s9861_s5 + $0x60] sm:$0xff] }
 0xde5   :  { %v3704_v29 = vsel %vm3703_vm11, %v3702_v14, %v3692_v42 }
 0xde6   :  { %v7294_v30 = vsel %vm7293_vm8, %v7291_v37, %v7288_v61  ;;  %v7301_v57 = vsel %vm7237_vm7, %v9671_v52, %v7297_v62  ;;  %v7958_v52 = vld [vmem:[%s9859_s4 + $0x30] sm:$0xff]  ;;  %v7602_v62 = vld [vmem:[%s9861_s5 + $0x58] sm:$0xff]  ;;  %v7600_v37 = vld [vmem:[%s9861_s5 + $0x48] sm:$0xff] }
 0xde7   :  { %v7298_v32 = vadd.f32 %v7294_v30, %v7234_v44  ;;  %v7304_v41 = vcombine.high %v7299_v59, %v7301_v57  ;;  %v7303_v50 = vcombine.low %v7299_v59, %v7301_v57  ;;  %8262 = vmatpush3.msra.mxu0 %v7958_v52  ;;  %v3696_v36 = vpop.permute.xlu0 %3695  ;;  %v7601_v61 = vld [vmem:[%s9861_s5 + $0x50] sm:$0xff]  ;;  %v7598_v44 = vld [vmem:[%s9861_s5 + $0x38] sm:$0xff]  ;;  %v7596_v30 = vld [vmem:[%s9861_s5 + $0x28] sm:$0xff] }
 0xde8   :  { %8263 = vmatprep.subr.mxu0 %v8490_v2  ;;  %v3706_v18 = vsel %vm3705_vm13, %v3704_v29, %v3696_v36  ;;  %v7595_v59 = vld [vmem:[%s9861_s5 + $0x20] sm:$0xff]  ;;  %v7594_v57 = vld [vmem:[%s9861_s5 + $0x18] sm:$0xff] }
 0xde9   :  { %v7302_v33 = vsel %vm7238_vm1, %v9674_v7, %v7298_v32  ;;  %v7318_v11 = vrot.slane %v7304_v41, %v8574_v20  ;;  %v7311_v43 = vrot.slane %v7303_v50, %v8574_v20  ;;  %8264 = vmatpush3.msra.mxu0 %v7957_v34  ;;  %v7593_v32 = vld [vmem:[%s9861_s5 + $0x10] sm:$0xff]  ;;  %v7587_v50 = vsub.s32 0, %v8571_v15 }
 0xdea   :  { %v7320_v31 = vcombine.high %v7300_v13, %v7302_v33  ;;  %v7319_v35 = vcombine.low %v7300_v13, %v7302_v33  ;;  %8265 = vmatprep.subr.mxu0 %v8490_v2 }
 0xdeb   :  { %8266 = vmatpush3.msra.mxu0 %v7956_v51 }
 0xdec   :  { %v7334_v7 = vrot.slane %v7320_v31, %v8574_v20  ;;  %v7327_v39 = vrot.slane %v7319_v35, %v8574_v20  ;;  %v7382_v20 = vld [vmem:[%s9859_s4 + $0x8] sm:$0xff]  ;;  %8281 = vmatprep.subr.mxu0 %v8490_v2 }
 0xded   :  { %8275 = vmatpush3.msra.mxu1 %v7382_v20  ;;  %v7592_v35 = vld [vmem:[%s9861_s5 + $0x8] sm:$0xff] }
 0xdee   :  { %v7351_v38 = vcombine.low %v7318_v11, %v7334_v7  ;;  %v7336_v12 = vcombine.high %v7311_v43, %v7327_v39  ;;  %v7335_v6 = vcombine.low %v7311_v43, %v7327_v39  ;;  %8276 = vmatprep.subr.mxu1 %v8490_v2  ;;  %v7591_v7 = vld [vmem:[%s9861_s5] sm:$0xff]  ;;  %v7610_v39 = vld [vmem:[%s9861_s5 + $0x98] sm:$0xff] }
 0xdef   :  { %8277 = vmatpush3.msra.mxu1 %v7381_v27 }
 0xdf0   :  { %v7360_v22 = vrot.slane %v7351_v38, %v8577_v26  ;;  %v7350_v28 = vrot.slane %v7336_v12, %v8577_v26  ;;  %v7343_v63 = vrot.slane %v7335_v6, %v8577_v26  ;;  %8286 = vmatprep.subr.mxu1 %v8490_v2  ;;  %v7590_v38 = vld [vmem:[%s9862_s6] sm:$0x7] }
 0xdf1   :  { %v7614_v12 = vrot.slane %v7590_v38, %v7587_v50 }
 0xdf2   :  { %7374 = vrot.lane.b32.xlu1 %v7360_v22, %s8501_s24  ;;  %7366 = vrot.lane.b32.xlu0 %v7350_v28, %s8498_s0  ;;  %v7352_v10 = vcombine.high %v7343_v63, %v8490_v2  ;;  %v7353_v8 = vcombine.high %v7350_v28, %v8490_v2  ;;  %v7608_v22 = vld [vmem:[%s9861_s5 + $0x88] sm:$0xff]  ;;  %v7607_v28 = vld [vmem:[%s9861_s5 + $0x80] sm:$0xff] }
 0xdf6   :  { %7362 = vrot.lane.b32.xlu0 %v7352_v10, %s8499_s25 }
 0xdfa   :  { %7370 = vrot.lane.b32.xlu0 %v7353_v8, %s8500_s26 }
 0xdfe   :  { %3699 = vrot.lane.b32.xlu0 %v3685_v19, %s8501_s24 }
 0xe1d   :  { %7548 = vadd.xlane.f32.xlu0 %v7547_v53 }
 0xe64   :  { %v7367_v54 = vpop.permute.xlu0 %7366  ;;  %v7375_v46 = vpop.permute.xlu1 %7374 }
 0xe68   :  { %v7363_v0 = vpop.permute.xlu0 %7362 }
 0xe69   :  { %v7377_v26 = vsel %vm766_vm3, %v7343_v63, %v7363_v0  ;;  %vm7619_vm3 = vcmask 1043456   ;;  %v7695_v63 = vsub.s32 1, %v8571_v15 }
 0xe6a   :  { %v7378_v56 = vsel %vm3703_vm11, %v7377_v26, %v7367_v54 }
 0xe6b   :  { %v7696_v27 = vrot.slane %v7590_v38, %v7695_v63 }
 0xe6c   :  { %v7371_v45 = vpop.permute.xlu0 %7370 }
 0xe6d   :  { %v7379_v60 = vsel %vm3705_vm13, %v7378_v56, %v7371_v45 }
 0xe6e   :  { %v7380_v17 = vsel %vm3707_vm12, %v7379_v60, %v7375_v46 }
 0xe6f   :  { %8268 = vmatmul.mubr.msk.f32.vlgmr.msra.gmra.mxu0 %vm7390_vm4, %v7380_v17 }
 0xe70   :  { %v3700_v58 = vpop.permute.xlu0 %3699  ;;  %8283 = vmatprep.mubr.msk.f32.mxu0 %vm8491_vm0, %v8490_v2 }
 0xe71   :  { %v3708_v3 = vsel %vm3707_vm12, %v3706_v18, %v3700_v58 }
 0xe72   :  { %8279 = vmatmul.mubr.msk.f32.vlgmr.msra.gmra.mxu1 %vm7390_vm4, %v3708_v3 }
 0xe73   :  { %8318 = vmatprep.mubr.msk.f32.mxu1 %vm8491_vm0, %v8490_v2  ;;  %8287 = vmatpush3.msra.mxu1 %v7606_v47 }
 0xe74   :  { %8288 = vmatprep.subr.mxu1 %v8490_v2 }
 0xe75   :  { %8289 = vmatpush3.msra.mxu1 %v7605_v5 }
 0xe76   :  { %8290 = vmatprep.subr.mxu1 %v8490_v2 }
 0xe77   :  { %8291 = vmatpush3.msra.mxu1 %v7604_v40 }
 0xe78   :  { %8292 = vmatprep.subr.mxu1 %v8490_v2 }
 0xe79   :  { %8293 = vmatpush3.msra.mxu1 %v7603_v16 }
 0xe7a   :  { %8294 = vmatprep.subr.mxu1 %v8490_v2 }
 0xe7b   :  { %8295 = vmatpush3.msra.mxu1 %v7602_v62 }
 0xe7c   :  { %8296 = vmatprep.subr.mxu1 %v8490_v2 }
 0xe7d   :  { %8297 = vmatpush3.msra.mxu1 %v7601_v61 }
 0xe7e   :  { %8298 = vmatprep.subr.mxu1 %v8490_v2 }
 0xe7f   :  { %8299 = vmatpush3.msra.mxu1 %v7600_v37 }
 0xe80   :  { %8300 = vmatprep.subr.mxu1 %v8490_v2 }
 0xe81   :  { %8301 = vmatpush3.msra.mxu1 %v7599_v24 }
 0xe82   :  { %8302 = vmatprep.subr.mxu1 %v8490_v2 }
 0xe83   :  { %8303 = vmatpush3.msra.mxu1 %v7598_v44 }
 0xe84   :  { %8304 = vmatprep.subr.mxu1 %v8490_v2 }
 0xe85   :  { %8305 = vmatpush3.msra.mxu1 %v7597_v25 }
 0xe86   :  { %8306 = vmatprep.subr.mxu1 %v8490_v2 }
 0xe87   :  { %8307 = vmatpush3.msra.mxu1 %v7596_v30 }
 0xe88   :  { %8308 = vmatprep.subr.mxu1 %v8490_v2 }
 0xe89   :  { %8309 = vmatpush3.msra.mxu1 %v7595_v59 }
 0xe8a   :  { %8310 = vmatprep.subr.mxu1 %v8490_v2 }
 0xe8b   :  { %8311 = vmatpush3.msra.mxu1 %v7594_v57 }
 0xe8c   :  { %8312 = vmatprep.subr.mxu1 %v8490_v2 }
 0xe8d   :  { %8313 = vmatpush3.msra.mxu1 %v7593_v32 }
 0xe8e   :  { %8314 = vmatprep.subr.mxu1 %v8490_v2 }
 0xe8f   :  { %8315 = vmatpush3.msra.mxu1 %v7592_v35 }
 0xe90   :  { %8316 = vmatprep.subr.mxu1 %v8490_v2 }
 0xe91   :  { %8317 = vmatpush3.msra.mxu1 %v7591_v7 }
 0xea6   :  { %v7549_v9 = vpop.xlane.xlu0 %7548 }
 0xea7   :  { %v7550_v55 = vmax.f32 %v7549_v9, 1.0 }
 0xea9   :  { %8488 = vrsqrt.f32 %v7550_v55 }
 0xeb6   :  { %v8489_v4 = vpop.eup %8488 }
 0xeb7   :  { %7553 = vxpose.xlu1.b32.start.end [1/1] (short) (narrow) %v8489_v4, 8  ;;  %v7552_v21 = vmul.f32 %v8489_v4, %v9755_v49  ;;  %v7770_v49 = vrot.slane %v7590_v38, %v7769_v48 }
 0xf2f   :  { %v7464_v41 = vpop.f32.mrf.mxu0 }
 0xf31   :  { %v8269_v13 = vpop.f32.mrf.mxu0 }
 0xf32   :  { %v7540_v33 = vpop.f32.mrf.mxu1 }
 0xf33   :  { %v7541_v11 = vadd.f32 %v7540_v33, %v7464_v41  ;;  %v7569_v52 = vpop.trf.xlu1 }
 0xf34   :  { %v7588_v34 = vrot.slane %v7569_v52, %v7587_v50  ;;  %v8280_v31 = vpop.f32.mrf.mxu1 }
 0xf35   :  { %8282 = vmatpush3.msk.msra.mxu0 %vm7619_vm3, %v7541_v11 }
 0xf36   :  { %v7589_v43 = vmul.f32 %v7588_v34, %v7552_v21  ;;  %8321 = vmatprep.subr.mxu0 %v8490_v2 }
 0xf38   :  { %8284 = vmatmul.mubr.msk.f32.vlgmr.msra.gmra.mxu0 %vm7615_vm2, %v7589_v43 }
 0xf39   :  { %8329 = vmatprep.mubr.msk.f32.mxu0 %vm8491_vm0, %v8490_v2  ;;  %8322 = vmatpush3.msra.mxu0 %v7610_v39  ;;  %vm7771_vm0 = vcmask 261120  }
 0xf3a   :  { %8323 = vmatprep.subr.mxu0 %v8490_v2 }
 0xf3b   :  { %8324 = vmatpush3.msra.mxu0 %v7609_v23 }
 0xf3c   :  { %8325 = vmatprep.subr.mxu0 %v8490_v2 }
 0xf3d   :  { %8326 = vmatpush3.msra.mxu0 %v7608_v22 }
 0xf3e   :  { %8327 = vmatprep.subr.mxu0 %v8490_v2 }
 0xf3f   :  { %8328 = vmatpush3.msra.mxu0 %v7607_v28 }
 0xff8   :  { %v7689_v6 = vpop.f32.mrf.mxu0 }
 0xff9   :  { %v7690_v51 = vadd.f32 %v7689_v6, %v7614_v12 }
 0xffa   :  { %v8285_v20 = vpop.f32.mrf.mxu0 }
 0xffb   :  { %8319 = vmatmul.mubr.f32.vlgmr.msra.gmra.mxu1 %v7690_v51 }
0x10bb   :  { %v7763_v10 = vpop.f32.mrf.mxu1 }
0x10bc   :  { %v7764_v8 = vadd.f32 %v7763_v10, %v7696_v27 }
0x10bd   :  { %v8320_v19 = vpop.f32.mrf.mxu1 }
0x10be   :  { %8330 = vmatmul.mubr.msk.f32.vlgmr.msra.gmra.mxu0 %vm7771_vm0, %v7764_v8 }
0x117e   :  { %v7841_v53 = vpop.f32.mrf.mxu0 }
0x117f   :  { %v7842_v42 = vadd.f32 %v7841_v53, %v7770_v49 }
0x1180   :  { %v8331_v2 = vpop.f32.mrf.mxu0 }
0x1181   :  { %7846 = vst.msk [vmem:[%s9863_s7] sm:$0xf] %vm7845_vm5, %v7842_v42 }

</bundles_post_ra>
